<compile_context>
chip_gen: v5e
topology: v5e:2x2
jax: 0.10.0
libtpu: 0.0.40
codegen_flags: <defaults>
</compile_context>

<pallas_src>
import functools
import math

import jax
import jax.numpy as jnp
from jax.experimental import pallas as pl
from jax.experimental.pallas import tpu as pltpu

_NEG_INF = -1e30
_LN_EPS = 1e-5


def _round_up(x, m):
    return (x + m - 1) // m * m


def _pick_tile(dp, tmax, align):
    # largest multiple of `align` <= min(tmax, dp) that divides dp
    # (dp is guaranteed to be a multiple of `align`).
    t = min(tmax, dp)
    while dp % t:
        t -= align
    return t


def _select_linear_tiles():
    kind = ""
    try:
        kind = jax.devices()[0].device_kind.lower()
    except Exception:
        pass
    if "v7" in kind or "7x" in kind:
        # v7x: 64 MiB VMEM / TensorCore -> keep tiles modest
        return {"tm": 256, "tn": 256, "tk": 512}
    # v5e / v6e: 128 MiB VMEM -> larger K/N tiles cut per-grid-step overhead
    return {"tm": 256, "tn": 512, "tk": 1024}


_LIN_TILES = _select_linear_tiles()


# ------------------- tiled linear (+ optional fused add+LayerNorm) ----------

def _linear_kernel(x_ref, w_ref, b_ref, *rest, activation, n_valid, fuse_ln):
    if fuse_ln:
        r_ref, g_ref, bt_ref, o_ref, acc_ref = rest
    else:
        o_ref, acc_ref = rest

    @pl.when(pl.program_id(2) == 0)
    def _():
        acc_ref[...] = jnp.zeros_like(acc_ref)

    acc_ref[...] += jnp.dot(x_ref[...], w_ref[...],
                            preferred_element_type=jnp.float32)

    @pl.when(pl.program_id(2) == pl.num_programs(2) - 1)
    def _():
        y = acc_ref[...] + b_ref[...]
        if activation == "relu":
            y = jnp.maximum(y, 0.0)
        if fuse_ln:
            y = y + r_ref[...].astype(jnp.float32)
            tn = y.shape[-1]
            if n_valid == tn:
                mean = jnp.mean(y, axis=-1, keepdims=True)
                cen = y - mean
                var = jnp.mean(cen * cen, axis=-1, keepdims=True)
            else:
                # LayerNorm statistics over the true feature width only
                # (padded lanes of y are zero but must not bias mean/var).
                col = jax.lax.broadcasted_iota(jnp.int32, y.shape, 1)
                valid = col < n_valid
                inv_n = 1.0 / n_valid
                mean = jnp.sum(jnp.where(valid, y, 0.0), axis=-1,
                               keepdims=True) * inv_n
                cen = jnp.where(valid, y - mean, 0.0)
                var = jnp.sum(cen * cen, axis=-1, keepdims=True) * inv_n
            y = (y - mean) * jax.lax.rsqrt(var + _LN_EPS)
            y = y * g_ref[...] + bt_ref[...]
        o_ref[...] = y.astype(o_ref.dtype)


def linear(x, w, b, activation=None, *, residual=None, ln=None,
           out_dtype=jnp.bfloat16):
    """PyTorch nn.Linear semantics; w is stored pre-transposed (Din, Dout) bf16.

    If `ln=(gamma, beta)` is given, the kernel fuses LayerNorm(residual + y)
    into the finalize step (single N tile)."""
    lead = x.shape[:-1]
    K = x.shape[-1]
    N = w.shape[1]
    x2 = x.reshape(-1, K)
    if x2.dtype != jnp.bfloat16:
        x2 = x2.astype(jnp.bfloat16)
    M = x2.shape[0]

    fuse_ln = ln is not None
    cfg = _LIN_TILES
    Kp = _round_up(K, 128)
    Np = _round_up(N, 128)
    tk = _pick_tile(Kp, cfg["tk"], 128)
    tn = Np if fuse_ln else _pick_tile(Np, cfg["tn"], 128)
    tm = min(cfg["tm"], _round_up(M, 8))
    Mp = _round_up(M, tm)

    # padding is a no-op when dims are already (8,128)-aligned.
    if (Mp, Kp) != (M, K):
        x2 = jnp.pad(x2, ((0, Mp - M), (0, Kp - K)))
    wp = w if w.shape == (Kp, Np) else jnp.pad(
        w, ((0, Kp - w.shape[0]), (0, Np - w.shape[1])))
    bp = b if b.shape[0] == Np else jnp.pad(b, (0, Np - b.shape[0]))
    bp = bp.reshape(1, Np).astype(jnp.float32)

    in_specs = [
        pl.BlockSpec((tm, tk), lambda i, j, k: (i, k)),
        pl.BlockSpec((tk, tn), lambda i, j, k: (k, j)),
        pl.BlockSpec((1, tn), lambda i, j, k: (0, j)),
    ]
    operands = [x2, wp, bp]

    if fuse_ln:
        gamma, beta = ln
        r2 = residual.reshape(-1, N)
        if r2.dtype != jnp.bfloat16:
            r2 = r2.astype(jnp.bfloat16)
        if (Mp, Np) != (M, N):
            r2 = jnp.pad(r2, ((0, Mp - M), (0, Np - N)))
        gp = gamma if gamma.shape[0] == Np else jnp.pad(gamma, (0, Np - N))
        btp = beta if beta.shape[0] == Np else jnp.pad(beta, (0, Np - N))
        in_specs += [
            pl.BlockSpec((tm, tn), lambda i, j, k: (i, j)),
            pl.BlockSpec((1, tn), lambda i, j, k: (0, j)),
            pl.BlockSpec((1, tn), lambda i, j, k: (0, j)),
        ]
        operands += [r2,
                     gp.reshape(1, Np).astype(jnp.float32),
                     btp.reshape(1, Np).astype(jnp.float32)]

    # right-sized scoped VMEM (double-buffered tiles + accumulator + headroom)
    ob = jnp.dtype(out_dtype).itemsize
    need = (2 * tm * tk * 2 + 2 * tk * tn * 2 + 2 * tm * tn * ob
            + tm * tn * 4 + 4 * tn * 4)
    if fuse_ln:
        need += 2 * tm * tn * 2 + 8 * tn * 4
    vmem_limit = min(max(int(need * 1.5) + (2 << 20), 16 << 20), 64 << 20)

    out = pl.pallas_call(
        functools.partial(_linear_kernel, activation=activation, n_valid=N,
                          fuse_ln=fuse_ln),
        grid=(Mp // tm, Np // tn, Kp // tk),
        in_specs=in_specs,
        out_specs=pl.BlockSpec((tm, tn), lambda i, j, k: (i, j)),
        out_shape=jax.ShapeDtypeStruct((Mp, Np), out_dtype),
        scratch_shapes=[pltpu.VMEM((tm, tn), jnp.float32)],
        compiler_params=pltpu.CompilerParams(
            dimension_semantics=("parallel", "parallel", "arbitrary"),
            vmem_limit_bytes=vmem_limit),
    )(*operands)

    if (Mp, Np) != (M, N):
        out = out[:M, :N]
    return out.reshape(lead + (N,))


# ------------------- attention: merged-head, flash-style over Lk ------------

def _flash_attn_kernel(kpad_ref, q_ref, k_ref, v_ref, o_ref,
                       m_ref, l_ref, acc_ref, *, scale, causal,
                       n_heads, head_dim):
    ki = pl.program_id(2)

    @pl.when(ki == 0)
    def _():
        m_ref[...] = jnp.full_like(m_ref, _NEG_INF)
        l_ref[...] = jnp.zeros_like(l_ref)
        acc_ref[...] = jnp.zeros_like(acc_ref)

    q = q_ref[0]                       # (tq, hidden) bf16
    k = k_ref[0]                       # (tk, hidden) bf16
    v = v_ref[0]                       # (tk, hidden) bf16
    tq = q.shape[0]
    tk = k.shape[0]

    keep = kpad_ref[0] > 0.0           # (1, tk)
    if causal:
        qpos = pl.program_id(1) * tq + jax.lax.broadcasted_iota(
            jnp.int32, (tq, tk), 0)
        kpos = ki * tk + jax.lax.broadcasted_iota(jnp.int32, (tq, tk), 1)
        keep = jnp.logical_and(keep, kpos <= qpos)   # (tq, tk)

    for h in range(n_heads):                          # static unrolled head loop
        sl = slice(h * head_dim, (h + 1) * head_dim)  # static lane slice
        s = jax.lax.dot_general(q[:, sl], k[:, sl], (((1,), (1,)), ((), ())),
                                preferred_element_type=jnp.float32) * scale
        s = jnp.where(keep, s, _NEG_INF)
        m_prev = m_ref[:, h:h + 1]                    # (tq, 1)
        m_new = jnp.maximum(m_prev, jnp.max(s, axis=-1, keepdims=True))
        p = jnp.where(keep, jnp.exp(s - m_new), 0.0)  # (tq, tk)
        alpha = jnp.exp(m_prev - m_new)
        l_ref[:, h:h + 1] = alpha * l_ref[:, h:h + 1] + jnp.sum(
            p, axis=-1, keepdims=True)
        acc_ref[:, sl] = alpha * acc_ref[:, sl] + jax.lax.dot_general(
            p.astype(jnp.bfloat16), v[:, sl], (((1,), (0,)), ((), ())),
            preferred_element_type=jnp.float32)
        m_ref[:, h:h + 1] = m_new

    @pl.when(ki == pl.num_programs(2) - 1)
    def _():
        for h in range(n_heads):
            sl = slice(h * head_dim, (h + 1) * head_dim)
            l_h = l_ref[:, h:h + 1]
            l_h = jnp.where(l_h <= 0.0, 1.0, l_h)     # fully-masked row guard
            o_ref[0, :, sl] = (acc_ref[:, sl] *
                               pl.reciprocal(l_h, approx=True)).astype(o_ref.dtype)


def _attn_map_kernel(kpad_ref, q_ref, k_ref, v_ref, o_ref, a_ref, *,
                     scale, causal, n_heads, head_dim):
    q = q_ref[0]                       # (tq, hidden) bf16
    k = k_ref[0]                       # (Lk, hidden) bf16
    v = v_ref[0]
    tq = q.shape[0]
    lk = k.shape[0]

    keep = kpad_ref[0] > 0.0           # (1, Lk)
    if causal:
        qpos = pl.program_id(1) * tq + jax.lax.broadcasted_iota(
            jnp.int32, (tq, lk), 0)
        kpos = jax.lax.broadcasted_iota(jnp.int32, (tq, lk), 1)
        keep = jnp.logical_and(keep, kpos <= qpos)

    for h in range(n_heads):
        sl = slice(h * head_dim, (h + 1) * head_dim)
        s = jax.lax.dot_general(q[:, sl], k[:, sl], (((1,), (1,)), ((), ())),
                                preferred_element_type=jnp.float32) * scale
        s = jnp.where(keep, s, _NEG_INF)
        s = s - jnp.max(s, axis=-1, keepdims=True)
        p = jnp.exp(s)
        # exact division: these probabilities are returned to the caller
        attn = p / jnp.sum(p, axis=-1, keepdims=True)
        a_ref[0, h] = attn.astype(a_ref.dtype)
        o_ref[0, :, sl] = jax.lax.dot_general(
            attn.astype(jnp.bfloat16), v[:, sl], (((1,), (0,)), ((), ())),
            preferred_element_type=jnp.float32).astype(o_ref.dtype)


def scaled_dot_attention(Q, K, V, kpad, n_heads, causal, need_attn):
    # Q: (B, Lq, hidden) bf16   K, V: (B, Lk, hidden) bf16   kpad: (B, 1, Lk) f32
    B, Lq, hidden = Q.shape
    Lk = K.shape[1]
    head_dim = hidden // n_heads
    scale = 1.0 / math.sqrt(head_dim)

    Q = Q.astype(jnp.bfloat16)
    K = K.astype(jnp.bfloat16)
    V = V.astype(jnp.bfloat16)

    tq = min(128, _round_up(Lq, 8))
    Lqp = _round_up(Lq, tq)
    if need_attn or _round_up(Lk, 8) <= 512:
        tk = Lkp = _round_up(Lk, 8)          # single key tile
    else:
        Lkp = _round_up(Lk, 128)
        tk = _pick_tile(Lkp, 512, 128)

    def pad_seq(a, lp):
        if a.shape[1] == lp:
            return a
        return jnp.pad(a, ((0, 0), (0, lp - a.shape[1]), (0, 0)))

    Qp = pad_seq(Q, Lqp)
    Kp_ = pad_seq(K, Lkp)
    Vp = pad_seq(V, Lkp)
    kpadp = kpad if kpad.shape[2] == Lkp else jnp.pad(
        kpad, ((0, 0), (0, 0), (0, Lkp - Lk)))       # padded keys are masked out

    nq = Lqp // tq

    if need_attn:
        out, attn = pl.pallas_call(
            functools.partial(_attn_map_kernel, scale=scale, causal=causal,
                              n_heads=n_heads, head_dim=head_dim),
            grid=(B, nq),
            in_specs=[
                pl.BlockSpec((1, 1, Lkp), lambda b, qi: (b, 0, 0)),
                pl.BlockSpec((1, tq, hidden), lambda b, qi: (b, qi, 0)),
                pl.BlockSpec((1, Lkp, hidden), lambda b, qi: (b, 0, 0)),
                pl.BlockSpec((1, Lkp, hidden), lambda b, qi: (b, 0, 0)),
            ],
            out_specs=[
                pl.BlockSpec((1, tq, hidden), lambda b, qi: (b, qi, 0)),
                pl.BlockSpec((1, n_heads, tq, Lkp), lambda b, qi: (b, 0, qi, 0)),
            ],
            out_shape=[
                jax.ShapeDtypeStruct((B, Lqp, hidden), jnp.bfloat16),
                jax.ShapeDtypeStruct((B, n_heads, Lqp, Lkp), jnp.float32),
            ],
            compiler_params=pltpu.CompilerParams(
                dimension_semantics=("parallel", "parallel")),
        )(kpadp, Qp, Kp_, Vp)
        if (Lqp, Lkp) != (Lq, Lk):
            attn = attn[:, :, :Lq, :Lk]
    else:
        nk = Lkp // tk
        out = pl.pallas_call(
            functools.partial(_flash_attn_kernel, scale=scale, causal=causal,
                              n_heads=n_heads, head_dim=head_dim),
            grid=(B, nq, nk),
            in_specs=[
                pl.BlockSpec((1, 1, tk), lambda b, qi, ki: (b, 0, ki)),
                pl.BlockSpec((1, tq, hidden), lambda b, qi, ki: (b, qi, 0)),
                pl.BlockSpec((1, tk, hidden), lambda b, qi, ki: (b, ki, 0)),
                pl.BlockSpec((1, tk, hidden), lambda b, qi, ki: (b, ki, 0)),
            ],
            out_specs=pl.BlockSpec((1, tq, hidden), lambda b, qi, ki: (b, qi, 0)),
            out_shape=jax.ShapeDtypeStruct((B, Lqp, hidden), jnp.bfloat16),
            scratch_shapes=[
                pltpu.VMEM((tq, n_heads), jnp.float32),   # running max
                pltpu.VMEM((tq, n_heads), jnp.float32),   # running denom
                pltpu.VMEM((tq, hidden), jnp.float32),    # output accumulator
            ],
            compiler_params=pltpu.CompilerParams(
                dimension_semantics=("parallel", "parallel", "arbitrary")),
        )(kpadp, Qp, Kp_, Vp)
        attn = None

    if Lqp != Lq:
        out = out[:, :Lq, :]
    return out, attn


# ----------------------------- model (glue + kernels) ----------------------

def mha_context(p, query, key, value, kpad, causal, need_attn):
    hidden = p["hidden_dim"]
    if (key is query) and (value is query):
        # self-attention: one fused QKV projection.
        qkv = linear(query, p["wqkv"], p["bqkv"])
        Q = qkv[..., :hidden]
        K = qkv[..., hidden:2 * hidden]
        V = qkv[..., 2 * hidden:]
    else:
        # cross-attention: Q from query, fused K/V projection from key(==value).
        Q = linear(query, p["wq"], p["bq"])
        kv = linear(key, p["wkv"], p["bkv"])
        K = kv[..., :hidden]
        V = kv[..., hidden:]
    return scaled_dot_attention(Q, K, V, kpad, p["n_heads"], causal, need_attn)


def positionwise_ff(p, x):
    # second linear's residual-add + LayerNorm is fused at the call site
    return linear(x, p["ff_w1"], p["ff_b1"], activation="relu")


def encoder_layer_forward(p, x, src_kpad):
    sa = p["self_attn"]
    ctx, _ = mha_context(sa, x, x, x, src_kpad, causal=False, need_attn=False)
    x = linear(ctx, sa["wo"], sa["bo"], residual=x,
               ln=(p["ln1_g"], p["ln1_b"]))
    h = positionwise_ff(p, x)
    x = linear(h, p["ff_w2"], p["ff_b2"], residual=x,
               ln=(p["ln2_g"], p["ln2_b"]))
    return x


def decoder_layer_forward(p, x, enc_src, tgt_kpad, src_kpad, need_attn):
    sa = p["self_attn"]
    ctx, _ = mha_context(sa, x, x, x, tgt_kpad, causal=True, need_attn=False)
    x = linear(ctx, sa["wo"], sa["bo"], residual=x,
               ln=(p["ln1_g"], p["ln1_b"]))
    ca = p["cross_attn"]
    ctx, attention = mha_context(ca, x, enc_src, enc_src, src_kpad,
                                 causal=False, need_attn=need_attn)
    x = linear(ctx, ca["wo"], ca["bo"], residual=x,
               ln=(p["ln2_g"], p["ln2_b"]))
    h = positionwise_ff(p, x)
    x = linear(h, p["ff_w2"], p["ff_b2"], residual=x,
               ln=(p["ln3_g"], p["ln3_b"]))
    return x, attention


def encoder_forward(p, src, src_kpad):
    L = src.shape[1]
    scale = math.sqrt(p["hidden_dim"])
    x = (p["tok_emb"][src] * scale + p["pos_emb"][:L][None, :, :])
    x = x.astype(jnp.bfloat16)
    for lp in p["layers"]:
        x = encoder_layer_forward(lp, x, src_kpad)
    return x, None


def decoder_forward(p, tgt, enc_src, tgt_kpad, src_kpad):
    L = tgt.shape[1]
    scale = math.sqrt(p["hidden_dim"])
    x = (p["tok_emb"][tgt] * scale + p["pos_emb"][:L][None, :, :])
    x = x.astype(jnp.bfloat16)
    attention = None
    n_layers = len(p["layers"])
    for idx, lp in enumerate(p["layers"]):
        x, att = decoder_layer_forward(
            lp, x, enc_src, tgt_kpad, src_kpad,
            need_attn=(idx == n_layers - 1))   # only last layer emits attn maps
        if att is not None:
            attention = att
    output = linear(x, p["fc_out_w"], p["fc_out_b"], out_dtype=jnp.float32)
    return output, attention


def make_key_pad_mask(tokens, pad_idx):
    # compact (B, 1, L) float mask: 1.0 where token is NOT padding.
    return (tokens != pad_idx).astype(jnp.float32)[:, None, :]


def transformer_forward(params, src, tgt):
    src_kpad = make_key_pad_mask(src, params["src_pad_idx"])
    tgt_kpad = make_key_pad_mask(tgt, params["tgt_pad_idx"])
    enc_src, _ = encoder_forward(params["encoder"], src, src_kpad)
    output, attention = decoder_forward(params["decoder"], tgt, enc_src,
                                        tgt_kpad, src_kpad)
    return output, attention


# ----------------------------- deterministic init --------------------------
# Weights are stored pre-transposed as (Din, Dout) and cast to bf16 once.

def _init_linear(key, din, dout):
    k1, k2 = jax.random.split(key)
    lim = 1.0 / math.sqrt(din)
    w = jax.random.uniform(k1, (din, dout), jnp.float32, -lim, lim)
    b = jax.random.uniform(k2, (dout,), jnp.float32, -lim, lim)
    return w.astype(jnp.bfloat16), b


def _init_mha(key, hidden, n_heads):
    ks = jax.random.split(key, 4)
    wq, bq = _init_linear(ks[0], hidden, hidden)
    wk, bk = _init_linear(ks[1], hidden, hidden)
    wv, bv = _init_linear(ks[2], hidden, hidden)
    wo, bo = _init_linear(ks[3], hidden, hidden)
    return dict(
        n_heads=n_heads, hidden_dim=hidden,
        wq=wq, bq=bq,
        wkv=jnp.concatenate([wk, wv], axis=1),
        bkv=jnp.concatenate([bk, bv]),
        wqkv=jnp.concatenate([wq, wk, wv], axis=1),
        bqkv=jnp.concatenate([bq, bk, bv]),
        wo=wo, bo=bo)


def _init_enc_layer(key, hidden, ff, n_heads):
    k1, k2, k3 = jax.random.split(key, 3)
    w1, b1 = _init_linear(k2, hidden, ff)
    w2, b2 = _init_linear(k3, ff, hidden)
    return dict(self_attn=_init_mha(k1, hidden, n_heads),
                ln1_g=jnp.ones((hidden,), jnp.float32),
                ln1_b=jnp.zeros((hidden,), jnp.float32),
                ff_w1=w1, ff_b1=b1, ff_w2=w2, ff_b2=b2,
                ln2_g=jnp.ones((hidden,), jnp.float32),
                ln2_b=jnp.zeros((hidden,), jnp.float32))


def _init_dec_layer(key, hidden, ff, n_heads):
    k1, k2, k3, k4 = jax.random.split(key, 4)
    w1, b1 = _init_linear(k3, hidden, ff)
    w2, b2 = _init_linear(k4, ff, hidden)
    return dict(self_attn=_init_mha(k1, hidden, n_heads),
                cross_attn=_init_mha(k2, hidden, n_heads),
                ln1_g=jnp.ones((hidden,), jnp.float32),
                ln1_b=jnp.zeros((hidden,), jnp.float32),
                ln2_g=jnp.ones((hidden,), jnp.float32),
                ln2_b=jnp.zeros((hidden,), jnp.float32),
                ff_w1=w1, ff_b1=b1, ff_w2=w2, ff_b2=b2,
                ln3_g=jnp.ones((hidden,), jnp.float32),
                ln3_b=jnp.zeros((hidden,), jnp.float32))


def init_transformer(key, *, encoder_layers, src_vocab_size, src_max_len,
                     decoder_layers, tgt_vocab_size, tgt_max_len,
                     src_pad_idx, tgt_pad_idx, n_heads, hidden_dim, ff_dim):
    keys = jax.random.split(key, 8)
    enc_layer_keys = jax.random.split(keys[0], encoder_layers)
    dec_layer_keys = jax.random.split(keys[1], decoder_layers)
    fc_out_w, fc_out_b = _init_linear(keys[2], hidden_dim, tgt_vocab_size)
    encoder = dict(
        hidden_dim=hidden_dim,
        tok_emb=jax.random.normal(keys[3], (src_vocab_size, hidden_dim), jnp.float32),
        pos_emb=jax.random.normal(keys[4], (src_max_len, hidden_dim), jnp.float32),
        layers=[_init_enc_layer(k, hidden_dim, ff_dim, n_heads) for k in enc_layer_keys],
    )
    decoder = dict(
        hidden_dim=hidden_dim,
        tok_emb=jax.random.normal(keys[5], (tgt_vocab_size, hidden_dim), jnp.float32),
        pos_emb=jax.random.normal(keys[6], (tgt_max_len, hidden_dim), jnp.float32),
        layers=[_init_dec_layer(k, hidden_dim, ff_dim, n_heads) for k in dec_layer_keys],
        fc_out_w=fc_out_w, fc_out_b=fc_out_b,
    )
    return dict(encoder=encoder, decoder=decoder,
                src_pad_idx=src_pad_idx, tgt_pad_idx=tgt_pad_idx)


# ----------------------------------- main -----------------------------------

if __name__ == "__main__":
    key = jax.random.PRNGKey(0)

    # small, module-consistent config
    encoder_layers = 2
    decoder_layers = 2
    src_vocab_size = 16
    tgt_vocab_size = 16
    src_max_len = 16
    tgt_max_len = 16
    src_pad_idx = 0
    tgt_pad_idx = 0
    n_heads = 4
    hidden_dim = 32
    ff_dim = 64
    batch, src_len, tgt_len = 2, 8, 8

    pkey, skey, tkey = jax.random.split(key, 3)
    params = init_transformer(
        pkey,
        encoder_layers=encoder_layers, src_vocab_size=src_vocab_size,
        src_max_len=src_max_len, decoder_layers=decoder_layers,
        tgt_vocab_size=tgt_vocab_size, tgt_max_len=tgt_max_len,
        src_pad_idx=src_pad_idx, tgt_pad_idx=tgt_pad_idx,
        n_heads=n_heads, hidden_dim=hidden_dim, ff_dim=ff_dim)

    src = jax.random.randint(skey, (batch, src_len), 0, src_vocab_size, dtype=jnp.int32)
    tgt = jax.random.randint(tkey, (batch, tgt_len), 0, tgt_vocab_size, dtype=jnp.int32)

    # jit the whole forward so glue ops (pads, slices, embedding gathers)
    # fuse around the pallas_calls; params are closed over as constants so
    # python-int config stays static.
    fwd = jax.jit(functools.partial(transformer_forward, params))
    output, attention = fwd(src, tgt)
    jax.block_until_ready((output, attention))

    assert output.shape == (batch, tgt_len, tgt_vocab_size)
    assert output.dtype == jnp.float32
    assert attention.shape == (batch, n_heads, tgt_len, src_len)
    print("KERNEL_OK")
</pallas_src>

<mosaic_0001>
module attributes {stable_mosaic.version = 11 : i64} {
  func.func @_linear_kernel(%arg0: i32, %arg1: i32, %arg2: i32, %arg3: memref<16x128xbf16, #tpu.memory_space<vmem>>, %arg4: memref<128x128xbf16, #tpu.memory_space<vmem>>, %arg5: memref<1x128xf32, #tpu.memory_space<vmem>>, %arg6: memref<16x128xbf16, #tpu.memory_space<vmem>>, %arg7: memref<16x128xf32, #tpu.memory_space<vmem>>) attributes {dimension_semantics = [#tpu.dimension_semantics<parallel>, #tpu.dimension_semantics<parallel>, #tpu.dimension_semantics<arbitrary>], iteration_bounds = array<i64: 1, 1, 1>, scalar_prefetch = 0 : i64, scratch_operands = 1 : i64, tpu.core_type = #tpu.core_type<tc>, window_params = [{transform_indices = @transform_0, window_bounds = array<i64: 16, 128>}, {transform_indices = @transform_1, window_bounds = array<i64: 128, 128>}, {transform_indices = @transform_2, window_bounds = array<i64: 1, 128>}, {transform_indices = @transform_3, window_bounds = array<i64: 16, 128>}]} {
    %c0_i32 = arith.constant 0 : i32
    %0 = arith.cmpi eq, %arg2, %c0_i32 : i32
    %1 = arith.extui %0 : i1 to i32
    %c0_i32_0 = arith.constant 0 : i32
    %2 = arith.cmpi ne, %1, %c0_i32_0 : i32
    scf.if %2 {
      %cst_10 = arith.constant 0.000000e+00 : f32
      %12 = vector.broadcast %cst_10 : f32 to vector<16x128xf32>
      %c0_11 = arith.constant 0 : index
      %c0_12 = arith.constant 0 : index
      %13 = vector.load %arg7[%c0_11, %c0_12] : memref<16x128xf32, #tpu.memory_space<vmem>>, vector<16x128xf32>
      tpu.vector_store %arg7[%c0_11, %c0_12], %12 {strides = array<i32>} : memref<16x128xf32, #tpu.memory_space<vmem>>, vector<16x128xf32>,
    } else {
    }
    %c0 = arith.constant 0 : index
    %c0_1 = arith.constant 0 : index
    %3 = vector.load %arg7[%c0, %c0_1] : memref<16x128xf32, #tpu.memory_space<vmem>>, vector<16x128xf32>
    %c0_2 = arith.constant 0 : index
    %c0_3 = arith.constant 0 : index
    %4 = vector.load %arg3[%c0_2, %c0_3] : memref<16x128xbf16, #tpu.memory_space<vmem>>, vector<16x128xbf16>
    %c0_4 = arith.constant 0 : index
    %c0_5 = arith.constant 0 : index
    %5 = vector.load %arg4[%c0_4, %c0_5] : memref<128x128xbf16, #tpu.memory_space<vmem>>, vector<128x128xbf16>
    %cst = arith.constant dense<0.000000e+00> : vector<16x128xf32>
    %6 = tpu.matmul %4, %5, %cst {dimension_numbers = #tpu.dot_dimension_numbers<[1], [0], [0], [1], [0, 0, 1, 1], [], []>} : vector<16x128xbf16>, vector<128x128xbf16>, vector<16x128xf32> -> vector<16x128xf32>
    %7 = arith.addf %3, %6 : vector<16x128xf32>
    %c0_6 = arith.constant 0 : index
    %c0_7 = arith.constant 0 : index
    %8 = vector.load %arg7[%c0_6, %c0_7] : memref<16x128xf32, #tpu.memory_space<vmem>>, vector<16x128xf32>
    tpu.vector_store %arg7[%c0_6, %c0_7], %7 {strides = array<i32>} : memref<16x128xf32, #tpu.memory_space<vmem>>, vector<16x128xf32>,
    %c0_i32_8 = arith.constant 0 : i32
    %9 = arith.cmpi eq, %arg2, %c0_i32_8 : i32
    %10 = arith.extui %9 : i1 to i32
    %c0_i32_9 = arith.constant 0 : i32
    %11 = arith.cmpi ne, %10, %c0_i32_9 : i32
    scf.if %11 {
      %c0_10 = arith.constant 0 : index
      %c0_11 = arith.constant 0 : index
      %12 = vector.load %arg7[%c0_10, %c0_11] : memref<16x128xf32, #tpu.memory_space<vmem>>, vector<16x128xf32>
      %c0_12 = arith.constant 0 : index
      %c0_13 = arith.constant 0 : index
      %13 = vector.load %arg5[%c0_12, %c0_13] : memref<1x128xf32, #tpu.memory_space<vmem>>, vector<1x128xf32>
      %14 = vector.broadcast %13 : vector<1x128xf32> to vector<16x128xf32>
      %15 = arith.addf %12, %14 : vector<16x128xf32>
      %16 = arith.truncf %15 : vector<16x128xf32> to vector<16x128xbf16>
      %c0_14 = arith.constant 0 : index
      %c0_15 = arith.constant 0 : index
      %17 = vector.load %arg6[%c0_14, %c0_15] : memref<16x128xbf16, #tpu.memory_space<vmem>>, vector<16x128xbf16>
      tpu.vector_store %arg6[%c0_14, %c0_15], %16 {strides = array<i32>} : memref<16x128xbf16, #tpu.memory_space<vmem>>, vector<16x128xbf16>,
    } else {
    }
    return
  }
  func.func @transform_0(%arg0: i32, %arg1: i32, %arg2: i32) -> (i32, i32) {
    %c0_i32 = arith.constant 0 : i32
    return %arg0, %arg2 : i32, i32
  }
  func.func @transform_1(%arg0: i32, %arg1: i32, %arg2: i32) -> (i32, i32) {
    %c0_i32 = arith.constant 0 : i32
    return %arg2, %arg1 : i32, i32
  }
  func.func @transform_2(%arg0: i32, %arg1: i32, %arg2: i32) -> (i32, i32) {
    %c0_i32 = arith.constant 0 : i32
    %c0_i32_0 = arith.constant 0 : i32
    return %c0_i32, %arg1 : i32, i32
  }
  func.func @transform_3(%arg0: i32, %arg1: i32, %arg2: i32) -> (i32, i32) {
    %c0_i32 = arith.constant 0 : i32
    return %arg0, %arg1 : i32, i32
  }
}

module attributes {stable_mosaic.version = 11 : i64} {
  func.func @_flash_attn_kernel(%arg0: i32, %arg1: i32, %arg2: i32, %arg3: memref<1x1x8xf32, #tpu.memory_space<vmem>>, %arg4: memref<1x8x32xbf16, #tpu.memory_space<vmem>>, %arg5: memref<1x8x32xbf16, #tpu.memory_space<vmem>>, %arg6: memref<1x8x32xbf16, #tpu.memory_space<vmem>>, %arg7: memref<1x8x32xbf16, #tpu.memory_space<vmem>>, %arg8: memref<8x4xf32, #tpu.memory_space<vmem>>, %arg9: memref<8x4xf32, #tpu.memory_space<vmem>>, %arg10: memref<8x32xf32, #tpu.memory_space<vmem>>) attributes {dimension_semantics = [#tpu.dimension_semantics<parallel>, #tpu.dimension_semantics<parallel>, #tpu.dimension_semantics<arbitrary>], iteration_bounds = array<i64: 2, 1, 1>, scalar_prefetch = 0 : i64, scratch_operands = 3 : i64, tpu.core_type = #tpu.core_type<tc>, window_params = [{transform_indices = @transform_0, window_bounds = array<i64: 1, 1, 8>}, {transform_indices = @transform_1, window_bounds = array<i64: 1, 8, 32>}, {transform_indices = @transform_2, window_bounds = array<i64: 1, 8, 32>}, {transform_indices = @transform_3, window_bounds = array<i64: 1, 8, 32>}, {transform_indices = @transform_4, window_bounds = array<i64: 1, 8, 32>}]} {
    %c0_i32 = arith.constant 0 : i32
    %0 = arith.cmpi eq, %arg2, %c0_i32 : i32
    %1 = arith.extui %0 : i1 to i32
    %c0_i32_0 = arith.constant 0 : i32
    %2 = arith.cmpi ne, %1, %c0_i32_0 : i32
    scf.if %2 {
      %cst_85 = arith.constant -1.000000e+30 : f32
      %159 = vector.broadcast %cst_85 : f32 to vector<8x4xf32>
      %c0_86 = arith.constant 0 : index
      %c0_87 = arith.constant 0 : index
      %160 = vector.load %arg8[%c0_86, %c0_87] : memref<8x4xf32, #tpu.memory_space<vmem>>, vector<8x4xf32>
      tpu.vector_store %arg8[%c0_86, %c0_87], %159 {strides = array<i32>} : memref<8x4xf32, #tpu.memory_space<vmem>>, vector<8x4xf32>,
      %cst_88 = arith.constant 0.000000e+00 : f32
      %161 = vector.broadcast %cst_88 : f32 to vector<8x4xf32>
      %c0_89 = arith.constant 0 : index
      %c0_90 = arith.constant 0 : index
      %162 = vector.load %arg9[%c0_89, %c0_90] : memref<8x4xf32, #tpu.memory_space<vmem>>, vector<8x4xf32>
      tpu.vector_store %arg9[%c0_89, %c0_90], %161 {strides = array<i32>} : memref<8x4xf32, #tpu.memory_space<vmem>>, vector<8x4xf32>,
      %cst_91 = arith.constant 0.000000e+00 : f32
      %163 = vector.broadcast %cst_91 : f32 to vector<8x32xf32>
      %c0_92 = arith.constant 0 : index
      %c0_93 = arith.constant 0 : index
      %164 = vector.load %arg10[%c0_92, %c0_93] : memref<8x32xf32, #tpu.memory_space<vmem>>, vector<8x32xf32>
      tpu.vector_store %arg10[%c0_92, %c0_93], %163 {strides = array<i32>} : memref<8x32xf32, #tpu.memory_space<vmem>>, vector<8x32xf32>,
    } else {
    }
    %c0 = arith.constant 0 : index
    %c0_1 = arith.constant 0 : index
    %c0_2 = arith.constant 0 : index
    %3 = vector.load %arg4[%c0, %c0_1, %c0_2] : memref<1x8x32xbf16, #tpu.memory_space<vmem>>, vector<1x8x32xbf16>
    %4 = vector.shape_cast %3 : vector<1x8x32xbf16> to vector<8x32xbf16>
    %c0_3 = arith.constant 0 : index
    %c0_4 = arith.constant 0 : index
    %c0_5 = arith.constant 0 : index
    %5 = vector.load %arg5[%c0_3, %c0_4, %c0_5] : memref<1x8x32xbf16, #tpu.memory_space<vmem>>, vector<1x8x32xbf16>
    %6 = vector.shape_cast %5 : vector<1x8x32xbf16> to vector<8x32xbf16>
    %c0_6 = arith.constant 0 : index
    %c0_7 = arith.constant 0 : index
    %c0_8 = arith.constant 0 : index
    %7 = vector.load %arg6[%c0_6, %c0_7, %c0_8] : memref<1x8x32xbf16, #tpu.memory_space<vmem>>, vector<1x8x32xbf16>
    %8 = vector.shape_cast %7 : vector<1x8x32xbf16> to vector<8x32xbf16>
    %c0_9 = arith.constant 0 : index
    %c0_10 = arith.constant 0 : index
    %c0_11 = arith.constant 0 : index
    %9 = vector.load %arg3[%c0_9, %c0_10, %c0_11] : memref<1x1x8xf32, #tpu.memory_space<vmem>>, vector<1x1x8xf32>
    %10 = vector.shape_cast %9 : vector<1x1x8xf32> to vector<1x8xf32>
    %cst = arith.constant 0.000000e+00 : f32
    %11 = vector.broadcast %cst : f32 to vector<1x8xf32>
    %12 = arith.cmpf ogt, %10, %11 : vector<1x8xf32>
    %c8_i32 = arith.constant 8 : i32
    %13 = arith.muli %arg1, %c8_i32 : i32
    %14 = tpu.iota {dimensions = array<i32: 0>} : vector<8x8xi32>
    %15 = vector.broadcast %13 : i32 to vector<8x8xi32>
    %16 = arith.addi %15, %14 : vector<8x8xi32>
    %c8_i32_12 = arith.constant 8 : i32
    %17 = arith.muli %arg2, %c8_i32_12 : i32
    %18 = tpu.iota {dimensions = array<i32: 1>} : vector<8x8xi32>
    %19 = vector.broadcast %17 : i32 to vector<8x8xi32>
    %20 = arith.addi %19, %18 : vector<8x8xi32>
    %21 = arith.cmpi sle, %20, %16 : vector<8x8xi32>
    %22 = vector.broadcast %12 : vector<1x8xi1> to vector<8x8xi1>
    %23 = arith.andi %22, %21 : vector<8x8xi1>
    %24 = vector.extract_strided_slice %4 {offsets = [0, 0], sizes = [8, 8], strides = [1, 1]} : vector<8x32xbf16> to vector<8x8xbf16>
    %25 = vector.extract_strided_slice %6 {offsets = [0, 0], sizes = [8, 8], strides = [1, 1]} : vector<8x32xbf16> to vector<8x8xbf16>
    %cst_13 = arith.constant dense<0.000000e+00> : vector<8x8xf32>
    %26 = tpu.matmul %24, %25, %cst_13 {dimension_numbers = #tpu.dot_dimension_numbers<[1], [1], [0], [0], [0, 0, 1, 0], [], []>} : vector<8x8xbf16>, vector<8x8xbf16>, vector<8x8xf32> -> vector<8x8xf32>
    %cst_14 = arith.constant 0.353553385 : f32
    %27 = vector.broadcast %cst_14 : f32 to vector<8x8xf32>
    %28 = arith.mulf %26, %27 : vector<8x8xf32>
    %cst_15 = arith.constant -1.000000e+30 : f32
    %29 = vector.broadcast %cst_15 : f32 to vector<8x8xf32>
    %30 = arith.select %23, %28, %29 : vector<8x8xi1>, vector<8x8xf32>
    %c0_16 = arith.constant 0 : index
    %c0_17 = arith.constant 0 : index
    %31 = vector.load %arg8[%c0_16, %c0_17] : memref<8x4xf32, #tpu.memory_space<vmem>>, vector<8x1xf32>
    %cst_18 = arith.constant dense<0xFF800000> : vector<8xf32>
    %32 = vector.multi_reduction <maximumf>, %30, %cst_18 [1] : vector<8x8xf32> to vector<8xf32>
    %33 = vector.shape_cast %32 : vector<8xf32> to vector<8x1xf32>
    %34 = arith.maximumf %31, %33 : vector<8x1xf32>
    %35 = vector.broadcast %34 : vector<8x1xf32> to vector<8x8xf32>
    %36 = arith.subf %30, %35 : vector<8x8xf32>
    %37 = math.exp %36 : vector<8x8xf32>
    %cst_19 = arith.constant 0.000000e+00 : f32
    %38 = vector.broadcast %cst_19 : f32 to vector<8x8xf32>
    %39 = arith.select %23, %37, %38 : vector<8x8xi1>, vector<8x8xf32>
    %40 = arith.subf %31, %34 : vector<8x1xf32>
    %41 = math.exp %40 : vector<8x1xf32>
    %c0_20 = arith.constant 0 : index
    %c0_21 = arith.constant 0 : index
    %42 = vector.load %arg9[%c0_20, %c0_21] : memref<8x4xf32, #tpu.memory_space<vmem>>, vector<8x1xf32>
    %43 = arith.mulf %41, %42 : vector<8x1xf32>
    %cst_22 = arith.constant dense<0.000000e+00> : vector<8xf32>
    %44 = vector.multi_reduction <add>, %39, %cst_22 [1] : vector<8x8xf32> to vector<8xf32>
    %45 = vector.shape_cast %44 : vector<8xf32> to vector<8x1xf32>
    %46 = arith.addf %43, %45 : vector<8x1xf32>
    %c0_23 = arith.constant 0 : index
    %c0_24 = arith.constant 0 : index
    %47 = vector.load %arg9[%c0_23, %c0_24] : memref<8x4xf32, #tpu.memory_space<vmem>>, vector<8x1xf32>
    tpu.vector_store %arg9[%c0_23, %c0_24], %46 {strides = array<i32>} : memref<8x4xf32, #tpu.memory_space<vmem>>, vector<8x1xf32>,
    %c0_25 = arith.constant 0 : index
    %c0_26 = arith.constant 0 : index
    %48 = vector.load %arg10[%c0_25, %c0_26] : memref<8x32xf32, #tpu.memory_space<vmem>>, vector<8x8xf32>
    %49 = vector.broadcast %41 : vector<8x1xf32> to vector<8x8xf32>
    %50 = arith.mulf %49, %48 : vector<8x8xf32>
    %51 = arith.truncf %39 : vector<8x8xf32> to vector<8x8xbf16>
    %52 = vector.extract_strided_slice %8 {offsets = [0, 0], sizes = [8, 8], strides = [1, 1]} : vector<8x32xbf16> to vector<8x8xbf16>
    %cst_27 = arith.constant dense<0.000000e+00> : vector<8x8xf32>
    %53 = tpu.matmul %51, %52, %cst_27 {dimension_numbers = #tpu.dot_dimension_numbers<[1], [0], [0], [1], [0, 0, 1, 1], [], []>} : vector<8x8xbf16>, vector<8x8xbf16>, vector<8x8xf32> -> vector<8x8xf32>
    %54 = arith.addf %50, %53 : vector<8x8xf32>
    %c0_28 = arith.constant 0 : index
    %c0_29 = arith.constant 0 : index
    %55 = vector.load %arg10[%c0_28, %c0_29] : memref<8x32xf32, #tpu.memory_space<vmem>>, vector<8x8xf32>
    tpu.vector_store %arg10[%c0_28, %c0_29], %54 {strides = array<i32>} : memref<8x32xf32, #tpu.memory_space<vmem>>, vector<8x8xf32>,
    %c0_30 = arith.constant 0 : index
    %c0_31 = arith.constant 0 : index
    %56 = vector.load %arg8[%c0_30, %c0_31] : memref<8x4xf32, #tpu.memory_space<vmem>>, vector<8x1xf32>
    tpu.vector_store %arg8[%c0_30, %c0_31], %34 {strides = array<i32>} : memref<8x4xf32, #tpu.memory_space<vmem>>, vector<8x1xf32>,
    %57 = vector.extract_strided_slice %4 {offsets = [0, 8], sizes = [8, 8], strides = [1, 1]} : vector<8x32xbf16> to vector<8x8xbf16>
    %58 = vector.extract_strided_slice %6 {offsets = [0, 8], sizes = [8, 8], strides = [1, 1]} : vector<8x32xbf16> to vector<8x8xbf16>
    %cst_32 = arith.constant dense<0.000000e+00> : vector<8x8xf32>
    %59 = tpu.matmul %57, %58, %cst_32 {dimension_numbers = #tpu.dot_dimension_numbers<[1], [1], [0], [0], [0, 0, 1, 0], [], []>} : vector<8x8xbf16>, vector<8x8xbf16>, vector<8x8xf32> -> vector<8x8xf32>
    %cst_33 = arith.constant 0.353553385 : f32
    %60 = vector.broadcast %cst_33 : f32 to vector<8x8xf32>
    %61 = arith.mulf %59, %60 : vector<8x8xf32>
    %cst_34 = arith.constant -1.000000e+30 : f32
    %62 = vector.broadcast %cst_34 : f32 to vector<8x8xf32>
    %63 = arith.select %23, %61, %62 : vector<8x8xi1>, vector<8x8xf32>
    %c0_35 = arith.constant 0 : index
    %c1 = arith.constant 1 : index
    %64 = vector.load %arg8[%c0_35, %c1] : memref<8x4xf32, #tpu.memory_space<vmem>>, vector<8x1xf32>
    %cst_36 = arith.constant dense<0xFF800000> : vector<8xf32>
    %65 = vector.multi_reduction <maximumf>, %63, %cst_36 [1] : vector<8x8xf32> to vector<8xf32>
    %66 = vector.shape_cast %65 : vector<8xf32> to vector<8x1xf32>
    %67 = arith.maximumf %64, %66 : vector<8x1xf32>
    %68 = vector.broadcast %67 : vector<8x1xf32> to vector<8x8xf32>
    %69 = arith.subf %63, %68 : vector<8x8xf32>
    %70 = math.exp %69 : vector<8x8xf32>
    %cst_37 = arith.constant 0.000000e+00 : f32
    %71 = vector.broadcast %cst_37 : f32 to vector<8x8xf32>
    %72 = arith.select %23, %70, %71 : vector<8x8xi1>, vector<8x8xf32>
    %73 = arith.subf %64, %67 : vector<8x1xf32>
    %74 = math.exp %73 : vector<8x1xf32>
    %c0_38 = arith.constant 0 : index
    %c1_39 = arith.constant 1 : index
    %75 = vector.load %arg9[%c0_38, %c1_39] : memref<8x4xf32, #tpu.memory_space<vmem>>, vector<8x1xf32>
    %76 = arith.mulf %74, %75 : vector<8x1xf32>
    %cst_40 = arith.constant dense<0.000000e+00> : vector<8xf32>
    %77 = vector.multi_reduction <add>, %72, %cst_40 [1] : vector<8x8xf32> to vector<8xf32>
    %78 = vector.shape_cast %77 : vector<8xf32> to vector<8x1xf32>
    %79 = arith.addf %76, %78 : vector<8x1xf32>
    %c0_41 = arith.constant 0 : index
    %c1_42 = arith.constant 1 : index
    %80 = vector.load %arg9[%c0_41, %c1_42] : memref<8x4xf32, #tpu.memory_space<vmem>>, vector<8x1xf32>
    tpu.vector_store %arg9[%c0_41, %c1_42], %79 {strides = array<i32>} : memref<8x4xf32, #tpu.memory_space<vmem>>, vector<8x1xf32>,
    %c0_43 = arith.constant 0 : index
    %c8 = arith.constant 8 : index
    %81 = vector.load %arg10[%c0_43, %c8] : memref<8x32xf32, #tpu.memory_space<vmem>>, vector<8x8xf32>
    %82 = vector.broadcast %74 : vector<8x1xf32> to vector<8x8xf32>
    %83 = arith.mulf %82, %81 : vector<8x8xf32>
    %84 = arith.truncf %72 : vector<8x8xf32> to vector<8x8xbf16>
    %85 = vector.extract_strided_slice %8 {offsets = [0, 8], sizes = [8, 8], strides = [1, 1]} : vector<8x32xbf16> to vector<8x8xbf16>
    %cst_44 = arith.constant dense<0.000000e+00> : vector<8x8xf32>
    %86 = tpu.matmul %84, %85, %cst_44 {dimension_numbers = #tpu.dot_dimension_numbers<[1], [0], [0], [1], [0, 0, 1, 1], [], []>} : vector<8x8xbf16>, vector<8x8xbf16>, vector<8x8xf32> -> vector<8x8xf32>
    %87 = arith.addf %83, %86 : vector<8x8xf32>
    %c0_45 = arith.constant 0 : index
    %c8_46 = arith.constant 8 : index
    %88 = vector.load %arg10[%c0_45, %c8_46] : memref<8x32xf32, #tpu.memory_space<vmem>>, vector<8x8xf32>
    tpu.vector_store %arg10[%c0_45, %c8_46], %87 {strides = array<i32>} : memref<8x32xf32, #tpu.memory_space<vmem>>, vector<8x8xf32>,
    %c0_47 = arith.constant 0 : index
    %c1_48 = arith.constant 1 : index
    %89 = vector.load %arg8[%c0_47, %c1_48] : memref<8x4xf32, #tpu.memory_space<vmem>>, vector<8x1xf32>
    tpu.vector_store %arg8[%c0_47, %c1_48], %67 {strides = array<i32>} : memref<8x4xf32, #tpu.memory_space<vmem>>, vector<8x1xf32>,
    %90 = vector.extract_strided_slice %4 {offsets = [0, 16], sizes = [8, 8], strides = [1, 1]} : vector<8x32xbf16> to vector<8x8xbf16>
    %91 = vector.extract_strided_slice %6 {offsets = [0, 16], sizes = [8, 8], strides = [1, 1]} : vector<8x32xbf16> to vector<8x8xbf16>
    %cst_49 = arith.constant dense<0.000000e+00> : vector<8x8xf32>
    %92 = tpu.matmul %90, %91, %cst_49 {dimension_numbers = #tpu.dot_dimension_numbers<[1], [1], [0], [0], [0, 0, 1, 0], [], []>} : vector<8x8xbf16>, vector<8x8xbf16>, vector<8x8xf32> -> vector<8x8xf32>
    %cst_50 = arith.constant 0.353553385 : f32
    %93 = vector.broadcast %cst_50 : f32 to vector<8x8xf32>
    %94 = arith.mulf %92, %93 : vector<8x8xf32>
    %cst_51 = arith.constant -1.000000e+30 : f32
    %95 = vector.broadcast %cst_51 : f32 to vector<8x8xf32>
    %96 = arith.select %23, %94, %95 : vector<8x8xi1>, vector<8x8xf32>
    %c0_52 = arith.constant 0 : index
    %c2 = arith.constant 2 : index
    %97 = vector.load %arg8[%c0_52, %c2] : memref<8x4xf32, #tpu.memory_space<vmem>>, vector<8x1xf32>
    %cst_53 = arith.constant dense<0xFF800000> : vector<8xf32>
    %98 = vector.multi_reduction <maximumf>, %96, %cst_53 [1] : vector<8x8xf32> to vector<8xf32>
    %99 = vector.shape_cast %98 : vector<8xf32> to vector<8x1xf32>
    %100 = arith.maximumf %97, %99 : vector<8x1xf32>
    %101 = vector.broadcast %100 : vector<8x1xf32> to vector<8x8xf32>
    %102 = arith.subf %96, %101 : vector<8x8xf32>
    %103 = math.exp %102 : vector<8x8xf32>
    %cst_54 = arith.constant 0.000000e+00 : f32
    %104 = vector.broadcast %cst_54 : f32 to vector<8x8xf32>
    %105 = arith.select %23, %103, %104 : vector<8x8xi1>, vector<8x8xf32>
    %106 = arith.subf %97, %100 : vector<8x1xf32>
    %107 = math.exp %106 : vector<8x1xf32>
    %c0_55 = arith.constant 0 : index
    %c2_56 = arith.constant 2 : index
    %108 = vector.load %arg9[%c0_55, %c2_56] : memref<8x4xf32, #tpu.memory_space<vmem>>, vector<8x1xf32>
    %109 = arith.mulf %107, %108 : vector<8x1xf32>
    %cst_57 = arith.constant dense<0.000000e+00> : vector<8xf32>
    %110 = vector.multi_reduction <add>, %105, %cst_57 [1] : vector<8x8xf32> to vector<8xf32>
    %111 = vector.shape_cast %110 : vector<8xf32> to vector<8x1xf32>
    %112 = arith.addf %109, %111 : vector<8x1xf32>
    %c0_58 = arith.constant 0 : index
    %c2_59 = arith.constant 2 : index
    %113 = vector.load %arg9[%c0_58, %c2_59] : memref<8x4xf32, #tpu.memory_space<vmem>>, vector<8x1xf32>
    tpu.vector_store %arg9[%c0_58, %c2_59], %112 {strides = array<i32>} : memref<8x4xf32, #tpu.memory_space<vmem>>, vector<8x1xf32>,
    %c0_60 = arith.constant 0 : index
    %c16 = arith.constant 16 : index
    %114 = vector.load %arg10[%c0_60, %c16] : memref<8x32xf32, #tpu.memory_space<vmem>>, vector<8x8xf32>
    %115 = vector.broadcast %107 : vector<8x1xf32> to vector<8x8xf32>
    %116 = arith.mulf %115, %114 : vector<8x8xf32>
    %117 = arith.truncf %105 : vector<8x8xf32> to vector<8x8xbf16>
    %118 = vector.extract_strided_slice %8 {offsets = [0, 16], sizes = [8, 8], strides = [1, 1]} : vector<8x32xbf16> to vector<8x8xbf16>
    %cst_61 = arith.constant dense<0.000000e+00> : vector<8x8xf32>
    %119 = tpu.matmul %117, %118, %cst_61 {dimension_numbers = #tpu.dot_dimension_numbers<[1], [0], [0], [1], [0, 0, 1, 1], [], []>} : vector<8x8xbf16>, vector<8x8xbf16>, vector<8x8xf32> -> vector<8x8xf32>
    %120 = arith.addf %116, %119 : vector<8x8xf32>
    %c0_62 = arith.constant 0 : index
    %c16_63 = arith.constant 16 : index
    %121 = vector.load %arg10[%c0_62, %c16_63] : memref<8x32xf32, #tpu.memory_space<vmem>>, vector<8x8xf32>
    tpu.vector_store %arg10[%c0_62, %c16_63], %120 {strides = array<i32>} : memref<8x32xf32, #tpu.memory_space<vmem>>, vector<8x8xf32>,
    %c0_64 = arith.constant 0 : index
    %c2_65 = arith.constant 2 : index
    %122 = vector.load %arg8[%c0_64, %c2_65] : memref<8x4xf32, #tpu.memory_space<vmem>>, vector<8x1xf32>
    tpu.vector_store %arg8[%c0_64, %c2_65], %100 {strides = array<i32>} : memref<8x4xf32, #tpu.memory_space<vmem>>, vector<8x1xf32>,
    %123 = vector.extract_strided_slice %4 {offsets = [0, 24], sizes = [8, 8], strides = [1, 1]} : vector<8x32xbf16> to vector<8x8xbf16>
    %124 = vector.extract_strided_slice %6 {offsets = [0, 24], sizes = [8, 8], strides = [1, 1]} : vector<8x32xbf16> to vector<8x8xbf16>
    %cst_66 = arith.constant dense<0.000000e+00> : vector<8x8xf32>
    %125 = tpu.matmul %123, %124, %cst_66 {dimension_numbers = #tpu.dot_dimension_numbers<[1], [1], [0], [0], [0, 0, 1, 0], [], []>} : vector<8x8xbf16>, vector<8x8xbf16>, vector<8x8xf32> -> vector<8x8xf32>
    %cst_67 = arith.constant 0.353553385 : f32
    %126 = vector.broadcast %cst_67 : f32 to vector<8x8xf32>
    %127 = arith.mulf %125, %126 : vector<8x8xf32>
    %cst_68 = arith.constant -1.000000e+30 : f32
    %128 = vector.broadcast %cst_68 : f32 to vector<8x8xf32>
    %129 = arith.select %23, %127, %128 : vector<8x8xi1>, vector<8x8xf32>
    %c0_69 = arith.constant 0 : index
    %c3 = arith.constant 3 : index
    %130 = vector.load %arg8[%c0_69, %c3] : memref<8x4xf32, #tpu.memory_space<vmem>>, vector<8x1xf32>
    %cst_70 = arith.constant dense<0xFF800000> : vector<8xf32>
    %131 = vector.multi_reduction <maximumf>, %129, %cst_70 [1] : vector<8x8xf32> to vector<8xf32>
    %132 = vector.shape_cast %131 : vector<8xf32> to vector<8x1xf32>
    %133 = arith.maximumf %130, %132 : vector<8x1xf32>
    %134 = vector.broadcast %133 : vector<8x1xf32> to vector<8x8xf32>
    %135 = arith.subf %129, %134 : vector<8x8xf32>
    %136 = math.exp %135 : vector<8x8xf32>
    %cst_71 = arith.constant 0.000000e+00 : f32
    %137 = vector.broadcast %cst_71 : f32 to vector<8x8xf32>
    %138 = arith.select %23, %136, %137 : vector<8x8xi1>, vector<8x8xf32>
    %139 = arith.subf %130, %133 : vector<8x1xf32>
    %140 = math.exp %139 : vector<8x1xf32>
    %c0_72 = arith.constant 0 : index
    %c3_73 = arith.constant 3 : index
    %141 = vector.load %arg9[%c0_72, %c3_73] : memref<8x4xf32, #tpu.memory_space<vmem>>, vector<8x1xf32>
    %142 = arith.mulf %140, %141 : vector<8x1xf32>
    %cst_74 = arith.constant dense<0.000000e+00> : vector<8xf32>
    %143 = vector.multi_reduction <add>, %138, %cst_74 [1] : vector<8x8xf32> to vector<8xf32>
    %144 = vector.shape_cast %143 : vector<8xf32> to vector<8x1xf32>
    %145 = arith.addf %142, %144 : vector<8x1xf32>
    %c0_75 = arith.constant 0 : index
    %c3_76 = arith.constant 3 : index
    %146 = vector.load %arg9[%c0_75, %c3_76] : memref<8x4xf32, #tpu.memory_space<vmem>>, vector<8x1xf32>
    tpu.vector_store %arg9[%c0_75, %c3_76], %145 {strides = array<i32>} : memref<8x4xf32, #tpu.memory_space<vmem>>, vector<8x1xf32>,
    %c0_77 = arith.constant 0 : index
    %c24 = arith.constant 24 : index
    %147 = vector.load %arg10[%c0_77, %c24] : memref<8x32xf32, #tpu.memory_space<vmem>>, vector<8x8xf32>
    %148 = vector.broadcast %140 : vector<8x1xf32> to vector<8x8xf32>
    %149 = arith.mulf %148, %147 : vector<8x8xf32>
    %150 = arith.truncf %138 : vector<8x8xf32> to vector<8x8xbf16>
    %151 = vector.extract_strided_slice %8 {offsets = [0, 24], sizes = [8, 8], strides = [1, 1]} : vector<8x32xbf16> to vector<8x8xbf16>
    %cst_78 = arith.constant dense<0.000000e+00> : vector<8x8xf32>
    %152 = tpu.matmul %150, %151, %cst_78 {dimension_numbers = #tpu.dot_dimension_numbers<[1], [0], [0], [1], [0, 0, 1, 1], [], []>} : vector<8x8xbf16>, vector<8x8xbf16>, vector<8x8xf32> -> vector<8x8xf32>
    %153 = arith.addf %149, %152 : vector<8x8xf32>
    %c0_79 = arith.constant 0 : index
    %c24_80 = arith.constant 24 : index
    %154 = vector.load %arg10[%c0_79, %c24_80] : memref<8x32xf32, #tpu.memory_space<vmem>>, vector<8x8xf32>
    tpu.vector_store %arg10[%c0_79, %c24_80], %153 {strides = array<i32>} : memref<8x32xf32, #tpu.memory_space<vmem>>, vector<8x8xf32>,
    %c0_81 = arith.constant 0 : index
    %c3_82 = arith.constant 3 : index
    %155 = vector.load %arg8[%c0_81, %c3_82] : memref<8x4xf32, #tpu.memory_space<vmem>>, vector<8x1xf32>
    tpu.vector_store %arg8[%c0_81, %c3_82], %133 {strides = array<i32>} : memref<8x4xf32, #tpu.memory_space<vmem>>, vector<8x1xf32>,
    %c0_i32_83 = arith.constant 0 : i32
    %156 = arith.cmpi eq, %arg2, %c0_i32_83 : i32
    %157 = arith.extui %156 : i1 to i32
    %c0_i32_84 = arith.constant 0 : i32
    %158 = arith.cmpi ne, %157, %c0_i32_84 : i32
    scf.if %158 {
      %c0_85 = arith.constant 0 : index
      %c0_86 = arith.constant 0 : index
      %159 = vector.load %arg9[%c0_85, %c0_86] : memref<8x4xf32, #tpu.memory_space<vmem>>, vector<8x1xf32>
      %cst_87 = arith.constant 0.000000e+00 : f32
      %160 = vector.broadcast %cst_87 : f32 to vector<8x1xf32>
      %161 = arith.cmpf ole, %159, %160 : vector<8x1xf32>
      %cst_88 = arith.constant 1.000000e+00 : f32
      %162 = vector.broadcast %cst_88 : f32 to vector<8x1xf32>
      %163 = arith.select %161, %162, %159 : vector<8x1xi1>, vector<8x1xf32>
      %c0_89 = arith.constant 0 : index
      %c0_90 = arith.constant 0 : index
      %164 = vector.load %arg10[%c0_89, %c0_90] : memref<8x32xf32, #tpu.memory_space<vmem>>, vector<8x8xf32>
      %165 = tpu.reciprocal %163 {approx = true} : vector<8x1xf32> -> vector<8x1xf32>
      %166 = vector.broadcast %165 : vector<8x1xf32> to vector<8x8xf32>
      %167 = arith.mulf %164, %166 : vector<8x8xf32>
      %168 = arith.truncf %167 : vector<8x8xf32> to vector<8x8xbf16>
      %c0_91 = arith.constant 0 : index
      %c0_92 = arith.constant 0 : index
      %c0_93 = arith.constant 0 : index
      %169 = vector.load %arg7[%c0_91, %c0_92, %c0_93] : memref<1x8x32xbf16, #tpu.memory_space<vmem>>, vector<1x8x8xbf16>
      %170 = vector.shape_cast %169 : vector<1x8x8xbf16> to vector<8x8xbf16>
      %171 = vector.shape_cast %168 : vector<8x8xbf16> to vector<1x8x8xbf16>
      tpu.vector_store %arg7[%c0_91, %c0_92, %c0_93], %171 {strides = array<i32>} : memref<1x8x32xbf16, #tpu.memory_space<vmem>>, vector<1x8x8xbf16>,
      %c0_94 = arith.constant 0 : index
      %c1_95 = arith.constant 1 : index
      %172 = vector.load %arg9[%c0_94, %c1_95] : memref<8x4xf32, #tpu.memory_space<vmem>>, vector<8x1xf32>
      %cst_96 = arith.constant 0.000000e+00 : f32
      %173 = vector.broadcast %cst_96 : f32 to vector<8x1xf32>
      %174 = arith.cmpf ole, %172, %173 : vector<8x1xf32>
      %cst_97 = arith.constant 1.000000e+00 : f32
      %175 = vector.broadcast %cst_97 : f32 to vector<8x1xf32>
      %176 = arith.select %174, %175, %172 : vector<8x1xi1>, vector<8x1xf32>
      %c0_98 = arith.constant 0 : index
      %c8_99 = arith.constant 8 : index
      %177 = vector.load %arg10[%c0_98, %c8_99] : memref<8x32xf32, #tpu.memory_space<vmem>>, vector<8x8xf32>
      %178 = tpu.reciprocal %176 {approx = true} : vector<8x1xf32> -> vector<8x1xf32>
      %179 = vector.broadcast %178 : vector<8x1xf32> to vector<8x8xf32>
      %180 = arith.mulf %177, %179 : vector<8x8xf32>
      %181 = arith.truncf %180 : vector<8x8xf32> to vector<8x8xbf16>
      %c0_100 = arith.constant 0 : index
      %c0_101 = arith.constant 0 : index
      %c8_102 = arith.constant 8 : index
      %182 = vector.load %arg7[%c0_100, %c0_101, %c8_102] : memref<1x8x32xbf16, #tpu.memory_space<vmem>>, vector<1x8x8xbf16>
      %183 = vector.shape_cast %182 : vector<1x8x8xbf16> to vector<8x8xbf16>
      %184 = vector.shape_cast %181 : vector<8x8xbf16> to vector<1x8x8xbf16>
      tpu.vector_store %arg7[%c0_100, %c0_101, %c8_102], %184 {strides = array<i32>} : memref<1x8x32xbf16, #tpu.memory_space<vmem>>, vector<1x8x8xbf16>,
      %c0_103 = arith.constant 0 : index
      %c2_104 = arith.constant 2 : index
      %185 = vector.load %arg9[%c0_103, %c2_104] : memref<8x4xf32, #tpu.memory_space<vmem>>, vector<8x1xf32>
      %cst_105 = arith.constant 0.000000e+00 : f32
      %186 = vector.broadcast %cst_105 : f32 to vector<8x1xf32>
      %187 = arith.cmpf ole, %185, %186 : vector<8x1xf32>
      %cst_106 = arith.constant 1.000000e+00 : f32
      %188 = vector.broadcast %cst_106 : f32 to vector<8x1xf32>
      %189 = arith.select %187, %188, %185 : vector<8x1xi1>, vector<8x1xf32>
      %c0_107 = arith.constant 0 : index
      %c16_108 = arith.constant 16 : index
      %190 = vector.load %arg10[%c0_107, %c16_108] : memref<8x32xf32, #tpu.memory_space<vmem>>, vector<8x8xf32>
      %191 = tpu.reciprocal %189 {approx = true} : vector<8x1xf32> -> vector<8x1xf32>
      %192 = vector.broadcast %191 : vector<8x1xf32> to vector<8x8xf32>
      %193 = arith.mulf %190, %192 : vector<8x8xf32>
      %194 = arith.truncf %193 : vector<8x8xf32> to vector<8x8xbf16>
      %c0_109 = arith.constant 0 : index
      %c0_110 = arith.constant 0 : index
      %c16_111 = arith.constant 16 : index
      %195 = vector.load %arg7[%c0_109, %c0_110, %c16_111] : memref<1x8x32xbf16, #tpu.memory_space<vmem>>, vector<1x8x8xbf16>
      %196 = vector.shape_cast %195 : vector<1x8x8xbf16> to vector<8x8xbf16>
      %197 = vector.shape_cast %194 : vector<8x8xbf16> to vector<1x8x8xbf16>
      tpu.vector_store %arg7[%c0_109, %c0_110, %c16_111], %197 {strides = array<i32>} : memref<1x8x32xbf16, #tpu.memory_space<vmem>>, vector<1x8x8xbf16>,
      %c0_112 = arith.constant 0 : index
      %c3_113 = arith.constant 3 : index
      %198 = vector.load %arg9[%c0_112, %c3_113] : memref<8x4xf32, #tpu.memory_space<vmem>>, vector<8x1xf32>
      %cst_114 = arith.constant 0.000000e+00 : f32
      %199 = vector.broadcast %cst_114 : f32 to vector<8x1xf32>
      %200 = arith.cmpf ole, %198, %199 : vector<8x1xf32>
      %cst_115 = arith.constant 1.000000e+00 : f32
      %201 = vector.broadcast %cst_115 : f32 to vector<8x1xf32>
      %202 = arith.select %200, %201, %198 : vector<8x1xi1>, vector<8x1xf32>
      %c0_116 = arith.constant 0 : index
      %c24_117 = arith.constant 24 : index
      %203 = vector.load %arg10[%c0_116, %c24_117] : memref<8x32xf32, #tpu.memory_space<vmem>>, vector<8x8xf32>
      %204 = tpu.reciprocal %202 {approx = true} : vector<8x1xf32> -> vector<8x1xf32>
      %205 = vector.broadcast %204 : vector<8x1xf32> to vector<8x8xf32>
      %206 = arith.mulf %203, %205 : vector<8x8xf32>
      %207 = arith.truncf %206 : vector<8x8xf32> to vector<8x8xbf16>
      %c0_118 = arith.constant 0 : index
      %c0_119 = arith.constant 0 : index
      %c24_120 = arith.constant 24 : index
      %208 = vector.load %arg7[%c0_118, %c0_119, %c24_120] : memref<1x8x32xbf16, #tpu.memory_space<vmem>>, vector<1x8x8xbf16>
      %209 = vector.shape_cast %208 : vector<1x8x8xbf16> to vector<8x8xbf16>
      %210 = vector.shape_cast %207 : vector<8x8xbf16> to vector<1x8x8xbf16>
      tpu.vector_store %arg7[%c0_118, %c0_119, %c24_120], %210 {strides = array<i32>} : memref<1x8x32xbf16, #tpu.memory_space<vmem>>, vector<1x8x8xbf16>,
    } else {
    }
    return
  }
  func.func @transform_0(%arg0: i32, %arg1: i32, %arg2: i32) -> (i32, i32, i32) {
    %c0_i32 = arith.constant 0 : i32
    %c0_i32_0 = arith.constant 0 : i32
    return %arg0, %c0_i32, %arg2 : i32, i32, i32
  }
  func.func @transform_1(%arg0: i32, %arg1: i32, %arg2: i32) -> (i32, i32, i32) {
    %c0_i32 = arith.constant 0 : i32
    %c0_i32_0 = arith.constant 0 : i32
    return %arg0, %arg1, %c0_i32 : i32, i32, i32
  }
  func.func @transform_2(%arg0: i32, %arg1: i32, %arg2: i32) -> (i32, i32, i32) {
    %c0_i32 = arith.constant 0 : i32
    %c0_i32_0 = arith.constant 0 : i32
    return %arg0, %arg2, %c0_i32 : i32, i32, i32
  }
  func.func @transform_3(%arg0: i32, %arg1: i32, %arg2: i32) -> (i32, i32, i32) {
    %c0_i32 = arith.constant 0 : i32
    %c0_i32_0 = arith.constant 0 : i32
    return %arg0, %arg2, %c0_i32 : i32, i32, i32
  }
  func.func @transform_4(%arg0: i32, %arg1: i32, %arg2: i32) -> (i32, i32, i32) {
    %c0_i32 = arith.constant 0 : i32
    %c0_i32_0 = arith.constant 0 : i32
    return %arg0, %arg1, %c0_i32 : i32, i32, i32
  }
}

module attributes {stable_mosaic.version = 11 : i64} {
  func.func @_linear_kernel(%arg0: i32, %arg1: i32, %arg2: i32, %arg3: memref<16x128xbf16, #tpu.memory_space<vmem>>, %arg4: memref<128x128xbf16, #tpu.memory_space<vmem>>, %arg5: memref<1x128xf32, #tpu.memory_space<vmem>>, %arg6: memref<16x128xbf16, #tpu.memory_space<vmem>>, %arg7: memref<1x128xf32, #tpu.memory_space<vmem>>, %arg8: memref<1x128xf32, #tpu.memory_space<vmem>>, %arg9: memref<16x128xbf16, #tpu.memory_space<vmem>>, %arg10: memref<16x128xf32, #tpu.memory_space<vmem>>) attributes {dimension_semantics = [#tpu.dimension_semantics<parallel>, #tpu.dimension_semantics<parallel>, #tpu.dimension_semantics<arbitrary>], iteration_bounds = array<i64: 1, 1, 1>, scalar_prefetch = 0 : i64, scratch_operands = 1 : i64, tpu.core_type = #tpu.core_type<tc>, window_params = [{transform_indices = @transform_0, window_bounds = array<i64: 16, 128>}, {transform_indices = @transform_1, window_bounds = array<i64: 128, 128>}, {transform_indices = @transform_2, window_bounds = array<i64: 1, 128>}, {transform_indices = @transform_3, window_bounds = array<i64: 16, 128>}, {transform_indices = @transform_4, window_bounds = array<i64: 1, 128>}, {transform_indices = @transform_5, window_bounds = array<i64: 1, 128>}, {transform_indices = @transform_6, window_bounds = array<i64: 16, 128>}]} {
    %c0_i32 = arith.constant 0 : i32
    %0 = arith.cmpi eq, %arg2, %c0_i32 : i32
    %1 = arith.extui %0 : i1 to i32
    %c0_i32_0 = arith.constant 0 : i32
    %2 = arith.cmpi ne, %1, %c0_i32_0 : i32
    scf.if %2 {
      %cst_10 = arith.constant 0.000000e+00 : f32
      %12 = vector.broadcast %cst_10 : f32 to vector<16x128xf32>
      %c0_11 = arith.constant 0 : index
      %c0_12 = arith.constant 0 : index
      %13 = vector.load %arg10[%c0_11, %c0_12] : memref<16x128xf32, #tpu.memory_space<vmem>>, vector<16x128xf32>
      tpu.vector_store %arg10[%c0_11, %c0_12], %12 {strides = array<i32>} : memref<16x128xf32, #tpu.memory_space<vmem>>, vector<16x128xf32>,
    } else {
    }
    %c0 = arith.constant 0 : index
    %c0_1 = arith.constant 0 : index
    %3 = vector.load %arg10[%c0, %c0_1] : memref<16x128xf32, #tpu.memory_space<vmem>>, vector<16x128xf32>
    %c0_2 = arith.constant 0 : index
    %c0_3 = arith.constant 0 : index
    %4 = vector.load %arg3[%c0_2, %c0_3] : memref<16x128xbf16, #tpu.memory_space<vmem>>, vector<16x128xbf16>
    %c0_4 = arith.constant 0 : index
    %c0_5 = arith.constant 0 : index
    %5 = vector.load %arg4[%c0_4, %c0_5] : memref<128x128xbf16, #tpu.memory_space<vmem>>, vector<128x128xbf16>
    %cst = arith.constant dense<0.000000e+00> : vector<16x128xf32>
    %6 = tpu.matmul %4, %5, %cst {dimension_numbers = #tpu.dot_dimension_numbers<[1], [0], [0], [1], [0, 0, 1, 1], [], []>} : vector<16x128xbf16>, vector<128x128xbf16>, vector<16x128xf32> -> vector<16x128xf32>
    %7 = arith.addf %3, %6 : vector<16x128xf32>
    %c0_6 = arith.constant 0 : index
    %c0_7 = arith.constant 0 : index
    %8 = vector.load %arg10[%c0_6, %c0_7] : memref<16x128xf32, #tpu.memory_space<vmem>>, vector<16x128xf32>
    tpu.vector_store %arg10[%c0_6, %c0_7], %7 {strides = array<i32>} : memref<16x128xf32, #tpu.memory_space<vmem>>, vector<16x128xf32>,
    %c0_i32_8 = arith.constant 0 : i32
    %9 = arith.cmpi eq, %arg2, %c0_i32_8 : i32
    %10 = arith.extui %9 : i1 to i32
    %c0_i32_9 = arith.constant 0 : i32
    %11 = arith.cmpi ne, %10, %c0_i32_9 : i32
    scf.if %11 {
      %c0_10 = arith.constant 0 : index
      %c0_11 = arith.constant 0 : index
      %12 = vector.load %arg10[%c0_10, %c0_11] : memref<16x128xf32, #tpu.memory_space<vmem>>, vector<16x128xf32>
      %c0_12 = arith.constant 0 : index
      %c0_13 = arith.constant 0 : index
      %13 = vector.load %arg5[%c0_12, %c0_13] : memref<1x128xf32, #tpu.memory_space<vmem>>, vector<1x128xf32>
      %14 = vector.broadcast %13 : vector<1x128xf32> to vector<16x128xf32>
      %15 = arith.addf %12, %14 : vector<16x128xf32>
      %c0_14 = arith.constant 0 : index
      %c0_15 = arith.constant 0 : index
      %16 = vector.load %arg6[%c0_14, %c0_15] : memref<16x128xbf16, #tpu.memory_space<vmem>>, vector<16x128xbf16>
      %17 = arith.extf %16 : vector<16x128xbf16> to vector<16x128xf32>
      %18 = arith.addf %15, %17 : vector<16x128xf32>
      %19 = tpu.iota {dimensions = array<i32: 1>} : vector<16x128xi32>
      %c32_i32 = arith.constant 32 : i32
      %20 = vector.broadcast %c32_i32 : i32 to vector<16x128xi32>
      %21 = arith.cmpi slt, %19, %20 : vector<16x128xi32>
      %cst_16 = arith.constant 0.000000e+00 : f32
      %22 = vector.broadcast %cst_16 : f32 to vector<16x128xf32>
      %23 = arith.select %21, %18, %22 : vector<16x128xi1>, vector<16x128xf32>
      %cst_17 = arith.constant dense<0.000000e+00> : vector<16xf32>
      %24 = vector.multi_reduction <add>, %23, %cst_17 [1] : vector<16x128xf32> to vector<16xf32>
      %25 = vector.shape_cast %24 : vector<16xf32> to vector<16x1xf32>
      %cst_18 = arith.constant 3.125000e-02 : f32
      %26 = vector.broadcast %cst_18 : f32 to vector<16x1xf32>
      %27 = arith.mulf %25, %26 : vector<16x1xf32>
      %28 = vector.broadcast %27 : vector<16x1xf32> to vector<16x128xf32>
      %29 = arith.subf %18, %28 : vector<16x128xf32>
      %cst_19 = arith.constant 0.000000e+00 : f32
      %30 = vector.broadcast %cst_19 : f32 to vector<16x128xf32>
      %31 = arith.select %21, %29, %30 : vector<16x128xi1>, vector<16x128xf32>
      %32 = arith.mulf %31, %31 : vector<16x128xf32>
      %cst_20 = arith.constant dense<0.000000e+00> : vector<16xf32>
      %33 = vector.multi_reduction <add>, %32, %cst_20 [1] : vector<16x128xf32> to vector<16xf32>
      %34 = vector.shape_cast %33 : vector<16xf32> to vector<16x1xf32>
      %cst_21 = arith.constant 3.125000e-02 : f32
      %35 = vector.broadcast %cst_21 : f32 to vector<16x1xf32>
      %36 = arith.mulf %34, %35 : vector<16x1xf32>
      %37 = vector.broadcast %27 : vector<16x1xf32> to vector<16x128xf32>
      %38 = arith.subf %18, %37 : vector<16x128xf32>
      %cst_22 = arith.constant 9.99999974E-6 : f32
      %39 = vector.broadcast %cst_22 : f32 to vector<16x1xf32>
      %40 = arith.addf %36, %39 : vector<16x1xf32>
      %41 = math.rsqrt %40 : vector<16x1xf32>
      %42 = vector.broadcast %41 : vector<16x1xf32> to vector<16x128xf32>
      %43 = arith.mulf %38, %42 : vector<16x128xf32>
      %c0_23 = arith.constant 0 : index
      %c0_24 = arith.constant 0 : index
      %44 = vector.load %arg7[%c0_23, %c0_24] : memref<1x128xf32, #tpu.memory_space<vmem>>, vector<1x128xf32>
      %45 = vector.broadcast %44 : vector<1x128xf32> to vector<16x128xf32>
      %46 = arith.mulf %43, %45 : vector<16x128xf32>
      %c0_25 = arith.constant 0 : index
      %c0_26 = arith.constant 0 : index
      %47 = vector.load %arg8[%c0_25, %c0_26] : memref<1x128xf32, #tpu.memory_space<vmem>>, vector<1x128xf32>
      %48 = vector.broadcast %47 : vector<1x128xf32> to vector<16x128xf32>
      %49 = arith.addf %46, %48 : vector<16x128xf32>
      %50 = arith.truncf %49 : vector<16x128xf32> to vector<16x128xbf16>
      %c0_27 = arith.constant 0 : index
      %c0_28 = arith.constant 0 : index
      %51 = vector.load %arg9[%c0_27, %c0_28] : memref<16x128xbf16, #tpu.memory_space<vmem>>, vector<16x128xbf16>
      tpu.vector_store %arg9[%c0_27, %c0_28], %50 {strides = array<i32>} : memref<16x128xbf16, #tpu.memory_space<vmem>>, vector<16x128xbf16>,
    } else {
    }
    return
  }
  func.func @transform_0(%arg0: i32, %arg1: i32, %arg2: i32) -> (i32, i32) {
    %c0_i32 = arith.constant 0 : i32
    return %arg0, %arg2 : i32, i32
  }
  func.func @transform_1(%arg0: i32, %arg1: i32, %arg2: i32) -> (i32, i32) {
    %c0_i32 = arith.constant 0 : i32
    return %arg2, %arg1 : i32, i32
  }
  func.func @transform_2(%arg0: i32, %arg1: i32, %arg2: i32) -> (i32, i32) {
    %c0_i32 = arith.constant 0 : i32
    %c0_i32_0 = arith.constant 0 : i32
    return %c0_i32, %arg1 : i32, i32
  }
  func.func @transform_3(%arg0: i32, %arg1: i32, %arg2: i32) -> (i32, i32) {
    %c0_i32 = arith.constant 0 : i32
    return %arg0, %arg1 : i32, i32
  }
  func.func @transform_4(%arg0: i32, %arg1: i32, %arg2: i32) -> (i32, i32) {
    %c0_i32 = arith.constant 0 : i32
    %c0_i32_0 = arith.constant 0 : i32
    return %c0_i32, %arg1 : i32, i32
  }
  func.func @transform_5(%arg0: i32, %arg1: i32, %arg2: i32) -> (i32, i32) {
    %c0_i32 = arith.constant 0 : i32
    %c0_i32_0 = arith.constant 0 : i32
    return %c0_i32, %arg1 : i32, i32
  }
  func.func @transform_6(%arg0: i32, %arg1: i32, %arg2: i32) -> (i32, i32) {
    %c0_i32 = arith.constant 0 : i32
    return %arg0, %arg1 : i32, i32
  }
}

module attributes {stable_mosaic.version = 11 : i64} {
  func.func @_flash_attn_kernel(%arg0: i32, %arg1: i32, %arg2: i32, %arg3: memref<1x1x8xf32, #tpu.memory_space<vmem>>, %arg4: memref<1x8x32xbf16, #tpu.memory_space<vmem>>, %arg5: memref<1x8x32xbf16, #tpu.memory_space<vmem>>, %arg6: memref<1x8x32xbf16, #tpu.memory_space<vmem>>, %arg7: memref<1x8x32xbf16, #tpu.memory_space<vmem>>, %arg8: memref<8x4xf32, #tpu.memory_space<vmem>>, %arg9: memref<8x4xf32, #tpu.memory_space<vmem>>, %arg10: memref<8x32xf32, #tpu.memory_space<vmem>>) attributes {dimension_semantics = [#tpu.dimension_semantics<parallel>, #tpu.dimension_semantics<parallel>, #tpu.dimension_semantics<arbitrary>], iteration_bounds = array<i64: 2, 1, 1>, scalar_prefetch = 0 : i64, scratch_operands = 3 : i64, tpu.core_type = #tpu.core_type<tc>, window_params = [{transform_indices = @transform_0, window_bounds = array<i64: 1, 1, 8>}, {transform_indices = @transform_1, window_bounds = array<i64: 1, 8, 32>}, {transform_indices = @transform_2, window_bounds = array<i64: 1, 8, 32>}, {transform_indices = @transform_3, window_bounds = array<i64: 1, 8, 32>}, {transform_indices = @transform_4, window_bounds = array<i64: 1, 8, 32>}]} {
    %c0_i32 = arith.constant 0 : i32
    %0 = arith.cmpi eq, %arg2, %c0_i32 : i32
    %1 = arith.extui %0 : i1 to i32
    %c0_i32_0 = arith.constant 0 : i32
    %2 = arith.cmpi ne, %1, %c0_i32_0 : i32
    scf.if %2 {
      %cst_84 = arith.constant -1.000000e+30 : f32
      %164 = vector.broadcast %cst_84 : f32 to vector<8x4xf32>
      %c0_85 = arith.constant 0 : index
      %c0_86 = arith.constant 0 : index
      %165 = vector.load %arg8[%c0_85, %c0_86] : memref<8x4xf32, #tpu.memory_space<vmem>>, vector<8x4xf32>
      tpu.vector_store %arg8[%c0_85, %c0_86], %164 {strides = array<i32>} : memref<8x4xf32, #tpu.memory_space<vmem>>, vector<8x4xf32>,
      %cst_87 = arith.constant 0.000000e+00 : f32
      %166 = vector.broadcast %cst_87 : f32 to vector<8x4xf32>
      %c0_88 = arith.constant 0 : index
      %c0_89 = arith.constant 0 : index
      %167 = vector.load %arg9[%c0_88, %c0_89] : memref<8x4xf32, #tpu.memory_space<vmem>>, vector<8x4xf32>
      tpu.vector_store %arg9[%c0_88, %c0_89], %166 {strides = array<i32>} : memref<8x4xf32, #tpu.memory_space<vmem>>, vector<8x4xf32>,
      %cst_90 = arith.constant 0.000000e+00 : f32
      %168 = vector.broadcast %cst_90 : f32 to vector<8x32xf32>
      %c0_91 = arith.constant 0 : index
      %c0_92 = arith.constant 0 : index
      %169 = vector.load %arg10[%c0_91, %c0_92] : memref<8x32xf32, #tpu.memory_space<vmem>>, vector<8x32xf32>
      tpu.vector_store %arg10[%c0_91, %c0_92], %168 {strides = array<i32>} : memref<8x32xf32, #tpu.memory_space<vmem>>, vector<8x32xf32>,
    } else {
    }
    %c0 = arith.constant 0 : index
    %c0_1 = arith.constant 0 : index
    %c0_2 = arith.constant 0 : index
    %3 = vector.load %arg4[%c0, %c0_1, %c0_2] : memref<1x8x32xbf16, #tpu.memory_space<vmem>>, vector<1x8x32xbf16>
    %4 = vector.shape_cast %3 : vector<1x8x32xbf16> to vector<8x32xbf16>
    %c0_3 = arith.constant 0 : index
    %c0_4 = arith.constant 0 : index
    %c0_5 = arith.constant 0 : index
    %5 = vector.load %arg5[%c0_3, %c0_4, %c0_5] : memref<1x8x32xbf16, #tpu.memory_space<vmem>>, vector<1x8x32xbf16>
    %6 = vector.shape_cast %5 : vector<1x8x32xbf16> to vector<8x32xbf16>
    %c0_6 = arith.constant 0 : index
    %c0_7 = arith.constant 0 : index
    %c0_8 = arith.constant 0 : index
    %7 = vector.load %arg6[%c0_6, %c0_7, %c0_8] : memref<1x8x32xbf16, #tpu.memory_space<vmem>>, vector<1x8x32xbf16>
    %8 = vector.shape_cast %7 : vector<1x8x32xbf16> to vector<8x32xbf16>
    %c0_9 = arith.constant 0 : index
    %c0_10 = arith.constant 0 : index
    %c0_11 = arith.constant 0 : index
    %9 = vector.load %arg3[%c0_9, %c0_10, %c0_11] : memref<1x1x8xf32, #tpu.memory_space<vmem>>, vector<1x1x8xf32>
    %10 = vector.shape_cast %9 : vector<1x1x8xf32> to vector<1x8xf32>
    %cst = arith.constant 0.000000e+00 : f32
    %11 = vector.broadcast %cst : f32 to vector<1x8xf32>
    %12 = arith.cmpf ogt, %10, %11 : vector<1x8xf32>
    %13 = vector.extract_strided_slice %4 {offsets = [0, 0], sizes = [8, 8], strides = [1, 1]} : vector<8x32xbf16> to vector<8x8xbf16>
    %14 = vector.extract_strided_slice %6 {offsets = [0, 0], sizes = [8, 8], strides = [1, 1]} : vector<8x32xbf16> to vector<8x8xbf16>
    %cst_12 = arith.constant dense<0.000000e+00> : vector<8x8xf32>
    %15 = tpu.matmul %13, %14, %cst_12 {dimension_numbers = #tpu.dot_dimension_numbers<[1], [1], [0], [0], [0, 0, 1, 0], [], []>} : vector<8x8xbf16>, vector<8x8xbf16>, vector<8x8xf32> -> vector<8x8xf32>
    %cst_13 = arith.constant 0.353553385 : f32
    %16 = vector.broadcast %cst_13 : f32 to vector<8x8xf32>
    %17 = arith.mulf %15, %16 : vector<8x8xf32>
    %cst_14 = arith.constant -1.000000e+30 : f32
    %18 = vector.shape_cast %12 : vector<1x8xi1> to vector<1x8xi1>
    %19 = vector.broadcast %18 : vector<1x8xi1> to vector<8x8xi1>
    %20 = vector.broadcast %cst_14 : f32 to vector<8x8xf32>
    %21 = arith.select %19, %17, %20 : vector<8x8xi1>, vector<8x8xf32>
    %c0_15 = arith.constant 0 : index
    %c0_16 = arith.constant 0 : index
    %22 = vector.load %arg8[%c0_15, %c0_16] : memref<8x4xf32, #tpu.memory_space<vmem>>, vector<8x1xf32>
    %cst_17 = arith.constant dense<0xFF800000> : vector<8xf32>
    %23 = vector.multi_reduction <maximumf>, %21, %cst_17 [1] : vector<8x8xf32> to vector<8xf32>
    %24 = vector.shape_cast %23 : vector<8xf32> to vector<8x1xf32>
    %25 = arith.maximumf %22, %24 : vector<8x1xf32>
    %26 = vector.broadcast %25 : vector<8x1xf32> to vector<8x8xf32>
    %27 = arith.subf %21, %26 : vector<8x8xf32>
    %28 = math.exp %27 : vector<8x8xf32>
    %cst_18 = arith.constant 0.000000e+00 : f32
    %29 = vector.shape_cast %12 : vector<1x8xi1> to vector<1x8xi1>
    %30 = vector.broadcast %29 : vector<1x8xi1> to vector<8x8xi1>
    %31 = vector.broadcast %cst_18 : f32 to vector<8x8xf32>
    %32 = arith.select %30, %28, %31 : vector<8x8xi1>, vector<8x8xf32>
    %33 = arith.subf %22, %25 : vector<8x1xf32>
    %34 = math.exp %33 : vector<8x1xf32>
    %c0_19 = arith.constant 0 : index
    %c0_20 = arith.constant 0 : index
    %35 = vector.load %arg9[%c0_19, %c0_20] : memref<8x4xf32, #tpu.memory_space<vmem>>, vector<8x1xf32>
    %36 = arith.mulf %34, %35 : vector<8x1xf32>
    %cst_21 = arith.constant dense<0.000000e+00> : vector<8xf32>
    %37 = vector.multi_reduction <add>, %32, %cst_21 [1] : vector<8x8xf32> to vector<8xf32>
    %38 = vector.shape_cast %37 : vector<8xf32> to vector<8x1xf32>
    %39 = arith.addf %36, %38 : vector<8x1xf32>
    %c0_22 = arith.constant 0 : index
    %c0_23 = arith.constant 0 : index
    %40 = vector.load %arg9[%c0_22, %c0_23] : memref<8x4xf32, #tpu.memory_space<vmem>>, vector<8x1xf32>
    tpu.vector_store %arg9[%c0_22, %c0_23], %39 {strides = array<i32>} : memref<8x4xf32, #tpu.memory_space<vmem>>, vector<8x1xf32>,
    %c0_24 = arith.constant 0 : index
    %c0_25 = arith.constant 0 : index
    %41 = vector.load %arg10[%c0_24, %c0_25] : memref<8x32xf32, #tpu.memory_space<vmem>>, vector<8x8xf32>
    %42 = vector.broadcast %34 : vector<8x1xf32> to vector<8x8xf32>
    %43 = arith.mulf %42, %41 : vector<8x8xf32>
    %44 = arith.truncf %32 : vector<8x8xf32> to vector<8x8xbf16>
    %45 = vector.extract_strided_slice %8 {offsets = [0, 0], sizes = [8, 8], strides = [1, 1]} : vector<8x32xbf16> to vector<8x8xbf16>
    %cst_26 = arith.constant dense<0.000000e+00> : vector<8x8xf32>
    %46 = tpu.matmul %44, %45, %cst_26 {dimension_numbers = #tpu.dot_dimension_numbers<[1], [0], [0], [1], [0, 0, 1, 1], [], []>} : vector<8x8xbf16>, vector<8x8xbf16>, vector<8x8xf32> -> vector<8x8xf32>
    %47 = arith.addf %43, %46 : vector<8x8xf32>
    %c0_27 = arith.constant 0 : index
    %c0_28 = arith.constant 0 : index
    %48 = vector.load %arg10[%c0_27, %c0_28] : memref<8x32xf32, #tpu.memory_space<vmem>>, vector<8x8xf32>
    tpu.vector_store %arg10[%c0_27, %c0_28], %47 {strides = array<i32>} : memref<8x32xf32, #tpu.memory_space<vmem>>, vector<8x8xf32>,
    %c0_29 = arith.constant 0 : index
    %c0_30 = arith.constant 0 : index
    %49 = vector.load %arg8[%c0_29, %c0_30] : memref<8x4xf32, #tpu.memory_space<vmem>>, vector<8x1xf32>
    tpu.vector_store %arg8[%c0_29, %c0_30], %25 {strides = array<i32>} : memref<8x4xf32, #tpu.memory_space<vmem>>, vector<8x1xf32>,
    %50 = vector.extract_strided_slice %4 {offsets = [0, 8], sizes = [8, 8], strides = [1, 1]} : vector<8x32xbf16> to vector<8x8xbf16>
    %51 = vector.extract_strided_slice %6 {offsets = [0, 8], sizes = [8, 8], strides = [1, 1]} : vector<8x32xbf16> to vector<8x8xbf16>
    %cst_31 = arith.constant dense<0.000000e+00> : vector<8x8xf32>
    %52 = tpu.matmul %50, %51, %cst_31 {dimension_numbers = #tpu.dot_dimension_numbers<[1], [1], [0], [0], [0, 0, 1, 0], [], []>} : vector<8x8xbf16>, vector<8x8xbf16>, vector<8x8xf32> -> vector<8x8xf32>
    %cst_32 = arith.constant 0.353553385 : f32
    %53 = vector.broadcast %cst_32 : f32 to vector<8x8xf32>
    %54 = arith.mulf %52, %53 : vector<8x8xf32>
    %cst_33 = arith.constant -1.000000e+30 : f32
    %55 = vector.shape_cast %12 : vector<1x8xi1> to vector<1x8xi1>
    %56 = vector.broadcast %55 : vector<1x8xi1> to vector<8x8xi1>
    %57 = vector.broadcast %cst_33 : f32 to vector<8x8xf32>
    %58 = arith.select %56, %54, %57 : vector<8x8xi1>, vector<8x8xf32>
    %c0_34 = arith.constant 0 : index
    %c1 = arith.constant 1 : index
    %59 = vector.load %arg8[%c0_34, %c1] : memref<8x4xf32, #tpu.memory_space<vmem>>, vector<8x1xf32>
    %cst_35 = arith.constant dense<0xFF800000> : vector<8xf32>
    %60 = vector.multi_reduction <maximumf>, %58, %cst_35 [1] : vector<8x8xf32> to vector<8xf32>
    %61 = vector.shape_cast %60 : vector<8xf32> to vector<8x1xf32>
    %62 = arith.maximumf %59, %61 : vector<8x1xf32>
    %63 = vector.broadcast %62 : vector<8x1xf32> to vector<8x8xf32>
    %64 = arith.subf %58, %63 : vector<8x8xf32>
    %65 = math.exp %64 : vector<8x8xf32>
    %cst_36 = arith.constant 0.000000e+00 : f32
    %66 = vector.shape_cast %12 : vector<1x8xi1> to vector<1x8xi1>
    %67 = vector.broadcast %66 : vector<1x8xi1> to vector<8x8xi1>
    %68 = vector.broadcast %cst_36 : f32 to vector<8x8xf32>
    %69 = arith.select %67, %65, %68 : vector<8x8xi1>, vector<8x8xf32>
    %70 = arith.subf %59, %62 : vector<8x1xf32>
    %71 = math.exp %70 : vector<8x1xf32>
    %c0_37 = arith.constant 0 : index
    %c1_38 = arith.constant 1 : index
    %72 = vector.load %arg9[%c0_37, %c1_38] : memref<8x4xf32, #tpu.memory_space<vmem>>, vector<8x1xf32>
    %73 = arith.mulf %71, %72 : vector<8x1xf32>
    %cst_39 = arith.constant dense<0.000000e+00> : vector<8xf32>
    %74 = vector.multi_reduction <add>, %69, %cst_39 [1] : vector<8x8xf32> to vector<8xf32>
    %75 = vector.shape_cast %74 : vector<8xf32> to vector<8x1xf32>
    %76 = arith.addf %73, %75 : vector<8x1xf32>
    %c0_40 = arith.constant 0 : index
    %c1_41 = arith.constant 1 : index
    %77 = vector.load %arg9[%c0_40, %c1_41] : memref<8x4xf32, #tpu.memory_space<vmem>>, vector<8x1xf32>
    tpu.vector_store %arg9[%c0_40, %c1_41], %76 {strides = array<i32>} : memref<8x4xf32, #tpu.memory_space<vmem>>, vector<8x1xf32>,
    %c0_42 = arith.constant 0 : index
    %c8 = arith.constant 8 : index
    %78 = vector.load %arg10[%c0_42, %c8] : memref<8x32xf32, #tpu.memory_space<vmem>>, vector<8x8xf32>
    %79 = vector.broadcast %71 : vector<8x1xf32> to vector<8x8xf32>
    %80 = arith.mulf %79, %78 : vector<8x8xf32>
    %81 = arith.truncf %69 : vector<8x8xf32> to vector<8x8xbf16>
    %82 = vector.extract_strided_slice %8 {offsets = [0, 8], sizes = [8, 8], strides = [1, 1]} : vector<8x32xbf16> to vector<8x8xbf16>
    %cst_43 = arith.constant dense<0.000000e+00> : vector<8x8xf32>
    %83 = tpu.matmul %81, %82, %cst_43 {dimension_numbers = #tpu.dot_dimension_numbers<[1], [0], [0], [1], [0, 0, 1, 1], [], []>} : vector<8x8xbf16>, vector<8x8xbf16>, vector<8x8xf32> -> vector<8x8xf32>
    %84 = arith.addf %80, %83 : vector<8x8xf32>
    %c0_44 = arith.constant 0 : index
    %c8_45 = arith.constant 8 : index
    %85 = vector.load %arg10[%c0_44, %c8_45] : memref<8x32xf32, #tpu.memory_space<vmem>>, vector<8x8xf32>
    tpu.vector_store %arg10[%c0_44, %c8_45], %84 {strides = array<i32>} : memref<8x32xf32, #tpu.memory_space<vmem>>, vector<8x8xf32>,
    %c0_46 = arith.constant 0 : index
    %c1_47 = arith.constant 1 : index
    %86 = vector.load %arg8[%c0_46, %c1_47] : memref<8x4xf32, #tpu.memory_space<vmem>>, vector<8x1xf32>
    tpu.vector_store %arg8[%c0_46, %c1_47], %62 {strides = array<i32>} : memref<8x4xf32, #tpu.memory_space<vmem>>, vector<8x1xf32>,
    %87 = vector.extract_strided_slice %4 {offsets = [0, 16], sizes = [8, 8], strides = [1, 1]} : vector<8x32xbf16> to vector<8x8xbf16>
    %88 = vector.extract_strided_slice %6 {offsets = [0, 16], sizes = [8, 8], strides = [1, 1]} : vector<8x32xbf16> to vector<8x8xbf16>
    %cst_48 = arith.constant dense<0.000000e+00> : vector<8x8xf32>
    %89 = tpu.matmul %87, %88, %cst_48 {dimension_numbers = #tpu.dot_dimension_numbers<[1], [1], [0], [0], [0, 0, 1, 0], [], []>} : vector<8x8xbf16>, vector<8x8xbf16>, vector<8x8xf32> -> vector<8x8xf32>
    %cst_49 = arith.constant 0.353553385 : f32
    %90 = vector.broadcast %cst_49 : f32 to vector<8x8xf32>
    %91 = arith.mulf %89, %90 : vector<8x8xf32>
    %cst_50 = arith.constant -1.000000e+30 : f32
    %92 = vector.shape_cast %12 : vector<1x8xi1> to vector<1x8xi1>
    %93 = vector.broadcast %92 : vector<1x8xi1> to vector<8x8xi1>
    %94 = vector.broadcast %cst_50 : f32 to vector<8x8xf32>
    %95 = arith.select %93, %91, %94 : vector<8x8xi1>, vector<8x8xf32>
    %c0_51 = arith.constant 0 : index
    %c2 = arith.constant 2 : index
    %96 = vector.load %arg8[%c0_51, %c2] : memref<8x4xf32, #tpu.memory_space<vmem>>, vector<8x1xf32>
    %cst_52 = arith.constant dense<0xFF800000> : vector<8xf32>
    %97 = vector.multi_reduction <maximumf>, %95, %cst_52 [1] : vector<8x8xf32> to vector<8xf32>
    %98 = vector.shape_cast %97 : vector<8xf32> to vector<8x1xf32>
    %99 = arith.maximumf %96, %98 : vector<8x1xf32>
    %100 = vector.broadcast %99 : vector<8x1xf32> to vector<8x8xf32>
    %101 = arith.subf %95, %100 : vector<8x8xf32>
    %102 = math.exp %101 : vector<8x8xf32>
    %cst_53 = arith.constant 0.000000e+00 : f32
    %103 = vector.shape_cast %12 : vector<1x8xi1> to vector<1x8xi1>
    %104 = vector.broadcast %103 : vector<1x8xi1> to vector<8x8xi1>
    %105 = vector.broadcast %cst_53 : f32 to vector<8x8xf32>
    %106 = arith.select %104, %102, %105 : vector<8x8xi1>, vector<8x8xf32>
    %107 = arith.subf %96, %99 : vector<8x1xf32>
    %108 = math.exp %107 : vector<8x1xf32>
    %c0_54 = arith.constant 0 : index
    %c2_55 = arith.constant 2 : index
    %109 = vector.load %arg9[%c0_54, %c2_55] : memref<8x4xf32, #tpu.memory_space<vmem>>, vector<8x1xf32>
    %110 = arith.mulf %108, %109 : vector<8x1xf32>
    %cst_56 = arith.constant dense<0.000000e+00> : vector<8xf32>
    %111 = vector.multi_reduction <add>, %106, %cst_56 [1] : vector<8x8xf32> to vector<8xf32>
    %112 = vector.shape_cast %111 : vector<8xf32> to vector<8x1xf32>
    %113 = arith.addf %110, %112 : vector<8x1xf32>
    %c0_57 = arith.constant 0 : index
    %c2_58 = arith.constant 2 : index
    %114 = vector.load %arg9[%c0_57, %c2_58] : memref<8x4xf32, #tpu.memory_space<vmem>>, vector<8x1xf32>
    tpu.vector_store %arg9[%c0_57, %c2_58], %113 {strides = array<i32>} : memref<8x4xf32, #tpu.memory_space<vmem>>, vector<8x1xf32>,
    %c0_59 = arith.constant 0 : index
    %c16 = arith.constant 16 : index
    %115 = vector.load %arg10[%c0_59, %c16] : memref<8x32xf32, #tpu.memory_space<vmem>>, vector<8x8xf32>
    %116 = vector.broadcast %108 : vector<8x1xf32> to vector<8x8xf32>
    %117 = arith.mulf %116, %115 : vector<8x8xf32>
    %118 = arith.truncf %106 : vector<8x8xf32> to vector<8x8xbf16>
    %119 = vector.extract_strided_slice %8 {offsets = [0, 16], sizes = [8, 8], strides = [1, 1]} : vector<8x32xbf16> to vector<8x8xbf16>
    %cst_60 = arith.constant dense<0.000000e+00> : vector<8x8xf32>
    %120 = tpu.matmul %118, %119, %cst_60 {dimension_numbers = #tpu.dot_dimension_numbers<[1], [0], [0], [1], [0, 0, 1, 1], [], []>} : vector<8x8xbf16>, vector<8x8xbf16>, vector<8x8xf32> -> vector<8x8xf32>
    %121 = arith.addf %117, %120 : vector<8x8xf32>
    %c0_61 = arith.constant 0 : index
    %c16_62 = arith.constant 16 : index
    %122 = vector.load %arg10[%c0_61, %c16_62] : memref<8x32xf32, #tpu.memory_space<vmem>>, vector<8x8xf32>
    tpu.vector_store %arg10[%c0_61, %c16_62], %121 {strides = array<i32>} : memref<8x32xf32, #tpu.memory_space<vmem>>, vector<8x8xf32>,
    %c0_63 = arith.constant 0 : index
    %c2_64 = arith.constant 2 : index
    %123 = vector.load %arg8[%c0_63, %c2_64] : memref<8x4xf32, #tpu.memory_space<vmem>>, vector<8x1xf32>
    tpu.vector_store %arg8[%c0_63, %c2_64], %99 {strides = array<i32>} : memref<8x4xf32, #tpu.memory_space<vmem>>, vector<8x1xf32>,
    %124 = vector.extract_strided_slice %4 {offsets = [0, 24], sizes = [8, 8], strides = [1, 1]} : vector<8x32xbf16> to vector<8x8xbf16>
    %125 = vector.extract_strided_slice %6 {offsets = [0, 24], sizes = [8, 8], strides = [1, 1]} : vector<8x32xbf16> to vector<8x8xbf16>
    %cst_65 = arith.constant dense<0.000000e+00> : vector<8x8xf32>
    %126 = tpu.matmul %124, %125, %cst_65 {dimension_numbers = #tpu.dot_dimension_numbers<[1], [1], [0], [0], [0, 0, 1, 0], [], []>} : vector<8x8xbf16>, vector<8x8xbf16>, vector<8x8xf32> -> vector<8x8xf32>
    %cst_66 = arith.constant 0.353553385 : f32
    %127 = vector.broadcast %cst_66 : f32 to vector<8x8xf32>
    %128 = arith.mulf %126, %127 : vector<8x8xf32>
    %cst_67 = arith.constant -1.000000e+30 : f32
    %129 = vector.shape_cast %12 : vector<1x8xi1> to vector<1x8xi1>
    %130 = vector.broadcast %129 : vector<1x8xi1> to vector<8x8xi1>
    %131 = vector.broadcast %cst_67 : f32 to vector<8x8xf32>
    %132 = arith.select %130, %128, %131 : vector<8x8xi1>, vector<8x8xf32>
    %c0_68 = arith.constant 0 : index
    %c3 = arith.constant 3 : index
    %133 = vector.load %arg8[%c0_68, %c3] : memref<8x4xf32, #tpu.memory_space<vmem>>, vector<8x1xf32>
    %cst_69 = arith.constant dense<0xFF800000> : vector<8xf32>
    %134 = vector.multi_reduction <maximumf>, %132, %cst_69 [1] : vector<8x8xf32> to vector<8xf32>
    %135 = vector.shape_cast %134 : vector<8xf32> to vector<8x1xf32>
    %136 = arith.maximumf %133, %135 : vector<8x1xf32>
    %137 = vector.broadcast %136 : vector<8x1xf32> to vector<8x8xf32>
    %138 = arith.subf %132, %137 : vector<8x8xf32>
    %139 = math.exp %138 : vector<8x8xf32>
    %cst_70 = arith.constant 0.000000e+00 : f32
    %140 = vector.shape_cast %12 : vector<1x8xi1> to vector<1x8xi1>
    %141 = vector.broadcast %140 : vector<1x8xi1> to vector<8x8xi1>
    %142 = vector.broadcast %cst_70 : f32 to vector<8x8xf32>
    %143 = arith.select %141, %139, %142 : vector<8x8xi1>, vector<8x8xf32>
    %144 = arith.subf %133, %136 : vector<8x1xf32>
    %145 = math.exp %144 : vector<8x1xf32>
    %c0_71 = arith.constant 0 : index
    %c3_72 = arith.constant 3 : index
    %146 = vector.load %arg9[%c0_71, %c3_72] : memref<8x4xf32, #tpu.memory_space<vmem>>, vector<8x1xf32>
    %147 = arith.mulf %145, %146 : vector<8x1xf32>
    %cst_73 = arith.constant dense<0.000000e+00> : vector<8xf32>
    %148 = vector.multi_reduction <add>, %143, %cst_73 [1] : vector<8x8xf32> to vector<8xf32>
    %149 = vector.shape_cast %148 : vector<8xf32> to vector<8x1xf32>
    %150 = arith.addf %147, %149 : vector<8x1xf32>
    %c0_74 = arith.constant 0 : index
    %c3_75 = arith.constant 3 : index
    %151 = vector.load %arg9[%c0_74, %c3_75] : memref<8x4xf32, #tpu.memory_space<vmem>>, vector<8x1xf32>
    tpu.vector_store %arg9[%c0_74, %c3_75], %150 {strides = array<i32>} : memref<8x4xf32, #tpu.memory_space<vmem>>, vector<8x1xf32>,
    %c0_76 = arith.constant 0 : index
    %c24 = arith.constant 24 : index
    %152 = vector.load %arg10[%c0_76, %c24] : memref<8x32xf32, #tpu.memory_space<vmem>>, vector<8x8xf32>
    %153 = vector.broadcast %145 : vector<8x1xf32> to vector<8x8xf32>
    %154 = arith.mulf %153, %152 : vector<8x8xf32>
    %155 = arith.truncf %143 : vector<8x8xf32> to vector<8x8xbf16>
    %156 = vector.extract_strided_slice %8 {offsets = [0, 24], sizes = [8, 8], strides = [1, 1]} : vector<8x32xbf16> to vector<8x8xbf16>
    %cst_77 = arith.constant dense<0.000000e+00> : vector<8x8xf32>
    %157 = tpu.matmul %155, %156, %cst_77 {dimension_numbers = #tpu.dot_dimension_numbers<[1], [0], [0], [1], [0, 0, 1, 1], [], []>} : vector<8x8xbf16>, vector<8x8xbf16>, vector<8x8xf32> -> vector<8x8xf32>
    %158 = arith.addf %154, %157 : vector<8x8xf32>
    %c0_78 = arith.constant 0 : index
    %c24_79 = arith.constant 24 : index
    %159 = vector.load %arg10[%c0_78, %c24_79] : memref<8x32xf32, #tpu.memory_space<vmem>>, vector<8x8xf32>
    tpu.vector_store %arg10[%c0_78, %c24_79], %158 {strides = array<i32>} : memref<8x32xf32, #tpu.memory_space<vmem>>, vector<8x8xf32>,
    %c0_80 = arith.constant 0 : index
    %c3_81 = arith.constant 3 : index
    %160 = vector.load %arg8[%c0_80, %c3_81] : memref<8x4xf32, #tpu.memory_space<vmem>>, vector<8x1xf32>
    tpu.vector_store %arg8[%c0_80, %c3_81], %136 {strides = array<i32>} : memref<8x4xf32, #tpu.memory_space<vmem>>, vector<8x1xf32>,
    %c0_i32_82 = arith.constant 0 : i32
    %161 = arith.cmpi eq, %arg2, %c0_i32_82 : i32
    %162 = arith.extui %161 : i1 to i32
    %c0_i32_83 = arith.constant 0 : i32
    %163 = arith.cmpi ne, %162, %c0_i32_83 : i32
    scf.if %163 {
      %c0_84 = arith.constant 0 : index
      %c0_85 = arith.constant 0 : index
      %164 = vector.load %arg9[%c0_84, %c0_85] : memref<8x4xf32, #tpu.memory_space<vmem>>, vector<8x1xf32>
      %cst_86 = arith.constant 0.000000e+00 : f32
      %165 = vector.broadcast %cst_86 : f32 to vector<8x1xf32>
      %166 = arith.cmpf ole, %164, %165 : vector<8x1xf32>
      %cst_87 = arith.constant 1.000000e+00 : f32
      %167 = vector.broadcast %cst_87 : f32 to vector<8x1xf32>
      %168 = arith.select %166, %167, %164 : vector<8x1xi1>, vector<8x1xf32>
      %c0_88 = arith.constant 0 : index
      %c0_89 = arith.constant 0 : index
      %169 = vector.load %arg10[%c0_88, %c0_89] : memref<8x32xf32, #tpu.memory_space<vmem>>, vector<8x8xf32>
      %170 = tpu.reciprocal %168 {approx = true} : vector<8x1xf32> -> vector<8x1xf32>
      %171 = vector.broadcast %170 : vector<8x1xf32> to vector<8x8xf32>
      %172 = arith.mulf %169, %171 : vector<8x8xf32>
      %173 = arith.truncf %172 : vector<8x8xf32> to vector<8x8xbf16>
      %c0_90 = arith.constant 0 : index
      %c0_91 = arith.constant 0 : index
      %c0_92 = arith.constant 0 : index
      %174 = vector.load %arg7[%c0_90, %c0_91, %c0_92] : memref<1x8x32xbf16, #tpu.memory_space<vmem>>, vector<1x8x8xbf16>
      %175 = vector.shape_cast %174 : vector<1x8x8xbf16> to vector<8x8xbf16>
      %176 = vector.shape_cast %173 : vector<8x8xbf16> to vector<1x8x8xbf16>
      tpu.vector_store %arg7[%c0_90, %c0_91, %c0_92], %176 {strides = array<i32>} : memref<1x8x32xbf16, #tpu.memory_space<vmem>>, vector<1x8x8xbf16>,
      %c0_93 = arith.constant 0 : index
      %c1_94 = arith.constant 1 : index
      %177 = vector.load %arg9[%c0_93, %c1_94] : memref<8x4xf32, #tpu.memory_space<vmem>>, vector<8x1xf32>
      %cst_95 = arith.constant 0.000000e+00 : f32
      %178 = vector.broadcast %cst_95 : f32 to vector<8x1xf32>
      %179 = arith.cmpf ole, %177, %178 : vector<8x1xf32>
      %cst_96 = arith.constant 1.000000e+00 : f32
      %180 = vector.broadcast %cst_96 : f32 to vector<8x1xf32>
      %181 = arith.select %179, %180, %177 : vector<8x1xi1>, vector<8x1xf32>
      %c0_97 = arith.constant 0 : index
      %c8_98 = arith.constant 8 : index
      %182 = vector.load %arg10[%c0_97, %c8_98] : memref<8x32xf32, #tpu.memory_space<vmem>>, vector<8x8xf32>
      %183 = tpu.reciprocal %181 {approx = true} : vector<8x1xf32> -> vector<8x1xf32>
      %184 = vector.broadcast %183 : vector<8x1xf32> to vector<8x8xf32>
      %185 = arith.mulf %182, %184 : vector<8x8xf32>
      %186 = arith.truncf %185 : vector<8x8xf32> to vector<8x8xbf16>
      %c0_99 = arith.constant 0 : index
      %c0_100 = arith.constant 0 : index
      %c8_101 = arith.constant 8 : index
      %187 = vector.load %arg7[%c0_99, %c0_100, %c8_101] : memref<1x8x32xbf16, #tpu.memory_space<vmem>>, vector<1x8x8xbf16>
      %188 = vector.shape_cast %187 : vector<1x8x8xbf16> to vector<8x8xbf16>
      %189 = vector.shape_cast %186 : vector<8x8xbf16> to vector<1x8x8xbf16>
      tpu.vector_store %arg7[%c0_99, %c0_100, %c8_101], %189 {strides = array<i32>} : memref<1x8x32xbf16, #tpu.memory_space<vmem>>, vector<1x8x8xbf16>,
      %c0_102 = arith.constant 0 : index
      %c2_103 = arith.constant 2 : index
      %190 = vector.load %arg9[%c0_102, %c2_103] : memref<8x4xf32, #tpu.memory_space<vmem>>, vector<8x1xf32>
      %cst_104 = arith.constant 0.000000e+00 : f32
      %191 = vector.broadcast %cst_104 : f32 to vector<8x1xf32>
      %192 = arith.cmpf ole, %190, %191 : vector<8x1xf32>
      %cst_105 = arith.constant 1.000000e+00 : f32
      %193 = vector.broadcast %cst_105 : f32 to vector<8x1xf32>
      %194 = arith.select %192, %193, %190 : vector<8x1xi1>, vector<8x1xf32>
      %c0_106 = arith.constant 0 : index
      %c16_107 = arith.constant 16 : index
      %195 = vector.load %arg10[%c0_106, %c16_107] : memref<8x32xf32, #tpu.memory_space<vmem>>, vector<8x8xf32>
      %196 = tpu.reciprocal %194 {approx = true} : vector<8x1xf32> -> vector<8x1xf32>
      %197 = vector.broadcast %196 : vector<8x1xf32> to vector<8x8xf32>
      %198 = arith.mulf %195, %197 : vector<8x8xf32>
      %199 = arith.truncf %198 : vector<8x8xf32> to vector<8x8xbf16>
      %c0_108 = arith.constant 0 : index
      %c0_109 = arith.constant 0 : index
      %c16_110 = arith.constant 16 : index
      %200 = vector.load %arg7[%c0_108, %c0_109, %c16_110] : memref<1x8x32xbf16, #tpu.memory_space<vmem>>, vector<1x8x8xbf16>
      %201 = vector.shape_cast %200 : vector<1x8x8xbf16> to vector<8x8xbf16>
      %202 = vector.shape_cast %199 : vector<8x8xbf16> to vector<1x8x8xbf16>
      tpu.vector_store %arg7[%c0_108, %c0_109, %c16_110], %202 {strides = array<i32>} : memref<1x8x32xbf16, #tpu.memory_space<vmem>>, vector<1x8x8xbf16>,
      %c0_111 = arith.constant 0 : index
      %c3_112 = arith.constant 3 : index
      %203 = vector.load %arg9[%c0_111, %c3_112] : memref<8x4xf32, #tpu.memory_space<vmem>>, vector<8x1xf32>
      %cst_113 = arith.constant 0.000000e+00 : f32
      %204 = vector.broadcast %cst_113 : f32 to vector<8x1xf32>
      %205 = arith.cmpf ole, %203, %204 : vector<8x1xf32>
      %cst_114 = arith.constant 1.000000e+00 : f32
      %206 = vector.broadcast %cst_114 : f32 to vector<8x1xf32>
      %207 = arith.select %205, %206, %203 : vector<8x1xi1>, vector<8x1xf32>
      %c0_115 = arith.constant 0 : index
      %c24_116 = arith.constant 24 : index
      %208 = vector.load %arg10[%c0_115, %c24_116] : memref<8x32xf32, #tpu.memory_space<vmem>>, vector<8x8xf32>
      %209 = tpu.reciprocal %207 {approx = true} : vector<8x1xf32> -> vector<8x1xf32>
      %210 = vector.broadcast %209 : vector<8x1xf32> to vector<8x8xf32>
      %211 = arith.mulf %208, %210 : vector<8x8xf32>
      %212 = arith.truncf %211 : vector<8x8xf32> to vector<8x8xbf16>
      %c0_117 = arith.constant 0 : index
      %c0_118 = arith.constant 0 : index
      %c24_119 = arith.constant 24 : index
      %213 = vector.load %arg7[%c0_117, %c0_118, %c24_119] : memref<1x8x32xbf16, #tpu.memory_space<vmem>>, vector<1x8x8xbf16>
      %214 = vector.shape_cast %213 : vector<1x8x8xbf16> to vector<8x8xbf16>
      %215 = vector.shape_cast %212 : vector<8x8xbf16> to vector<1x8x8xbf16>
      tpu.vector_store %arg7[%c0_117, %c0_118, %c24_119], %215 {strides = array<i32>} : memref<1x8x32xbf16, #tpu.memory_space<vmem>>, vector<1x8x8xbf16>,
    } else {
    }
    return
  }
  func.func @transform_0(%arg0: i32, %arg1: i32, %arg2: i32) -> (i32, i32, i32) {
    %c0_i32 = arith.constant 0 : i32
    %c0_i32_0 = arith.constant 0 : i32
    return %arg0, %c0_i32, %arg2 : i32, i32, i32
  }
  func.func @transform_1(%arg0: i32, %arg1: i32, %arg2: i32) -> (i32, i32, i32) {
    %c0_i32 = arith.constant 0 : i32
    %c0_i32_0 = arith.constant 0 : i32
    return %arg0, %arg1, %c0_i32 : i32, i32, i32
  }
  func.func @transform_2(%arg0: i32, %arg1: i32, %arg2: i32) -> (i32, i32, i32) {
    %c0_i32 = arith.constant 0 : i32
    %c0_i32_0 = arith.constant 0 : i32
    return %arg0, %arg2, %c0_i32 : i32, i32, i32
  }
  func.func @transform_3(%arg0: i32, %arg1: i32, %arg2: i32) -> (i32, i32, i32) {
    %c0_i32 = arith.constant 0 : i32
    %c0_i32_0 = arith.constant 0 : i32
    return %arg0, %arg2, %c0_i32 : i32, i32, i32
  }
  func.func @transform_4(%arg0: i32, %arg1: i32, %arg2: i32) -> (i32, i32, i32) {
    %c0_i32 = arith.constant 0 : i32
    %c0_i32_0 = arith.constant 0 : i32
    return %arg0, %arg1, %c0_i32 : i32, i32, i32
  }
}

module attributes {stable_mosaic.version = 11 : i64} {
  func.func @_linear_kernel(%arg0: i32, %arg1: i32, %arg2: i32, %arg3: memref<16x128xbf16, #tpu.memory_space<vmem>>, %arg4: memref<128x128xbf16, #tpu.memory_space<vmem>>, %arg5: memref<1x128xf32, #tpu.memory_space<vmem>>, %arg6: memref<16x128xbf16, #tpu.memory_space<vmem>>, %arg7: memref<16x128xf32, #tpu.memory_space<vmem>>) attributes {dimension_semantics = [#tpu.dimension_semantics<parallel>, #tpu.dimension_semantics<parallel>, #tpu.dimension_semantics<arbitrary>], iteration_bounds = array<i64: 1, 1, 1>, scalar_prefetch = 0 : i64, scratch_operands = 1 : i64, tpu.core_type = #tpu.core_type<tc>, window_params = [{transform_indices = @transform_0, window_bounds = array<i64: 16, 128>}, {transform_indices = @transform_1, window_bounds = array<i64: 128, 128>}, {transform_indices = @transform_2, window_bounds = array<i64: 1, 128>}, {transform_indices = @transform_3, window_bounds = array<i64: 16, 128>}]} {
    %c0_i32 = arith.constant 0 : i32
    %0 = arith.cmpi eq, %arg2, %c0_i32 : i32
    %1 = arith.extui %0 : i1 to i32
    %c0_i32_0 = arith.constant 0 : i32
    %2 = arith.cmpi ne, %1, %c0_i32_0 : i32
    scf.if %2 {
      %cst_10 = arith.constant 0.000000e+00 : f32
      %12 = vector.broadcast %cst_10 : f32 to vector<16x128xf32>
      %c0_11 = arith.constant 0 : index
      %c0_12 = arith.constant 0 : index
      %13 = vector.load %arg7[%c0_11, %c0_12] : memref<16x128xf32, #tpu.memory_space<vmem>>, vector<16x128xf32>
      tpu.vector_store %arg7[%c0_11, %c0_12], %12 {strides = array<i32>} : memref<16x128xf32, #tpu.memory_space<vmem>>, vector<16x128xf32>,
    } else {
    }
    %c0 = arith.constant 0 : index
    %c0_1 = arith.constant 0 : index
    %3 = vector.load %arg7[%c0, %c0_1] : memref<16x128xf32, #tpu.memory_space<vmem>>, vector<16x128xf32>
    %c0_2 = arith.constant 0 : index
    %c0_3 = arith.constant 0 : index
    %4 = vector.load %arg3[%c0_2, %c0_3] : memref<16x128xbf16, #tpu.memory_space<vmem>>, vector<16x128xbf16>
    %c0_4 = arith.constant 0 : index
    %c0_5 = arith.constant 0 : index
    %5 = vector.load %arg4[%c0_4, %c0_5] : memref<128x128xbf16, #tpu.memory_space<vmem>>, vector<128x128xbf16>
    %cst = arith.constant dense<0.000000e+00> : vector<16x128xf32>
    %6 = tpu.matmul %4, %5, %cst {dimension_numbers = #tpu.dot_dimension_numbers<[1], [0], [0], [1], [0, 0, 1, 1], [], []>} : vector<16x128xbf16>, vector<128x128xbf16>, vector<16x128xf32> -> vector<16x128xf32>
    %7 = arith.addf %3, %6 : vector<16x128xf32>
    %c0_6 = arith.constant 0 : index
    %c0_7 = arith.constant 0 : index
    %8 = vector.load %arg7[%c0_6, %c0_7] : memref<16x128xf32, #tpu.memory_space<vmem>>, vector<16x128xf32>
    tpu.vector_store %arg7[%c0_6, %c0_7], %7 {strides = array<i32>} : memref<16x128xf32, #tpu.memory_space<vmem>>, vector<16x128xf32>,
    %c0_i32_8 = arith.constant 0 : i32
    %9 = arith.cmpi eq, %arg2, %c0_i32_8 : i32
    %10 = arith.extui %9 : i1 to i32
    %c0_i32_9 = arith.constant 0 : i32
    %11 = arith.cmpi ne, %10, %c0_i32_9 : i32
    scf.if %11 {
      %c0_10 = arith.constant 0 : index
      %c0_11 = arith.constant 0 : index
      %12 = vector.load %arg7[%c0_10, %c0_11] : memref<16x128xf32, #tpu.memory_space<vmem>>, vector<16x128xf32>
      %c0_12 = arith.constant 0 : index
      %c0_13 = arith.constant 0 : index
      %13 = vector.load %arg5[%c0_12, %c0_13] : memref<1x128xf32, #tpu.memory_space<vmem>>, vector<1x128xf32>
      %14 = vector.broadcast %13 : vector<1x128xf32> to vector<16x128xf32>
      %15 = arith.addf %12, %14 : vector<16x128xf32>
      %cst_14 = arith.constant 0.000000e+00 : f32
      %16 = vector.broadcast %cst_14 : f32 to vector<16x128xf32>
      %17 = arith.maximumf %15, %16 : vector<16x128xf32>
      %18 = arith.truncf %17 : vector<16x128xf32> to vector<16x128xbf16>
      %c0_15 = arith.constant 0 : index
      %c0_16 = arith.constant 0 : index
      %19 = vector.load %arg6[%c0_15, %c0_16] : memref<16x128xbf16, #tpu.memory_space<vmem>>, vector<16x128xbf16>
      tpu.vector_store %arg6[%c0_15, %c0_16], %18 {strides = array<i32>} : memref<16x128xbf16, #tpu.memory_space<vmem>>, vector<16x128xbf16>,
    } else {
    }
    return
  }
  func.func @transform_0(%arg0: i32, %arg1: i32, %arg2: i32) -> (i32, i32) {
    %c0_i32 = arith.constant 0 : i32
    return %arg0, %arg2 : i32, i32
  }
  func.func @transform_1(%arg0: i32, %arg1: i32, %arg2: i32) -> (i32, i32) {
    %c0_i32 = arith.constant 0 : i32
    return %arg2, %arg1 : i32, i32
  }
  func.func @transform_2(%arg0: i32, %arg1: i32, %arg2: i32) -> (i32, i32) {
    %c0_i32 = arith.constant 0 : i32
    %c0_i32_0 = arith.constant 0 : i32
    return %c0_i32, %arg1 : i32, i32
  }
  func.func @transform_3(%arg0: i32, %arg1: i32, %arg2: i32) -> (i32, i32) {
    %c0_i32 = arith.constant 0 : i32
    return %arg0, %arg1 : i32, i32
  }
}

module attributes {stable_mosaic.version = 11 : i64} {
  func.func @_linear_kernel(%arg0: i32, %arg1: i32, %arg2: i32, %arg3: memref<16x128xbf16, #tpu.memory_space<vmem>>, %arg4: memref<128x128xbf16, #tpu.memory_space<vmem>>, %arg5: memref<1x128xf32, #tpu.memory_space<vmem>>, %arg6: memref<16x128xbf16, #tpu.memory_space<vmem>>, %arg7: memref<16x128xf32, #tpu.memory_space<vmem>>) attributes {dimension_semantics = [#tpu.dimension_semantics<parallel>, #tpu.dimension_semantics<parallel>, #tpu.dimension_semantics<arbitrary>], iteration_bounds = array<i64: 1, 1, 1>, scalar_prefetch = 0 : i64, scratch_operands = 1 : i64, tpu.core_type = #tpu.core_type<tc>, window_params = [{transform_indices = @transform_0, window_bounds = array<i64: 16, 128>}, {transform_indices = @transform_1, window_bounds = array<i64: 128, 128>}, {transform_indices = @transform_2, window_bounds = array<i64: 1, 128>}, {transform_indices = @transform_3, window_bounds = array<i64: 16, 128>}]} {
    %c0_i32 = arith.constant 0 : i32
    %0 = arith.cmpi eq, %arg2, %c0_i32 : i32
    %1 = arith.extui %0 : i1 to i32
    %c0_i32_0 = arith.constant 0 : i32
    %2 = arith.cmpi ne, %1, %c0_i32_0 : i32
    scf.if %2 {
      %cst_10 = arith.constant 0.000000e+00 : f32
      %12 = vector.broadcast %cst_10 : f32 to vector<16x128xf32>
      %c0_11 = arith.constant 0 : index
      %c0_12 = arith.constant 0 : index
      %13 = vector.load %arg7[%c0_11, %c0_12] : memref<16x128xf32, #tpu.memory_space<vmem>>, vector<16x128xf32>
      tpu.vector_store %arg7[%c0_11, %c0_12], %12 {strides = array<i32>} : memref<16x128xf32, #tpu.memory_space<vmem>>, vector<16x128xf32>,
    } else {
    }
    %c0 = arith.constant 0 : index
    %c0_1 = arith.constant 0 : index
    %3 = vector.load %arg7[%c0, %c0_1] : memref<16x128xf32, #tpu.memory_space<vmem>>, vector<16x128xf32>
    %c0_2 = arith.constant 0 : index
    %c0_3 = arith.constant 0 : index
    %4 = vector.load %arg3[%c0_2, %c0_3] : memref<16x128xbf16, #tpu.memory_space<vmem>>, vector<16x128xbf16>
    %c0_4 = arith.constant 0 : index
    %c0_5 = arith.constant 0 : index
    %5 = vector.load %arg4[%c0_4, %c0_5] : memref<128x128xbf16, #tpu.memory_space<vmem>>, vector<128x128xbf16>
    %cst = arith.constant dense<0.000000e+00> : vector<16x128xf32>
    %6 = tpu.matmul %4, %5, %cst {dimension_numbers = #tpu.dot_dimension_numbers<[1], [0], [0], [1], [0, 0, 1, 1], [], []>} : vector<16x128xbf16>, vector<128x128xbf16>, vector<16x128xf32> -> vector<16x128xf32>
    %7 = arith.addf %3, %6 : vector<16x128xf32>
    %c0_6 = arith.constant 0 : index
    %c0_7 = arith.constant 0 : index
    %8 = vector.load %arg7[%c0_6, %c0_7] : memref<16x128xf32, #tpu.memory_space<vmem>>, vector<16x128xf32>
    tpu.vector_store %arg7[%c0_6, %c0_7], %7 {strides = array<i32>} : memref<16x128xf32, #tpu.memory_space<vmem>>, vector<16x128xf32>,
    %c0_i32_8 = arith.constant 0 : i32
    %9 = arith.cmpi eq, %arg2, %c0_i32_8 : i32
    %10 = arith.extui %9 : i1 to i32
    %c0_i32_9 = arith.constant 0 : i32
    %11 = arith.cmpi ne, %10, %c0_i32_9 : i32
    scf.if %11 {
      %c0_10 = arith.constant 0 : index
      %c0_11 = arith.constant 0 : index
      %12 = vector.load %arg7[%c0_10, %c0_11] : memref<16x128xf32, #tpu.memory_space<vmem>>, vector<16x128xf32>
      %c0_12 = arith.constant 0 : index
      %c0_13 = arith.constant 0 : index
      %13 = vector.load %arg5[%c0_12, %c0_13] : memref<1x128xf32, #tpu.memory_space<vmem>>, vector<1x128xf32>
      %14 = vector.broadcast %13 : vector<1x128xf32> to vector<16x128xf32>
      %15 = arith.addf %12, %14 : vector<16x128xf32>
      %16 = arith.truncf %15 : vector<16x128xf32> to vector<16x128xbf16>
      %c0_14 = arith.constant 0 : index
      %c0_15 = arith.constant 0 : index
      %17 = vector.load %arg6[%c0_14, %c0_15] : memref<16x128xbf16, #tpu.memory_space<vmem>>, vector<16x128xbf16>
      tpu.vector_store %arg6[%c0_14, %c0_15], %16 {strides = array<i32>} : memref<16x128xbf16, #tpu.memory_space<vmem>>, vector<16x128xbf16>,
    } else {
    }
    return
  }
  func.func @transform_0(%arg0: i32, %arg1: i32, %arg2: i32) -> (i32, i32) {
    %c0_i32 = arith.constant 0 : i32
    return %arg0, %arg2 : i32, i32
  }
  func.func @transform_1(%arg0: i32, %arg1: i32, %arg2: i32) -> (i32, i32) {
    %c0_i32 = arith.constant 0 : i32
    return %arg2, %arg1 : i32, i32
  }
  func.func @transform_2(%arg0: i32, %arg1: i32, %arg2: i32) -> (i32, i32) {
    %c0_i32 = arith.constant 0 : i32
    %c0_i32_0 = arith.constant 0 : i32
    return %c0_i32, %arg1 : i32, i32
  }
  func.func @transform_3(%arg0: i32, %arg1: i32, %arg2: i32) -> (i32, i32) {
    %c0_i32 = arith.constant 0 : i32
    return %arg0, %arg1 : i32, i32
  }
}

module attributes {stable_mosaic.version = 11 : i64} {
  func.func @_linear_kernel(%arg0: i32, %arg1: i32, %arg2: i32, %arg3: memref<16x128xbf16, #tpu.memory_space<vmem>>, %arg4: memref<128x128xbf16, #tpu.memory_space<vmem>>, %arg5: memref<1x128xf32, #tpu.memory_space<vmem>>, %arg6: memref<16x128xbf16, #tpu.memory_space<vmem>>, %arg7: memref<1x128xf32, #tpu.memory_space<vmem>>, %arg8: memref<1x128xf32, #tpu.memory_space<vmem>>, %arg9: memref<16x128xbf16, #tpu.memory_space<vmem>>, %arg10: memref<16x128xf32, #tpu.memory_space<vmem>>) attributes {dimension_semantics = [#tpu.dimension_semantics<parallel>, #tpu.dimension_semantics<parallel>, #tpu.dimension_semantics<arbitrary>], iteration_bounds = array<i64: 1, 1, 1>, scalar_prefetch = 0 : i64, scratch_operands = 1 : i64, tpu.core_type = #tpu.core_type<tc>, window_params = [{transform_indices = @transform_0, window_bounds = array<i64: 16, 128>}, {transform_indices = @transform_1, window_bounds = array<i64: 128, 128>}, {transform_indices = @transform_2, window_bounds = array<i64: 1, 128>}, {transform_indices = @transform_3, window_bounds = array<i64: 16, 128>}, {transform_indices = @transform_4, window_bounds = array<i64: 1, 128>}, {transform_indices = @transform_5, window_bounds = array<i64: 1, 128>}, {transform_indices = @transform_6, window_bounds = array<i64: 16, 128>}]} {
    %c0_i32 = arith.constant 0 : i32
    %0 = arith.cmpi eq, %arg2, %c0_i32 : i32
    %1 = arith.extui %0 : i1 to i32
    %c0_i32_0 = arith.constant 0 : i32
    %2 = arith.cmpi ne, %1, %c0_i32_0 : i32
    scf.if %2 {
      %cst_10 = arith.constant 0.000000e+00 : f32
      %12 = vector.broadcast %cst_10 : f32 to vector<16x128xf32>
      %c0_11 = arith.constant 0 : index
      %c0_12 = arith.constant 0 : index
      %13 = vector.load %arg10[%c0_11, %c0_12] : memref<16x128xf32, #tpu.memory_space<vmem>>, vector<16x128xf32>
      tpu.vector_store %arg10[%c0_11, %c0_12], %12 {strides = array<i32>} : memref<16x128xf32, #tpu.memory_space<vmem>>, vector<16x128xf32>,
    } else {
    }
    %c0 = arith.constant 0 : index
    %c0_1 = arith.constant 0 : index
    %3 = vector.load %arg10[%c0, %c0_1] : memref<16x128xf32, #tpu.memory_space<vmem>>, vector<16x128xf32>
    %c0_2 = arith.constant 0 : index
    %c0_3 = arith.constant 0 : index
    %4 = vector.load %arg3[%c0_2, %c0_3] : memref<16x128xbf16, #tpu.memory_space<vmem>>, vector<16x128xbf16>
    %c0_4 = arith.constant 0 : index
    %c0_5 = arith.constant 0 : index
    %5 = vector.load %arg4[%c0_4, %c0_5] : memref<128x128xbf16, #tpu.memory_space<vmem>>, vector<128x128xbf16>
    %cst = arith.constant dense<0.000000e+00> : vector<16x128xf32>
    %6 = tpu.matmul %4, %5, %cst {dimension_numbers = #tpu.dot_dimension_numbers<[1], [0], [0], [1], [0, 0, 1, 1], [], []>} : vector<16x128xbf16>, vector<128x128xbf16>, vector<16x128xf32> -> vector<16x128xf32>
    %7 = arith.addf %3, %6 : vector<16x128xf32>
    %c0_6 = arith.constant 0 : index
    %c0_7 = arith.constant 0 : index
    %8 = vector.load %arg10[%c0_6, %c0_7] : memref<16x128xf32, #tpu.memory_space<vmem>>, vector<16x128xf32>
    tpu.vector_store %arg10[%c0_6, %c0_7], %7 {strides = array<i32>} : memref<16x128xf32, #tpu.memory_space<vmem>>, vector<16x128xf32>,
    %c0_i32_8 = arith.constant 0 : i32
    %9 = arith.cmpi eq, %arg2, %c0_i32_8 : i32
    %10 = arith.extui %9 : i1 to i32
    %c0_i32_9 = arith.constant 0 : i32
    %11 = arith.cmpi ne, %10, %c0_i32_9 : i32
    scf.if %11 {
      %c0_10 = arith.constant 0 : index
      %c0_11 = arith.constant 0 : index
      %12 = vector.load %arg10[%c0_10, %c0_11] : memref<16x128xf32, #tpu.memory_space<vmem>>, vector<16x128xf32>
      %c0_12 = arith.constant 0 : index
      %c0_13 = arith.constant 0 : index
      %13 = vector.load %arg5[%c0_12, %c0_13] : memref<1x128xf32, #tpu.memory_space<vmem>>, vector<1x128xf32>
      %14 = vector.broadcast %13 : vector<1x128xf32> to vector<16x128xf32>
      %15 = arith.addf %12, %14 : vector<16x128xf32>
      %c0_14 = arith.constant 0 : index
      %c0_15 = arith.constant 0 : index
      %16 = vector.load %arg6[%c0_14, %c0_15] : memref<16x128xbf16, #tpu.memory_space<vmem>>, vector<16x128xbf16>
      %17 = arith.extf %16 : vector<16x128xbf16> to vector<16x128xf32>
      %18 = arith.addf %15, %17 : vector<16x128xf32>
      %19 = tpu.iota {dimensions = array<i32: 1>} : vector<16x128xi32>
      %c32_i32 = arith.constant 32 : i32
      %20 = vector.broadcast %c32_i32 : i32 to vector<16x128xi32>
      %21 = arith.cmpi slt, %19, %20 : vector<16x128xi32>
      %cst_16 = arith.constant 0.000000e+00 : f32
      %22 = vector.broadcast %cst_16 : f32 to vector<16x128xf32>
      %23 = arith.select %21, %18, %22 : vector<16x128xi1>, vector<16x128xf32>
      %cst_17 = arith.constant dense<0.000000e+00> : vector<16xf32>
      %24 = vector.multi_reduction <add>, %23, %cst_17 [1] : vector<16x128xf32> to vector<16xf32>
      %25 = vector.shape_cast %24 : vector<16xf32> to vector<16x1xf32>
      %cst_18 = arith.constant 3.125000e-02 : f32
      %26 = vector.broadcast %cst_18 : f32 to vector<16x1xf32>
      %27 = arith.mulf %25, %26 : vector<16x1xf32>
      %28 = vector.broadcast %27 : vector<16x1xf32> to vector<16x128xf32>
      %29 = arith.subf %18, %28 : vector<16x128xf32>
      %cst_19 = arith.constant 0.000000e+00 : f32
      %30 = vector.broadcast %cst_19 : f32 to vector<16x128xf32>
      %31 = arith.select %21, %29, %30 : vector<16x128xi1>, vector<16x128xf32>
      %32 = arith.mulf %31, %31 : vector<16x128xf32>
      %cst_20 = arith.constant dense<0.000000e+00> : vector<16xf32>
      %33 = vector.multi_reduction <add>, %32, %cst_20 [1] : vector<16x128xf32> to vector<16xf32>
      %34 = vector.shape_cast %33 : vector<16xf32> to vector<16x1xf32>
      %cst_21 = arith.constant 3.125000e-02 : f32
      %35 = vector.broadcast %cst_21 : f32 to vector<16x1xf32>
      %36 = arith.mulf %34, %35 : vector<16x1xf32>
      %37 = vector.broadcast %27 : vector<16x1xf32> to vector<16x128xf32>
      %38 = arith.subf %18, %37 : vector<16x128xf32>
      %cst_22 = arith.constant 9.99999974E-6 : f32
      %39 = vector.broadcast %cst_22 : f32 to vector<16x1xf32>
      %40 = arith.addf %36, %39 : vector<16x1xf32>
      %41 = math.rsqrt %40 : vector<16x1xf32>
      %42 = vector.broadcast %41 : vector<16x1xf32> to vector<16x128xf32>
      %43 = arith.mulf %38, %42 : vector<16x128xf32>
      %c0_23 = arith.constant 0 : index
      %c0_24 = arith.constant 0 : index
      %44 = vector.load %arg7[%c0_23, %c0_24] : memref<1x128xf32, #tpu.memory_space<vmem>>, vector<1x128xf32>
      %45 = vector.broadcast %44 : vector<1x128xf32> to vector<16x128xf32>
      %46 = arith.mulf %43, %45 : vector<16x128xf32>
      %c0_25 = arith.constant 0 : index
      %c0_26 = arith.constant 0 : index
      %47 = vector.load %arg8[%c0_25, %c0_26] : memref<1x128xf32, #tpu.memory_space<vmem>>, vector<1x128xf32>
      %48 = vector.broadcast %47 : vector<1x128xf32> to vector<16x128xf32>
      %49 = arith.addf %46, %48 : vector<16x128xf32>
      %50 = arith.truncf %49 : vector<16x128xf32> to vector<16x128xbf16>
      %c0_27 = arith.constant 0 : index
      %c0_28 = arith.constant 0 : index
      %51 = vector.load %arg9[%c0_27, %c0_28] : memref<16x128xbf16, #tpu.memory_space<vmem>>, vector<16x128xbf16>
      tpu.vector_store %arg9[%c0_27, %c0_28], %50 {strides = array<i32>} : memref<16x128xbf16, #tpu.memory_space<vmem>>, vector<16x128xbf16>,
    } else {
    }
    return
  }
  func.func @transform_0(%arg0: i32, %arg1: i32, %arg2: i32) -> (i32, i32) {
    %c0_i32 = arith.constant 0 : i32
    return %arg0, %arg2 : i32, i32
  }
  func.func @transform_1(%arg0: i32, %arg1: i32, %arg2: i32) -> (i32, i32) {
    %c0_i32 = arith.constant 0 : i32
    return %arg2, %arg1 : i32, i32
  }
  func.func @transform_2(%arg0: i32, %arg1: i32, %arg2: i32) -> (i32, i32) {
    %c0_i32 = arith.constant 0 : i32
    %c0_i32_0 = arith.constant 0 : i32
    return %c0_i32, %arg1 : i32, i32
  }
  func.func @transform_3(%arg0: i32, %arg1: i32, %arg2: i32) -> (i32, i32) {
    %c0_i32 = arith.constant 0 : i32
    return %arg0, %arg1 : i32, i32
  }
  func.func @transform_4(%arg0: i32, %arg1: i32, %arg2: i32) -> (i32, i32) {
    %c0_i32 = arith.constant 0 : i32
    %c0_i32_0 = arith.constant 0 : i32
    return %c0_i32, %arg1 : i32, i32
  }
  func.func @transform_5(%arg0: i32, %arg1: i32, %arg2: i32) -> (i32, i32) {
    %c0_i32 = arith.constant 0 : i32
    %c0_i32_0 = arith.constant 0 : i32
    return %c0_i32, %arg1 : i32, i32
  }
  func.func @transform_6(%arg0: i32, %arg1: i32, %arg2: i32) -> (i32, i32) {
    %c0_i32 = arith.constant 0 : i32
    return %arg0, %arg1 : i32, i32
  }
}

module attributes {stable_mosaic.version = 11 : i64} {
  func.func @_linear_kernel(%arg0: i32, %arg1: i32, %arg2: i32, %arg3: memref<16x128xbf16, #tpu.memory_space<vmem>>, %arg4: memref<128x128xbf16, #tpu.memory_space<vmem>>, %arg5: memref<1x128xf32, #tpu.memory_space<vmem>>, %arg6: memref<16x128xbf16, #tpu.memory_space<vmem>>, %arg7: memref<16x128xf32, #tpu.memory_space<vmem>>) attributes {dimension_semantics = [#tpu.dimension_semantics<parallel>, #tpu.dimension_semantics<parallel>, #tpu.dimension_semantics<arbitrary>], iteration_bounds = array<i64: 1, 1, 1>, scalar_prefetch = 0 : i64, scratch_operands = 1 : i64, tpu.core_type = #tpu.core_type<tc>, window_params = [{transform_indices = @transform_0, window_bounds = array<i64: 16, 128>}, {transform_indices = @transform_1, window_bounds = array<i64: 128, 128>}, {transform_indices = @transform_2, window_bounds = array<i64: 1, 128>}, {transform_indices = @transform_3, window_bounds = array<i64: 16, 128>}]} {
    %c0_i32 = arith.constant 0 : i32
    %0 = arith.cmpi eq, %arg2, %c0_i32 : i32
    %1 = arith.extui %0 : i1 to i32
    %c0_i32_0 = arith.constant 0 : i32
    %2 = arith.cmpi ne, %1, %c0_i32_0 : i32
    scf.if %2 {
      %cst_10 = arith.constant 0.000000e+00 : f32
      %12 = vector.broadcast %cst_10 : f32 to vector<16x128xf32>
      %c0_11 = arith.constant 0 : index
      %c0_12 = arith.constant 0 : index
      %13 = vector.load %arg7[%c0_11, %c0_12] : memref<16x128xf32, #tpu.memory_space<vmem>>, vector<16x128xf32>
      tpu.vector_store %arg7[%c0_11, %c0_12], %12 {strides = array<i32>} : memref<16x128xf32, #tpu.memory_space<vmem>>, vector<16x128xf32>,
    } else {
    }
    %c0 = arith.constant 0 : index
    %c0_1 = arith.constant 0 : index
    %3 = vector.load %arg7[%c0, %c0_1] : memref<16x128xf32, #tpu.memory_space<vmem>>, vector<16x128xf32>
    %c0_2 = arith.constant 0 : index
    %c0_3 = arith.constant 0 : index
    %4 = vector.load %arg3[%c0_2, %c0_3] : memref<16x128xbf16, #tpu.memory_space<vmem>>, vector<16x128xbf16>
    %c0_4 = arith.constant 0 : index
    %c0_5 = arith.constant 0 : index
    %5 = vector.load %arg4[%c0_4, %c0_5] : memref<128x128xbf16, #tpu.memory_space<vmem>>, vector<128x128xbf16>
    %cst = arith.constant dense<0.000000e+00> : vector<16x128xf32>
    %6 = tpu.matmul %4, %5, %cst {dimension_numbers = #tpu.dot_dimension_numbers<[1], [0], [0], [1], [0, 0, 1, 1], [], []>} : vector<16x128xbf16>, vector<128x128xbf16>, vector<16x128xf32> -> vector<16x128xf32>
    %7 = arith.addf %3, %6 : vector<16x128xf32>
    %c0_6 = arith.constant 0 : index
    %c0_7 = arith.constant 0 : index
    %8 = vector.load %arg7[%c0_6, %c0_7] : memref<16x128xf32, #tpu.memory_space<vmem>>, vector<16x128xf32>
    tpu.vector_store %arg7[%c0_6, %c0_7], %7 {strides = array<i32>} : memref<16x128xf32, #tpu.memory_space<vmem>>, vector<16x128xf32>,
    %c0_i32_8 = arith.constant 0 : i32
    %9 = arith.cmpi eq, %arg2, %c0_i32_8 : i32
    %10 = arith.extui %9 : i1 to i32
    %c0_i32_9 = arith.constant 0 : i32
    %11 = arith.cmpi ne, %10, %c0_i32_9 : i32
    scf.if %11 {
      %c0_10 = arith.constant 0 : index
      %c0_11 = arith.constant 0 : index
      %12 = vector.load %arg7[%c0_10, %c0_11] : memref<16x128xf32, #tpu.memory_space<vmem>>, vector<16x128xf32>
      %c0_12 = arith.constant 0 : index
      %c0_13 = arith.constant 0 : index
      %13 = vector.load %arg5[%c0_12, %c0_13] : memref<1x128xf32, #tpu.memory_space<vmem>>, vector<1x128xf32>
      %14 = vector.broadcast %13 : vector<1x128xf32> to vector<16x128xf32>
      %15 = arith.addf %12, %14 : vector<16x128xf32>
      %cst_14 = arith.constant 0.000000e+00 : f32
      %16 = vector.broadcast %cst_14 : f32 to vector<16x128xf32>
      %17 = arith.maximumf %15, %16 : vector<16x128xf32>
      %18 = arith.truncf %17 : vector<16x128xf32> to vector<16x128xbf16>
      %c0_15 = arith.constant 0 : index
      %c0_16 = arith.constant 0 : index
      %19 = vector.load %arg6[%c0_15, %c0_16] : memref<16x128xbf16, #tpu.memory_space<vmem>>, vector<16x128xbf16>
      tpu.vector_store %arg6[%c0_15, %c0_16], %18 {strides = array<i32>} : memref<16x128xbf16, #tpu.memory_space<vmem>>, vector<16x128xbf16>,
    } else {
    }
    return
  }
  func.func @transform_0(%arg0: i32, %arg1: i32, %arg2: i32) -> (i32, i32) {
    %c0_i32 = arith.constant 0 : i32
    return %arg0, %arg2 : i32, i32
  }
  func.func @transform_1(%arg0: i32, %arg1: i32, %arg2: i32) -> (i32, i32) {
    %c0_i32 = arith.constant 0 : i32
    return %arg2, %arg1 : i32, i32
  }
  func.func @transform_2(%arg0: i32, %arg1: i32, %arg2: i32) -> (i32, i32) {
    %c0_i32 = arith.constant 0 : i32
    %c0_i32_0 = arith.constant 0 : i32
    return %c0_i32, %arg1 : i32, i32
  }
  func.func @transform_3(%arg0: i32, %arg1: i32, %arg2: i32) -> (i32, i32) {
    %c0_i32 = arith.constant 0 : i32
    return %arg0, %arg1 : i32, i32
  }
}

module attributes {stable_mosaic.version = 11 : i64} {
  func.func @_linear_kernel(%arg0: i32, %arg1: i32, %arg2: i32, %arg3: memref<16x128xbf16, #tpu.memory_space<vmem>>, %arg4: memref<128x128xbf16, #tpu.memory_space<vmem>>, %arg5: memref<1x128xf32, #tpu.memory_space<vmem>>, %arg6: memref<16x128xf32, #tpu.memory_space<vmem>>, %arg7: memref<16x128xf32, #tpu.memory_space<vmem>>) attributes {dimension_semantics = [#tpu.dimension_semantics<parallel>, #tpu.dimension_semantics<parallel>, #tpu.dimension_semantics<arbitrary>], iteration_bounds = array<i64: 1, 1, 1>, scalar_prefetch = 0 : i64, scratch_operands = 1 : i64, tpu.core_type = #tpu.core_type<tc>, window_params = [{transform_indices = @transform_0, window_bounds = array<i64: 16, 128>}, {transform_indices = @transform_1, window_bounds = array<i64: 128, 128>}, {transform_indices = @transform_2, window_bounds = array<i64: 1, 128>}, {transform_indices = @transform_3, window_bounds = array<i64: 16, 128>}]} {
    %c0_i32 = arith.constant 0 : i32
    %0 = arith.cmpi eq, %arg2, %c0_i32 : i32
    %1 = arith.extui %0 : i1 to i32
    %c0_i32_0 = arith.constant 0 : i32
    %2 = arith.cmpi ne, %1, %c0_i32_0 : i32
    scf.if %2 {
      %cst_10 = arith.constant 0.000000e+00 : f32
      %12 = vector.broadcast %cst_10 : f32 to vector<16x128xf32>
      %c0_11 = arith.constant 0 : index
      %c0_12 = arith.constant 0 : index
      %13 = vector.load %arg7[%c0_11, %c0_12] : memref<16x128xf32, #tpu.memory_space<vmem>>, vector<16x128xf32>
      tpu.vector_store %arg7[%c0_11, %c0_12], %12 {strides = array<i32>} : memref<16x128xf32, #tpu.memory_space<vmem>>, vector<16x128xf32>,
    } else {
    }
    %c0 = arith.constant 0 : index
    %c0_1 = arith.constant 0 : index
    %3 = vector.load %arg7[%c0, %c0_1] : memref<16x128xf32, #tpu.memory_space<vmem>>, vector<16x128xf32>
    %c0_2 = arith.constant 0 : index
    %c0_3 = arith.constant 0 : index
    %4 = vector.load %arg3[%c0_2, %c0_3] : memref<16x128xbf16, #tpu.memory_space<vmem>>, vector<16x128xbf16>
    %c0_4 = arith.constant 0 : index
    %c0_5 = arith.constant 0 : index
    %5 = vector.load %arg4[%c0_4, %c0_5] : memref<128x128xbf16, #tpu.memory_space<vmem>>, vector<128x128xbf16>
    %cst = arith.constant dense<0.000000e+00> : vector<16x128xf32>
    %6 = tpu.matmul %4, %5, %cst {dimension_numbers = #tpu.dot_dimension_numbers<[1], [0], [0], [1], [0, 0, 1, 1], [], []>} : vector<16x128xbf16>, vector<128x128xbf16>, vector<16x128xf32> -> vector<16x128xf32>
    %7 = arith.addf %3, %6 : vector<16x128xf32>
    %c0_6 = arith.constant 0 : index
    %c0_7 = arith.constant 0 : index
    %8 = vector.load %arg7[%c0_6, %c0_7] : memref<16x128xf32, #tpu.memory_space<vmem>>, vector<16x128xf32>
    tpu.vector_store %arg7[%c0_6, %c0_7], %7 {strides = array<i32>} : memref<16x128xf32, #tpu.memory_space<vmem>>, vector<16x128xf32>,
    %c0_i32_8 = arith.constant 0 : i32
    %9 = arith.cmpi eq, %arg2, %c0_i32_8 : i32
    %10 = arith.extui %9 : i1 to i32
    %c0_i32_9 = arith.constant 0 : i32
    %11 = arith.cmpi ne, %10, %c0_i32_9 : i32
    scf.if %11 {
      %c0_10 = arith.constant 0 : index
      %c0_11 = arith.constant 0 : index
      %12 = vector.load %arg7[%c0_10, %c0_11] : memref<16x128xf32, #tpu.memory_space<vmem>>, vector<16x128xf32>
      %c0_12 = arith.constant 0 : index
      %c0_13 = arith.constant 0 : index
      %13 = vector.load %arg5[%c0_12, %c0_13] : memref<1x128xf32, #tpu.memory_space<vmem>>, vector<1x128xf32>
      %14 = vector.broadcast %13 : vector<1x128xf32> to vector<16x128xf32>
      %15 = arith.addf %12, %14 : vector<16x128xf32>
      %c0_14 = arith.constant 0 : index
      %c0_15 = arith.constant 0 : index
      %16 = vector.load %arg6[%c0_14, %c0_15] : memref<16x128xf32, #tpu.memory_space<vmem>>, vector<16x128xf32>
      tpu.vector_store %arg6[%c0_14, %c0_15], %15 {strides = array<i32>} : memref<16x128xf32, #tpu.memory_space<vmem>>, vector<16x128xf32>,
    } else {
    }
    return
  }
  func.func @transform_0(%arg0: i32, %arg1: i32, %arg2: i32) -> (i32, i32) {
    %c0_i32 = arith.constant 0 : i32
    return %arg0, %arg2 : i32, i32
  }
  func.func @transform_1(%arg0: i32, %arg1: i32, %arg2: i32) -> (i32, i32) {
    %c0_i32 = arith.constant 0 : i32
    return %arg2, %arg1 : i32, i32
  }
  func.func @transform_2(%arg0: i32, %arg1: i32, %arg2: i32) -> (i32, i32) {
    %c0_i32 = arith.constant 0 : i32
    %c0_i32_0 = arith.constant 0 : i32
    return %c0_i32, %arg1 : i32, i32
  }
  func.func @transform_3(%arg0: i32, %arg1: i32, %arg2: i32) -> (i32, i32) {
    %c0_i32 = arith.constant 0 : i32
    return %arg0, %arg1 : i32, i32
  }
}

module attributes {stable_mosaic.version = 11 : i64} {
  func.func @_attn_map_kernel(%arg0: i32, %arg1: i32, %arg2: memref<1x1x8xf32, #tpu.memory_space<vmem>>, %arg3: memref<1x8x32xbf16, #tpu.memory_space<vmem>>, %arg4: memref<1x8x32xbf16, #tpu.memory_space<vmem>>, %arg5: memref<1x8x32xbf16, #tpu.memory_space<vmem>>, %arg6: memref<1x8x32xbf16, #tpu.memory_space<vmem>>, %arg7: memref<1x4x8x8xf32, #tpu.memory_space<vmem>>) attributes {dimension_semantics = [#tpu.dimension_semantics<parallel>, #tpu.dimension_semantics<parallel>], iteration_bounds = array<i64: 2, 1>, scalar_prefetch = 0 : i64, scratch_operands = 0 : i64, tpu.core_type = #tpu.core_type<tc>, window_params = [{transform_indices = @transform_0, window_bounds = array<i64: 1, 1, 8>}, {transform_indices = @transform_1, window_bounds = array<i64: 1, 8, 32>}, {transform_indices = @transform_2, window_bounds = array<i64: 1, 8, 32>}, {transform_indices = @transform_3, window_bounds = array<i64: 1, 8, 32>}, {transform_indices = @transform_4, window_bounds = array<i64: 1, 8, 32>}, {transform_indices = @transform_5, window_bounds = array<i64: 1, 4, 8, 8>}]} {
    %c0 = arith.constant 0 : index
    %c0_0 = arith.constant 0 : index
    %c0_1 = arith.constant 0 : index
    %0 = vector.load %arg3[%c0, %c0_0, %c0_1] : memref<1x8x32xbf16, #tpu.memory_space<vmem>>, vector<1x8x32xbf16>
    %1 = vector.shape_cast %0 : vector<1x8x32xbf16> to vector<8x32xbf16>
    %c0_2 = arith.constant 0 : index
    %c0_3 = arith.constant 0 : index
    %c0_4 = arith.constant 0 : index
    %2 = vector.load %arg4[%c0_2, %c0_3, %c0_4] : memref<1x8x32xbf16, #tpu.memory_space<vmem>>, vector<1x8x32xbf16>
    %3 = vector.shape_cast %2 : vector<1x8x32xbf16> to vector<8x32xbf16>
    %c0_5 = arith.constant 0 : index
    %c0_6 = arith.constant 0 : index
    %c0_7 = arith.constant 0 : index
    %4 = vector.load %arg5[%c0_5, %c0_6, %c0_7] : memref<1x8x32xbf16, #tpu.memory_space<vmem>>, vector<1x8x32xbf16>
    %5 = vector.shape_cast %4 : vector<1x8x32xbf16> to vector<8x32xbf16>
    %c0_8 = arith.constant 0 : index
    %c0_9 = arith.constant 0 : index
    %c0_10 = arith.constant 0 : index
    %6 = vector.load %arg2[%c0_8, %c0_9, %c0_10] : memref<1x1x8xf32, #tpu.memory_space<vmem>>, vector<1x1x8xf32>
    %7 = vector.shape_cast %6 : vector<1x1x8xf32> to vector<1x8xf32>
    %cst = arith.constant 0.000000e+00 : f32
    %8 = vector.broadcast %cst : f32 to vector<1x8xf32>
    %9 = arith.cmpf ogt, %7, %8 : vector<1x8xf32>
    %10 = vector.extract_strided_slice %1 {offsets = [0, 0], sizes = [8, 8], strides = [1, 1]} : vector<8x32xbf16> to vector<8x8xbf16>
    %11 = vector.extract_strided_slice %3 {offsets = [0, 0], sizes = [8, 8], strides = [1, 1]} : vector<8x32xbf16> to vector<8x8xbf16>
    %cst_11 = arith.constant dense<0.000000e+00> : vector<8x8xf32>
    %12 = tpu.matmul %10, %11, %cst_11 {dimension_numbers = #tpu.dot_dimension_numbers<[1], [1], [0], [0], [0, 0, 1, 0], [], []>} : vector<8x8xbf16>, vector<8x8xbf16>, vector<8x8xf32> -> vector<8x8xf32>
    %cst_12 = arith.constant 0.353553385 : f32
    %13 = vector.broadcast %cst_12 : f32 to vector<8x8xf32>
    %14 = arith.mulf %12, %13 : vector<8x8xf32>
    %cst_13 = arith.constant -1.000000e+30 : f32
    %15 = vector.shape_cast %9 : vector<1x8xi1> to vector<1x8xi1>
    %16 = vector.broadcast %15 : vector<1x8xi1> to vector<8x8xi1>
    %17 = vector.broadcast %cst_13 : f32 to vector<8x8xf32>
    %18 = arith.select %16, %14, %17 : vector<8x8xi1>, vector<8x8xf32>
    %cst_14 = arith.constant dense<0xFF800000> : vector<8xf32>
    %19 = vector.multi_reduction <maximumf>, %18, %cst_14 [1] : vector<8x8xf32> to vector<8xf32>
    %20 = vector.shape_cast %19 : vector<8xf32> to vector<8x1xf32>
    %21 = vector.broadcast %20 : vector<8x1xf32> to vector<8x8xf32>
    %22 = arith.subf %18, %21 : vector<8x8xf32>
    %23 = math.exp %22 : vector<8x8xf32>
    %cst_15 = arith.constant dense<0.000000e+00> : vector<8xf32>
    %24 = vector.multi_reduction <add>, %23, %cst_15 [1] : vector<8x8xf32> to vector<8xf32>
    %25 = vector.shape_cast %24 : vector<8xf32> to vector<8x1xf32>
    %26 = vector.broadcast %25 : vector<8x1xf32> to vector<8x8xf32>
    %27 = arith.divf %23, %26 : vector<8x8xf32>
    %c0_16 = arith.constant 0 : index
    %c0_17 = arith.constant 0 : index
    %c0_18 = arith.constant 0 : index
    %c0_19 = arith.constant 0 : index
    %28 = vector.load %arg7[%c0_16, %c0_17, %c0_18, %c0_19] : memref<1x4x8x8xf32, #tpu.memory_space<vmem>>, vector<1x1x8x8xf32>
    %29 = vector.shape_cast %28 : vector<1x1x8x8xf32> to vector<8x8xf32>
    %30 = vector.shape_cast %27 : vector<8x8xf32> to vector<1x1x8x8xf32>
    tpu.vector_store %arg7[%c0_16, %c0_17, %c0_18, %c0_19], %30 {strides = array<i32>} : memref<1x4x8x8xf32, #tpu.memory_space<vmem>>, vector<1x1x8x8xf32>,
    %31 = arith.truncf %27 : vector<8x8xf32> to vector<8x8xbf16>
    %32 = vector.extract_strided_slice %5 {offsets = [0, 0], sizes = [8, 8], strides = [1, 1]} : vector<8x32xbf16> to vector<8x8xbf16>
    %cst_20 = arith.constant dense<0.000000e+00> : vector<8x8xf32>
    %33 = tpu.matmul %31, %32, %cst_20 {dimension_numbers = #tpu.dot_dimension_numbers<[1], [0], [0], [1], [0, 0, 1, 1], [], []>} : vector<8x8xbf16>, vector<8x8xbf16>, vector<8x8xf32> -> vector<8x8xf32>
    %34 = arith.truncf %33 : vector<8x8xf32> to vector<8x8xbf16>
    %c0_21 = arith.constant 0 : index
    %c0_22 = arith.constant 0 : index
    %c0_23 = arith.constant 0 : index
    %35 = vector.load %arg6[%c0_21, %c0_22, %c0_23] : memref<1x8x32xbf16, #tpu.memory_space<vmem>>, vector<1x8x8xbf16>
    %36 = vector.shape_cast %35 : vector<1x8x8xbf16> to vector<8x8xbf16>
    %37 = vector.shape_cast %34 : vector<8x8xbf16> to vector<1x8x8xbf16>
    tpu.vector_store %arg6[%c0_21, %c0_22, %c0_23], %37 {strides = array<i32>} : memref<1x8x32xbf16, #tpu.memory_space<vmem>>, vector<1x8x8xbf16>,
    %38 = vector.extract_strided_slice %1 {offsets = [0, 8], sizes = [8, 8], strides = [1, 1]} : vector<8x32xbf16> to vector<8x8xbf16>
    %39 = vector.extract_strided_slice %3 {offsets = [0, 8], sizes = [8, 8], strides = [1, 1]} : vector<8x32xbf16> to vector<8x8xbf16>
    %cst_24 = arith.constant dense<0.000000e+00> : vector<8x8xf32>
    %40 = tpu.matmul %38, %39, %cst_24 {dimension_numbers = #tpu.dot_dimension_numbers<[1], [1], [0], [0], [0, 0, 1, 0], [], []>} : vector<8x8xbf16>, vector<8x8xbf16>, vector<8x8xf32> -> vector<8x8xf32>
    %cst_25 = arith.constant 0.353553385 : f32
    %41 = vector.broadcast %cst_25 : f32 to vector<8x8xf32>
    %42 = arith.mulf %40, %41 : vector<8x8xf32>
    %cst_26 = arith.constant -1.000000e+30 : f32
    %43 = vector.shape_cast %9 : vector<1x8xi1> to vector<1x8xi1>
    %44 = vector.broadcast %43 : vector<1x8xi1> to vector<8x8xi1>
    %45 = vector.broadcast %cst_26 : f32 to vector<8x8xf32>
    %46 = arith.select %44, %42, %45 : vector<8x8xi1>, vector<8x8xf32>
    %cst_27 = arith.constant dense<0xFF800000> : vector<8xf32>
    %47 = vector.multi_reduction <maximumf>, %46, %cst_27 [1] : vector<8x8xf32> to vector<8xf32>
    %48 = vector.shape_cast %47 : vector<8xf32> to vector<8x1xf32>
    %49 = vector.broadcast %48 : vector<8x1xf32> to vector<8x8xf32>
    %50 = arith.subf %46, %49 : vector<8x8xf32>
    %51 = math.exp %50 : vector<8x8xf32>
    %cst_28 = arith.constant dense<0.000000e+00> : vector<8xf32>
    %52 = vector.multi_reduction <add>, %51, %cst_28 [1] : vector<8x8xf32> to vector<8xf32>
    %53 = vector.shape_cast %52 : vector<8xf32> to vector<8x1xf32>
    %54 = vector.broadcast %53 : vector<8x1xf32> to vector<8x8xf32>
    %55 = arith.divf %51, %54 : vector<8x8xf32>
    %c0_29 = arith.constant 0 : index
    %c1 = arith.constant 1 : index
    %c0_30 = arith.constant 0 : index
    %c0_31 = arith.constant 0 : index
    %56 = vector.load %arg7[%c0_29, %c1, %c0_30, %c0_31] : memref<1x4x8x8xf32, #tpu.memory_space<vmem>>, vector<1x1x8x8xf32>
    %57 = vector.shape_cast %56 : vector<1x1x8x8xf32> to vector<8x8xf32>
    %58 = vector.shape_cast %55 : vector<8x8xf32> to vector<1x1x8x8xf32>
    tpu.vector_store %arg7[%c0_29, %c1, %c0_30, %c0_31], %58 {strides = array<i32>} : memref<1x4x8x8xf32, #tpu.memory_space<vmem>>, vector<1x1x8x8xf32>,
    %59 = arith.truncf %55 : vector<8x8xf32> to vector<8x8xbf16>
    %60 = vector.extract_strided_slice %5 {offsets = [0, 8], sizes = [8, 8], strides = [1, 1]} : vector<8x32xbf16> to vector<8x8xbf16>
    %cst_32 = arith.constant dense<0.000000e+00> : vector<8x8xf32>
    %61 = tpu.matmul %59, %60, %cst_32 {dimension_numbers = #tpu.dot_dimension_numbers<[1], [0], [0], [1], [0, 0, 1, 1], [], []>} : vector<8x8xbf16>, vector<8x8xbf16>, vector<8x8xf32> -> vector<8x8xf32>
    %62 = arith.truncf %61 : vector<8x8xf32> to vector<8x8xbf16>
    %c0_33 = arith.constant 0 : index
    %c0_34 = arith.constant 0 : index
    %c8 = arith.constant 8 : index
    %63 = vector.load %arg6[%c0_33, %c0_34, %c8] : memref<1x8x32xbf16, #tpu.memory_space<vmem>>, vector<1x8x8xbf16>
    %64 = vector.shape_cast %63 : vector<1x8x8xbf16> to vector<8x8xbf16>
    %65 = vector.shape_cast %62 : vector<8x8xbf16> to vector<1x8x8xbf16>
    tpu.vector_store %arg6[%c0_33, %c0_34, %c8], %65 {strides = array<i32>} : memref<1x8x32xbf16, #tpu.memory_space<vmem>>, vector<1x8x8xbf16>,
    %66 = vector.extract_strided_slice %1 {offsets = [0, 16], sizes = [8, 8], strides = [1, 1]} : vector<8x32xbf16> to vector<8x8xbf16>
    %67 = vector.extract_strided_slice %3 {offsets = [0, 16], sizes = [8, 8], strides = [1, 1]} : vector<8x32xbf16> to vector<8x8xbf16>
    %cst_35 = arith.constant dense<0.000000e+00> : vector<8x8xf32>
    %68 = tpu.matmul %66, %67, %cst_35 {dimension_numbers = #tpu.dot_dimension_numbers<[1], [1], [0], [0], [0, 0, 1, 0], [], []>} : vector<8x8xbf16>, vector<8x8xbf16>, vector<8x8xf32> -> vector<8x8xf32>
    %cst_36 = arith.constant 0.353553385 : f32
    %69 = vector.broadcast %cst_36 : f32 to vector<8x8xf32>
    %70 = arith.mulf %68, %69 : vector<8x8xf32>
    %cst_37 = arith.constant -1.000000e+30 : f32
    %71 = vector.shape_cast %9 : vector<1x8xi1> to vector<1x8xi1>
    %72 = vector.broadcast %71 : vector<1x8xi1> to vector<8x8xi1>
    %73 = vector.broadcast %cst_37 : f32 to vector<8x8xf32>
    %74 = arith.select %72, %70, %73 : vector<8x8xi1>, vector<8x8xf32>
    %cst_38 = arith.constant dense<0xFF800000> : vector<8xf32>
    %75 = vector.multi_reduction <maximumf>, %74, %cst_38 [1] : vector<8x8xf32> to vector<8xf32>
    %76 = vector.shape_cast %75 : vector<8xf32> to vector<8x1xf32>
    %77 = vector.broadcast %76 : vector<8x1xf32> to vector<8x8xf32>
    %78 = arith.subf %74, %77 : vector<8x8xf32>
    %79 = math.exp %78 : vector<8x8xf32>
    %cst_39 = arith.constant dense<0.000000e+00> : vector<8xf32>
    %80 = vector.multi_reduction <add>, %79, %cst_39 [1] : vector<8x8xf32> to vector<8xf32>
    %81 = vector.shape_cast %80 : vector<8xf32> to vector<8x1xf32>
    %82 = vector.broadcast %81 : vector<8x1xf32> to vector<8x8xf32>
    %83 = arith.divf %79, %82 : vector<8x8xf32>
    %c0_40 = arith.constant 0 : index
    %c2 = arith.constant 2 : index
    %c0_41 = arith.constant 0 : index
    %c0_42 = arith.constant 0 : index
    %84 = vector.load %arg7[%c0_40, %c2, %c0_41, %c0_42] : memref<1x4x8x8xf32, #tpu.memory_space<vmem>>, vector<1x1x8x8xf32>
    %85 = vector.shape_cast %84 : vector<1x1x8x8xf32> to vector<8x8xf32>
    %86 = vector.shape_cast %83 : vector<8x8xf32> to vector<1x1x8x8xf32>
    tpu.vector_store %arg7[%c0_40, %c2, %c0_41, %c0_42], %86 {strides = array<i32>} : memref<1x4x8x8xf32, #tpu.memory_space<vmem>>, vector<1x1x8x8xf32>,
    %87 = arith.truncf %83 : vector<8x8xf32> to vector<8x8xbf16>
    %88 = vector.extract_strided_slice %5 {offsets = [0, 16], sizes = [8, 8], strides = [1, 1]} : vector<8x32xbf16> to vector<8x8xbf16>
    %cst_43 = arith.constant dense<0.000000e+00> : vector<8x8xf32>
    %89 = tpu.matmul %87, %88, %cst_43 {dimension_numbers = #tpu.dot_dimension_numbers<[1], [0], [0], [1], [0, 0, 1, 1], [], []>} : vector<8x8xbf16>, vector<8x8xbf16>, vector<8x8xf32> -> vector<8x8xf32>
    %90 = arith.truncf %89 : vector<8x8xf32> to vector<8x8xbf16>
    %c0_44 = arith.constant 0 : index
    %c0_45 = arith.constant 0 : index
    %c16 = arith.constant 16 : index
    %91 = vector.load %arg6[%c0_44, %c0_45, %c16] : memref<1x8x32xbf16, #tpu.memory_space<vmem>>, vector<1x8x8xbf16>
    %92 = vector.shape_cast %91 : vector<1x8x8xbf16> to vector<8x8xbf16>
    %93 = vector.shape_cast %90 : vector<8x8xbf16> to vector<1x8x8xbf16>
    tpu.vector_store %arg6[%c0_44, %c0_45, %c16], %93 {strides = array<i32>} : memref<1x8x32xbf16, #tpu.memory_space<vmem>>, vector<1x8x8xbf16>,
    %94 = vector.extract_strided_slice %1 {offsets = [0, 24], sizes = [8, 8], strides = [1, 1]} : vector<8x32xbf16> to vector<8x8xbf16>
    %95 = vector.extract_strided_slice %3 {offsets = [0, 24], sizes = [8, 8], strides = [1, 1]} : vector<8x32xbf16> to vector<8x8xbf16>
    %cst_46 = arith.constant dense<0.000000e+00> : vector<8x8xf32>
    %96 = tpu.matmul %94, %95, %cst_46 {dimension_numbers = #tpu.dot_dimension_numbers<[1], [1], [0], [0], [0, 0, 1, 0], [], []>} : vector<8x8xbf16>, vector<8x8xbf16>, vector<8x8xf32> -> vector<8x8xf32>
    %cst_47 = arith.constant 0.353553385 : f32
    %97 = vector.broadcast %cst_47 : f32 to vector<8x8xf32>
    %98 = arith.mulf %96, %97 : vector<8x8xf32>
    %cst_48 = arith.constant -1.000000e+30 : f32
    %99 = vector.shape_cast %9 : vector<1x8xi1> to vector<1x8xi1>
    %100 = vector.broadcast %99 : vector<1x8xi1> to vector<8x8xi1>
    %101 = vector.broadcast %cst_48 : f32 to vector<8x8xf32>
    %102 = arith.select %100, %98, %101 : vector<8x8xi1>, vector<8x8xf32>
    %cst_49 = arith.constant dense<0xFF800000> : vector<8xf32>
    %103 = vector.multi_reduction <maximumf>, %102, %cst_49 [1] : vector<8x8xf32> to vector<8xf32>
    %104 = vector.shape_cast %103 : vector<8xf32> to vector<8x1xf32>
    %105 = vector.broadcast %104 : vector<8x1xf32> to vector<8x8xf32>
    %106 = arith.subf %102, %105 : vector<8x8xf32>
    %107 = math.exp %106 : vector<8x8xf32>
    %cst_50 = arith.constant dense<0.000000e+00> : vector<8xf32>
    %108 = vector.multi_reduction <add>, %107, %cst_50 [1] : vector<8x8xf32> to vector<8xf32>
    %109 = vector.shape_cast %108 : vector<8xf32> to vector<8x1xf32>
    %110 = vector.broadcast %109 : vector<8x1xf32> to vector<8x8xf32>
    %111 = arith.divf %107, %110 : vector<8x8xf32>
    %c0_51 = arith.constant 0 : index
    %c3 = arith.constant 3 : index
    %c0_52 = arith.constant 0 : index
    %c0_53 = arith.constant 0 : index
    %112 = vector.load %arg7[%c0_51, %c3, %c0_52, %c0_53] : memref<1x4x8x8xf32, #tpu.memory_space<vmem>>, vector<1x1x8x8xf32>
    %113 = vector.shape_cast %112 : vector<1x1x8x8xf32> to vector<8x8xf32>
    %114 = vector.shape_cast %111 : vector<8x8xf32> to vector<1x1x8x8xf32>
    tpu.vector_store %arg7[%c0_51, %c3, %c0_52, %c0_53], %114 {strides = array<i32>} : memref<1x4x8x8xf32, #tpu.memory_space<vmem>>, vector<1x1x8x8xf32>,
    %115 = arith.truncf %111 : vector<8x8xf32> to vector<8x8xbf16>
    %116 = vector.extract_strided_slice %5 {offsets = [0, 24], sizes = [8, 8], strides = [1, 1]} : vector<8x32xbf16> to vector<8x8xbf16>
    %cst_54 = arith.constant dense<0.000000e+00> : vector<8x8xf32>
    %117 = tpu.matmul %115, %116, %cst_54 {dimension_numbers = #tpu.dot_dimension_numbers<[1], [0], [0], [1], [0, 0, 1, 1], [], []>} : vector<8x8xbf16>, vector<8x8xbf16>, vector<8x8xf32> -> vector<8x8xf32>
    %118 = arith.truncf %117 : vector<8x8xf32> to vector<8x8xbf16>
    %c0_55 = arith.constant 0 : index
    %c0_56 = arith.constant 0 : index
    %c24 = arith.constant 24 : index
    %119 = vector.load %arg6[%c0_55, %c0_56, %c24] : memref<1x8x32xbf16, #tpu.memory_space<vmem>>, vector<1x8x8xbf16>
    %120 = vector.shape_cast %119 : vector<1x8x8xbf16> to vector<8x8xbf16>
    %121 = vector.shape_cast %118 : vector<8x8xbf16> to vector<1x8x8xbf16>
    tpu.vector_store %arg6[%c0_55, %c0_56, %c24], %121 {strides = array<i32>} : memref<1x8x32xbf16, #tpu.memory_space<vmem>>, vector<1x8x8xbf16>,
    return
  }
  func.func @transform_0(%arg0: i32, %arg1: i32) -> (i32, i32, i32) {
    %c0_i32 = arith.constant 0 : i32
    %c0_i32_0 = arith.constant 0 : i32
    %c0_i32_1 = arith.constant 0 : i32
    return %arg0, %c0_i32, %c0_i32_0 : i32, i32, i32
  }
  func.func @transform_1(%arg0: i32, %arg1: i32) -> (i32, i32, i32) {
    %c0_i32 = arith.constant 0 : i32
    %c0_i32_0 = arith.constant 0 : i32
    return %arg0, %arg1, %c0_i32 : i32, i32, i32
  }
  func.func @transform_2(%arg0: i32, %arg1: i32) -> (i32, i32, i32) {
    %c0_i32 = arith.constant 0 : i32
    %c0_i32_0 = arith.constant 0 : i32
    %c0_i32_1 = arith.constant 0 : i32
    return %arg0, %c0_i32, %c0_i32_0 : i32, i32, i32
  }
  func.func @transform_3(%arg0: i32, %arg1: i32) -> (i32, i32, i32) {
    %c0_i32 = arith.constant 0 : i32
    %c0_i32_0 = arith.constant 0 : i32
    %c0_i32_1 = arith.constant 0 : i32
    return %arg0, %c0_i32, %c0_i32_0 : i32, i32, i32
  }
  func.func @transform_4(%arg0: i32, %arg1: i32) -> (i32, i32, i32) {
    %c0_i32 = arith.constant 0 : i32
    %c0_i32_0 = arith.constant 0 : i32
    return %arg0, %arg1, %c0_i32 : i32, i32, i32
  }
  func.func @transform_5(%arg0: i32, %arg1: i32) -> (i32, i32, i32, i32) {
    %c0_i32 = arith.constant 0 : i32
    %c0_i32_0 = arith.constant 0 : i32
    %c0_i32_1 = arith.constant 0 : i32
    return %arg0, %c0_i32, %arg1, %c0_i32_0 : i32, i32, i32, i32
  }
}

</mosaic_0001>

<bundles_post_ra>
// kernel: transformer_forward.29
= control target key start
LH: loop header
LB: loop body
LE: loop exit
PB: predicated region body
PF: predicated region fallthrough
CT: control target
= control target key end

     0   :  { %8 = vsyncpa [#allocation4], 0  ;;  %s228_s15 = smov [#allocation3]   ;;  %s229_s17 = smov 64   ;;  %s263_s0 = inlined_call_operand.vmem [shape: bf16[16,128], index: 0, kind: input, shape index: {}]   ;;  %s264_s1 = inlined_call_operand.hbm [shape: bf16[128,128], index: 1, kind: input, shape index: {}]   ;;  %s265_s2 = inlined_call_operand.vmem [shape: f32[1,128], index: 2, kind: input, shape index: {}]   ;;  %s266_s3 = inlined_call_operand.vmem [shape: bf16[16,128], index: 3, kind: output, shape index: {}]  }
   0x1   :  { %s15_s14 = sshll.u32 %s264_s1, 4  ;;  %s17_s16 = sshll.u32 %s228_s15, 4  ;;  %s16_s14 = int_to_ptr.hbm [resolvable:$true] %s15_s14  ;;  %s18_s16 = int_to_ptr.vmem [resolvable:$true] %s17_s16 }
   0x2   :  { %s230_s18 = smov 4  }
   0x3   :  { %23 = dma.hbm_to_vmem [thread:$0]  %s16_s14, 1024, %s18_s16, [#allocation4], %s229_s17, %s229_s17, %s230_s18  }
   0x4   :  { %226 = dma.done.wait [#allocation4], 1024  }
   0x5   :  { %227 = vsyncadd [#allocation4], 4294966272  ;;  %v192_v0 = vld [vmem:[#allocation3 + $0x38] sm:$0xff]  ;;  %v191_v1 = vld [vmem:[#allocation3 + $0x30] sm:$0xff] }
   0x6   :  { %110 = vmatpush.bf16.msra.mxu0 %v192_v0  ;;  %v190_v2 = vld [vmem:[#allocation3 + $0x28] sm:$0xff]  ;;  %v189_v3 = vld [vmem:[#allocation3 + $0x20] sm:$0xff]  ;;  %v188_v4 = vld [vmem:[#allocation3 + $0x18] sm:$0xff] }
   0x7   :  { %v187_v5 = vld [vmem:[#allocation3 + $0x10] sm:$0xff]  ;;  %v186_v6 = vld [vmem:[#allocation3 + $0x8] sm:$0xff]  ;;  %v185_v7 = vld [vmem:[#allocation3] sm:$0xff] }
   0x8   :  { %v184_v8 = vld [vmem:[%s263_s0] sm:$0xff] }
   0x9   :  { %v201_v10 = vld [vmem:[%s265_s2] ss:$0 sm:$0xff] }
   0xa   :  { %111 = vmatpush.bf16.msra.mxu0 %v191_v1 }
   0xe   :  { %112 = vmatpush.bf16.msra.mxu0 %v190_v2 }
  0x12   :  { %113 = vmatpush.bf16.msra.mxu0 %v189_v3 }
  0x16   :  { %114 = vmatpush.bf16.msra.mxu0 %v188_v4 }
  0x1a   :  { %115 = vmatpush.bf16.msra.mxu0 %v187_v5 }
  0x1e   :  { %116 = vmatpush.bf16.msra.mxu0 %v186_v6 }
  0x22   :  { %117 = vmatpush.bf16.msra.mxu0 %v185_v7 }
  0x25   :  { %118 = vmatmul.bf16.vlgmr.msra.gmra.mxu0 %v184_v8 }
  0xa2   :  { %v119_v9 = vpop.f32.mrf.mxu0 }
  0xa3   :  { %v137_v12 = vadd.f32 %v201_v10, %v119_v9 }
  0xaa   :  { %v121_v11 = vpop.f32.mrf.mxu0 }
  0xab   :  { %v138_v13 = vadd.f32 %v201_v10, %v121_v11 }
  0xad   :  { %v196_v14 = vpack.c.bf16 %v138_v13, %v137_v12 }
  0xaf   :  { %197 = vst [vmem:[%s266_s3] sm:$0xff] %v196_v14  }
  0xb0   :  { %147 = vsyncpa [#allocation4], 1 }

// kernel: transformer_forward.41
= control target key start
LH: loop header
LB: loop body
LE: loop exit
PB: predicated region body
PF: predicated region fallthrough
CT: control target
= control target key end

     0   :  { %11 = vsyncpa [#allocation4], 0  ;;  %s312_s24 = smov [#allocation3]   ;;  %s313_s26 = smov 64   ;;  %s375_s0 = inlined_call_operand.vmem [shape: bf16[16,128], index: 0, kind: input, shape index: {}]   ;;  %s376_s1 = inlined_call_operand.hbm [shape: bf16[128,128], index: 1, kind: input, shape index: {}]   ;;  %s377_s2 = inlined_call_operand.vmem [shape: f32[1,128], index: 2, kind: input, shape index: {}]   ;;  %s378_s3 = inlined_call_operand.vmem [shape: bf16[16,128], index: 3, kind: input, shape index: {}]   ;;  %s379_s4 = inlined_call_operand.vmem [shape: f32[1,128], index: 4, kind: input, shape index: {}]   ;;  %s380_s5 = inlined_call_operand.vmem [shape: f32[1,128], index: 5, kind: input, shape index: {}]   ;;  %s381_s6 = inlined_call_operand.vmem [shape: bf16[16,128], index: 6, kind: output, shape index: {}]  }
   0x1   :  { %s18_s23 = sshll.u32 %s376_s1, 4  ;;  %s20_s25 = sshll.u32 %s312_s24, 4  ;;  %s19_s23 = int_to_ptr.hbm [resolvable:$true] %s18_s23  ;;  %s21_s25 = int_to_ptr.vmem [resolvable:$true] %s20_s25 }
   0x2   :  { %s314_s27 = smov 4  }
   0x3   :  { %26 = dma.hbm_to_vmem [thread:$0]  %s19_s23, 1024, %s21_s25, [#allocation4], %s313_s26, %s313_s26, %s314_s27  }
   0x4   :  { %310 = dma.done.wait [#allocation4], 1024  }
   0x5   :  { %311 = vsyncadd [#allocation4], 4294966272  ;;  %v266_v0 = vld [vmem:[#allocation3 + $0x38] sm:$0xff]  ;;  %v265_v1 = vld [vmem:[#allocation3 + $0x30] sm:$0xff]  ;;  %v154_v9 = vlaneseq }
   0x6   :  { %119 = vmatpush.bf16.msra.mxu0 %v266_v0  ;;  %v264_v2 = vld [vmem:[#allocation3 + $0x28] sm:$0xff]  ;;  %v263_v3 = vld [vmem:[#allocation3 + $0x20] sm:$0xff]  ;;  %v262_v4 = vld [vmem:[#allocation3 + $0x18] sm:$0xff] }
   0x7   :  { %v261_v5 = vld [vmem:[#allocation3 + $0x10] sm:$0xff]  ;;  %v260_v6 = vld [vmem:[#allocation3 + $0x8] sm:$0xff]  ;;  %v259_v7 = vld [vmem:[#allocation3] sm:$0xff]  ;;  %v155_v12 = vand.u32 127, %v154_v9 }
   0x8   :  { %v258_v8 = vld [vmem:[%s375_s0] sm:$0xff] }
   0x9   :  { %v268_v10 = vld [vmem:[%s378_s3] sm:$0xff]   ;;  %vm156_vm0 = vcmp.lt.s32.totalorder %v155_v12, 32 }
   0xa   :  { %120 = vmatpush.bf16.msra.mxu0 %v265_v1  ;;  %v279_v11 = vld [vmem:[%s377_s2] ss:$0 sm:$0xff]  ;;  %v269_v13 = vunpack.c.l.bf16 %v268_v10  ;;  %v270_v18 = vunpack.c.h.bf16 %v268_v10 }
   0xb   :  { %v280_v51 = vld [vmem:[%s379_s4] ss:$0 sm:$0xff] }
   0xc   :  { %v281_v55 = vld [vmem:[%s380_s5] ss:$0 sm:$0xff] }
   0xe   :  { %121 = vmatpush.bf16.msra.mxu0 %v264_v2 }
  0x12   :  { %122 = vmatpush.bf16.msra.mxu0 %v263_v3 }
  0x16   :  { %123 = vmatpush.bf16.msra.mxu0 %v262_v4 }
  0x1a   :  { %124 = vmatpush.bf16.msra.mxu0 %v261_v5 }
  0x1e   :  { %125 = vmatpush.bf16.msra.mxu0 %v260_v6 }
  0x22   :  { %126 = vmatpush.bf16.msra.mxu0 %v259_v7 }
  0x25   :  { %127 = vmatmul.bf16.vlgmr.msra.gmra.mxu0 %v258_v8 }
  0xa2   :  { %v128_v14 = vpop.f32.mrf.mxu0 }
  0xa3   :  { %v146_v15 = vadd.f32 %v279_v11, %v128_v14 }
  0xa5   :  { %v152_v16 = vadd.f32 %v269_v13, %v146_v15 }
  0xa7   :  { %v157_v17 = vsel %vm156_vm0, %v152_v16, 0.0 }
  0xa8   :  { %159 = vadd.xlane.f32.xlu0 %v157_v17 }
  0xaa   :  { %v130_v19 = vpop.f32.mrf.mxu0 }
  0xab   :  { %v147_v20 = vadd.f32 %v279_v11, %v130_v19 }
  0xad   :  { %v153_v21 = vadd.f32 %v270_v18, %v147_v20 }
  0xaf   :  { %v158_v22 = vsel %vm156_vm0, %v153_v21, 0.0 }
  0xb0   :  { %161 = vadd.xlane.f32.xlu0 %v158_v22 }
 0x11b   :  { %v160_v23 = vpop.xlane.xlu0 %159 }
 0x11c   :  { %v163_v24 = vmul.f32 0.03125, %v160_v23 }
 0x11e   :  { %v165_v25 = vsub.f32 %v152_v16, %v163_v24 }
 0x120   :  { %v167_v26 = vsel %vm156_vm0, %v165_v25, 0.0 }
 0x121   :  { %v169_v27 = vmul.f32 %v167_v26, %v167_v26 }
 0x123   :  { %171 = vadd.xlane.f32.xlu1 %v169_v27  ;;  %v162_v28 = vpop.xlane.xlu0 %161 }
 0x124   :  { %v164_v29 = vmul.f32 0.03125, %v162_v28 }
 0x126   :  { %v166_v30 = vsub.f32 %v153_v21, %v164_v29 }
 0x128   :  { %v168_v31 = vsel %vm156_vm0, %v166_v30, 0.0 }
 0x129   :  { %v170_v32 = vmul.f32 %v168_v31, %v168_v31 }
 0x12b   :  { %173 = vadd.xlane.f32.xlu1 %v170_v32 }
 0x196   :  { %v172_v33 = vpop.xlane.xlu1 %171 }
 0x197   :  { %v175_v34 = vmul.f32 0.03125, %v172_v33 }
 0x199   :  { %v177_v35 = vadd.f32 1e-05, %v175_v34 }
 0x19b   :  { %282 = vrsqrt.f32 %v177_v35  ;;  %vm185_vm2 = vweird.f32 %v177_v35 }
 0x19e   :  { %v174_v36 = vpop.xlane.xlu1 %173 }
 0x19f   :  { %v176_v37 = vmul.f32 0.03125, %v174_v36 }
 0x1a1   :  { %v283_v38 = vpop.eup %282  ;;  %v178_v39 = vadd.f32 1e-05, %v176_v37 }
 0x1a2   :  { %v180_v40 = vmul.f32 %v283_v38, %v177_v35  ;;  %vm186_vm1 = vweird.f32 %v283_v38 }
 0x1a3   :  { %284 = vrsqrt.f32 %v178_v39  ;;  %vm187_vm3 = vmor %vm185_vm2, %vm186_vm1  ;;  %vm195_vm5 = vweird.f32 %v178_v39 }
 0x1a4   :  { %v181_v41 = vmul.f32 %v283_v38, %v180_v40 }
 0x1a6   :  { %v182_v42 = vmul.f32 0.5, %v181_v41 }
 0x1a8   :  { %v183_v43 = vsub.f32 1.5, %v182_v42 }
 0x1a9   :  { %v285_v44 = vpop.eup %284 }
 0x1aa   :  { %v184_v45 = vmul.f32 %v283_v38, %v183_v43  ;;  %v190_v46 = vmul.f32 %v285_v44, %v178_v39  ;;  %vm196_vm4 = vweird.f32 %v285_v44 }
 0x1ab   :  { %vm197_vm6 = vmor %vm195_vm5, %vm196_vm4 }
 0x1ac   :  { %v191_v47 = vmul.f32 %v285_v44, %v190_v46  ;;  %v188_v48 = vsel %vm187_vm3, %v283_v38, %v184_v45 }
 0x1ad   :  { %v199_v52 = vmul.f32 %v188_v48, %v165_v25 }
 0x1ae   :  { %v192_v49 = vmul.f32 0.5, %v191_v47 }
 0x1af   :  { %v205_v56 = vmul.f32 %v280_v51, %v199_v52 }
 0x1b0   :  { %v193_v50 = vsub.f32 1.5, %v192_v49 }
 0x1b1   :  { %v211_v59 = vadd.f32 %v281_v55, %v205_v56 }
 0x1b2   :  { %v194_v53 = vmul.f32 %v285_v44, %v193_v50 }
 0x1b4   :  { %v198_v54 = vsel %vm197_vm6, %v285_v44, %v194_v53 }
 0x1b5   :  { %v200_v57 = vmul.f32 %v198_v54, %v166_v30 }
 0x1b7   :  { %v206_v58 = vmul.f32 %v280_v51, %v200_v57 }
 0x1b9   :  { %v212_v60 = vadd.f32 %v281_v55, %v206_v58 }
 0x1bb   :  { %v274_v61 = vpack.c.bf16 %v212_v60, %v211_v59 }
 0x1bd   :  { %275 = vst [vmem:[%s381_s6] sm:$0xff] %v274_v61  }
 0x1be   :  { %221 = vsyncpa [#allocation4], 1 }

// kernel: transformer_forward.40
= control target key start
LH: loop header
LB: loop body
LE: loop exit
PB: predicated region body
PF: predicated region fallthrough
CT: control target
= control target key end

     0   :  { %s1015_s15 = smov 0   ;;  %s1017_s16 = smov 0   ;;  %s1185_s0 = inlined_call_operand.vmem [shape: f32[2,1,8], index: 0, kind: input, shape index: {}]   ;;  %s1186_s1 = inlined_call_operand.vmem [shape: bf16[2,8,32], index: 1, kind: input, shape index: {}]   ;;  %s1187_s2 = inlined_call_operand.vmem [shape: bf16[2,8,32], index: 2, kind: input, shape index: {}]   ;;  %s1188_s3 = inlined_call_operand.vmem [shape: bf16[2,8,32], index: 3, kind: input, shape index: {}]   ;;  %s1189_s4 = inlined_call_operand.vmem [shape: bf16[2,8,32], index: 4, kind: output, shape index: {}]  }
   0x1   :  { %s1019_s17 = smov 0  }
   0x2 LB: > { %s33_s18 = sadd.s32 1, %s972_s16  ;;  %p872_p0 = scmp.ge.s32.totalorder %s976_s17, 1  ;;  %s976_s17 = sphi %s1019_s17, %s14_s17   ;;  %s972_s16 = sphi %s1017_s16, %s1193_s16   ;;  %s968_s15 = sphi %s1015_s15, %s1192_s15  }
   0x3   : > { %p35_p1 = scmp.ge.s32.totalorder %s33_s18, 2  ;;  %p228_p2 = scmp.lt.s32.totalorder %s976_s17, 3 }
   0x5   : > { %s1195_s18 = smov (%p35_p1, %s33_s18), 0  ;;  %p229_p3 = pnand %p872_p0, %p228_p2 }
   0x6   : > { %p278_p4 = scmp.lt.s32.totalorder (!%p229_p3), %s968_s15, 1  ;;  %s979_s26 = smov (!%p229_p3), 120  }
   0x7   : > { %232 = sbr.rel (%p229_p3) target bundleno = 1143 (0x477), region = 36  ;;  %s980_s27 = smov (!%p229_p3), 104  }
   0x8   : > { %s982_s5 = smov (!%p229_p3), 112   ;;  %s987_s9 = smov (!%p229_p3), 8  }
   0x9   : > { %s988_s10 = smov (!%p229_p3), 16   ;;  %s989_s11 = smov (!%p229_p3), 24  }
   0xc   : > { %v978_v0 = vmov 0   ;;  %s1197_s15 = smov (!%p278_p4, %s968_s15), 1  ;;  %vm342_vm0 = vcmask 64512   ;;  %vm317_vm1 = vcmask 31744   ;;  %v981_v8 = vmov -1e+30  }
   0xd   : > { %923 = vset.pattern.permute.xlu0 %v978_v0  ;;  %s1034_s19 = sshll.u32 %s1197_s15, 2  ;;  %318 = vst.msk [vmem:[#allocation2] sm:$0xff] %vm317_vm1, %v981_v8  ;;  %s283_s30 = scalar_lea.vmem %s1185_s0, %s1197_s15  ;;  %v328_v12 = vlaneseq  ;;  %v983_v24 = vmov 0.0   ;;  %vm387_vm6 = vcmask 7168   ;;  %vm400_vm7 = vcmask 1043456  }
   0xe   : > { %s297_s22 = scalar_lea.vmem %s1187_s2, %s1034_s19  ;;  %s290_s25 = scalar_lea.vmem %s1186_s1, %s1034_s19  ;;  %v325_v9 = vld [vmem:[%s283_s30] sm:$0x1]  ;;  %319 = vst.msk [vmem:[#allocation3] sm:$0xff] %vm317_vm1, %v983_v24  ;;  %vm474_vm8 = vcmask 15368   ;;  %v984_v55 = vmov 1   ;;  %vm564_vm9 = vcmask 23568  }
   0xf   : > { %v323_v1 = vld [vmem:[%s297_s22] sm:$0xf]  ;;  %vm326_vm2 = vcmp.gt.f32.partialorder %v325_v9, 0.0  ;;  %v329_v14 = vshrl.u32 %v328_v12, 7  ;;  %v334_v15 = vand.u32 127, %v328_v12  ;;  %s304_s8 = scalar_lea.vmem %s1188_s3, %s1034_s19  ;;  %924 = vset.pattern.permute.xlu2 %v984_v55  ;;  %vm651_vm10 = vcmask 31768   ;;  %s311_s14 = scalar_lea.vmem %s1189_s4, %s1034_s19 }
  0x10   : > { %v347_v2 = vsel %vm342_vm0, %v323_v1, 0  ;;  %v426_v3 = vunpack.c.l.b16 %v323_v1  ;;  %v322_v4 = vld [vmem:[%s290_s25] sm:$0xf]  ;;  %v338_v13 = vsel %vm326_vm2, 1, %v978_v0  ;;  %vm320_vm11 = vcmask 261120  }
  0x11   : > { %356 = vmatpush.bf16.xpose.msra.mxu0 %v347_v2  ;;  %v421_v6 = vunpack.c.l.b16 %v322_v4  ;;  %v339_v16 = vperm.slane %v338_v13, 0  ;;  %vm337_vm3 = vcmp.le.s32.totalorder %v334_v15, %v329_v14  ;;  %v324_v34 = vld [vmem:[%s304_s8] sm:$0xf]  ;;  %321 = vst.msk [vmem:[#allocation4] sm:$0xff] %vm320_vm11, %v983_v24  ;;  %vm513_vm12 = vcmask 130112  }
  0x12   : > { %v427_v5 = vpack.c.b16 %v426_v3, %v426_v3  ;;  %v402_v35 = vsel %vm400_vm7, %v324_v34, 0  ;;  %v485_v36 = vunpack.c.l.b16 %v324_v34  ;;  %v985_v3 = vmov 2  }
  0x13   : > { %v422_v7 = vpack.c.b16 %v421_v6, %v421_v6  ;;  %vm340_vm4 = vcmp.eq.s32.totalorder %v339_v16, 1  ;;  %411 = vmatpush.bf16.msra.mxu1 %v402_v35  ;;  %vm600_vm14 = vcmask 195712   ;;  %vm687_vm15 = vcmask 261312  }
  0x14   : > { %428 = vrot.lane.b32.xlu1 %v427_v5, %s979_s26  ;;  %vm1056_vm5 = vmand %vm340_vm4, %vm337_vm3  ;;  %518 = vrot.lane.b32.xlu2 %v427_v5, %s982_s5  ;;  %v1068_v25 = vld [vmem:[#allocation2] sm:$0xff]  ;;  %v1090_v39 = vpack.c.b16 %v485_v36, %v485_v36  ;;  %vm719_vm1 = vcmask 126016   ;;  %vm733_vm2 = vcmask 191616   ;;  %vm747_vm3 = vcmask 257216  }
  0x18   : > { %877 = vmatmul.msk.bf16.vlgmr.msra.gmra.mxu0 %vm342_vm0, %v322_v4  ;;  %v986_v4 = vmov 3  }
  0x19   : > { %926 = vset.pattern.permute.xlu1 %v986_v4 }
  0x1c   : > { %423 = vrot.lane.b32.xlu1 %v422_v7, %s979_s26  ;;  %516 = vrot.lane.b32.xlu2 %v422_v7, %s982_s5 }
  0x24   : > { %605 = vrot.lane.b32.xlu1 %v427_v5, %s980_s27  ;;  %603 = vrot.lane.b32.xlu2 %v422_v7, %s980_s27 }
  0x6e   : > { %v519_v37 = vpop.permute.xlu2 %518 }
  0x6f   : > { %v524_v38 = vsel %vm342_vm0, %v519_v37, 0 }
  0x70   : > { %533 = vmatpush.bf16.xpose.msrb.mxu1 %v524_v38 }
  0x76   : > { %v517_v40 = vpop.permute.xlu2 %516 }
  0x7e   : > { %v604_v46 = vpop.permute.xlu2 %603 }
  0x86   : > { %v429_v10 = vpop.permute.xlu1 %428 }
  0x87   : > { %v434_v11 = vsel %vm342_vm0, %v429_v10, 0 }
  0x88   : > { %443 = vmatpush.bf16.xpose.msra.mxu2 %v434_v11 }
  0x8e   : > { %v424_v17 = vpop.permute.xlu1 %423 }
  0x8f   : > { %879 = vmatmul.msk.bf16.vlgmr.msra.gmra.mxu2 %vm342_vm0, %v424_v17 }
  0x95   : > { %v358_v19 = vpop.f32.mrf.mxu0 }
  0x96   : > { %v362_v20 = vmul.f32 0.35355338, %v358_v19  ;;  %v606_v41 = vpop.permute.xlu1 %605 }
  0x97   : > { %v611_v42 = vsel %vm342_vm0, %v606_v41, 0 }
  0x98   : > { %v363_v21 = vsel %vm1056_vm5, %v362_v20, -1e+30  ;;  %620 = vmatpush.bf16.xpose.msrb.mxu0 %v611_v42 }
  0x99   : > { %v365_v22 = vsel %vm342_vm0, %v363_v21, -inf }
  0x9a   : > { %366 = vmax.xlane.f32.xlu0 %v365_v22 }
  0x9d   : > { %v360_v23 = vpop.f32.mrf.mxu0 }
  0x9f   : > { %883 = vmatmul.msk.bf16.vlgmr.msrb.gmra.mxu0 %vm342_vm0, %v604_v46 }
 0x10d   : > { %v367_v26 = vpop.xlane.xlu0 %366 }
 0x10e   : > { %v1071_v27 = vmax.f32 %v1068_v25, %v367_v26 }
 0x110   : > { %v378_v28 = vsub.f32 %v1068_v25, %v1071_v27  ;;  %419 = vst.msk [vmem:[#allocation2] sm:$0xff] %vm387_vm6, %v1071_v27  ;;  %371 = vperm.xlu0 %923, %v1071_v27  }
 0x112   : > { %v445_v29 = vpop.f32.mrf.mxu2  ;;  %v379_v11 = vmul.f32 1.442695, %v378_v28 }
 0x113   : > { %v449_v30 = vmul.f32 0.35355338, %v445_v29 }
 0x115   : > { %v1080_v31 = vsel %vm1056_vm5, %v449_v30, -1e+30 }
 0x116   : > { %v452_v32 = vsel %vm342_vm0, %v1080_v31, -inf }
 0x117   : > { %453 = vmax.xlane.f32.xlu1 %v452_v32  ;;  %v451_v48 = vld [vmem:[#allocation2] sm:$0xff] }
 0x118   : > { %932 = vset.pattern.permute.xlu0 %v984_v55 }
 0x11a   : > { %v447_v33 = vpop.f32.mrf.mxu2 }
 0x11c   : > { %v622_v53 = vpop.f32.mrf.mxu0 }
 0x11d   : > { %v626_v54 = vmul.f32 0.35355338, %v622_v53 }
 0x11f   : > { %v1107_v56 = vsel %vm1056_vm5, %v626_v54, -1e+30 }
 0x120   : > { %v629_v57 = vsel %vm342_vm0, %v1107_v56, -inf }
 0x124   : > { %v624_v59 = vpop.f32.mrf.mxu0 }
 0x130   : > { %487 = vrot.lane.b32.xlu1 %v1090_v39, %s979_s26 }
 0x13a   : > { %630 = vmax.xlane.f32.xlu0 %v629_v57 }
 0x14e   : > { %574 = vrot.lane.b32.xlu0 %v1090_v39, %s982_s5 }
 0x182   : > { %v372_v43 = vpop.permute.xlu0 %371 }
 0x183   : > { %v374_v44 = vsub.f32 %v363_v21, %v372_v43  ;;  %v389_v43 = vld [vmem:[#allocation4] sm:$0xff] }
 0x185   : > { %v375_v45 = vmul.f32 1.442695, %v374_v44 }
 0x187   : > { %936 = vpow2.f32 %v375_v45 }
 0x188   : > { %938 = vpow2.f32 %v379_v11 }
 0x18a   : > { %v454_v47 = vpop.xlane.xlu1 %453 }
 0x18b   : > { %v455_v49 = vmax.f32 %v451_v48, %v454_v47 }
 0x18d   : > { %v937_v50 = vpop.eup %936  ;;  %515 = vst.msk [vmem:[#allocation2] sm:$0xff] %vm474_vm8, %v455_v49  ;;  %v465_v19 = vsub.f32 %v451_v48, %v455_v49 }
 0x18e   : > { %v1099_v51 = vsel %vm1056_vm5, %v937_v50, 0.0  ;;  %v939_v22 = vpop.eup %938 }
 0x18f   : > { %v396_v52 = vpack.c.bf16 %v1099_v51, %v1099_v51  ;;  %v466_v21 = vmul.f32 1.442695, %v465_v19  ;;  %v383_v29 = vsel %vm342_vm0, %v1099_v51, 0.0 }
 0x191   : > { %878 = vmatmul.msk.bf16.vlgmr.msra.gmra.mxu1 %vm342_vm0, %v396_v52 }
 0x194   : > { %v541_v8 = vld [vmem:[#allocation2] sm:$0xff] }
 0x1a1   : > { %881 = vmatmul.msk.bf16.vlgmr.msrb.gmra.mxu1 %vm342_vm0, %v517_v40 }
 0x1a2   : > { %v488_v5 = vpop.permute.xlu1 %487 }
 0x1a3   : > { %v493_v6 = vsel %vm400_vm7, %v488_v5, 0 }
 0x1a4   : > { %502 = vmatpush.bf16.msra.mxu3 %v493_v6 }
 0x1ad   : > { %v631_v13 = vpop.xlane.xlu0 %630 }
 0x20e   : > { %v1111_v58 = vpop.f32.mrf.mxu1 }
 0x216   : > { %v415_v60 = vpop.f32.mrf.mxu1 }
 0x21e   : > { %v535_v61 = vpop.f32.mrf.mxu1 }
 0x21f   : > { %v539_v62 = vmul.f32 0.35355338, %v535_v61 }
 0x221   : > { %v1117_v63 = vsel %vm1056_vm5, %v539_v62, -1e+30 }
 0x222   : > { %v542_v1 = vsel %vm342_vm0, %v1117_v63, -inf }
 0x223   : > { %543 = vmax.xlane.f32.xlu2 %v542_v1 }
 0x226   : > { %v537_v2 = vpop.f32.mrf.mxu1 }
 0x23b   : > { %458 = vperm.xlu2 %924, %v455_v49  }
 0x243   : > { %925 = vset.pattern.permute.xlu2 %v985_v3 }
 0x296   : > { %v544_v7 = vpop.xlane.xlu2 %543 }
 0x297   : > { %v545_v9 = vmax.f32 %v541_v8, %v544_v7 }
 0x299   : > { %v555_v10 = vsub.f32 %v541_v8, %v545_v9  ;;  %602 = vst.msk [vmem:[#allocation2] sm:$0xff] %vm564_vm9, %v545_v9  ;;  %548 = vperm.xlu2 %925, %v545_v9  }
 0x29b   : > { %v556_v30 = vmul.f32 1.442695, %v555_v10 }
 0x29e   : > { %v459_v12 = vpop.permute.xlu2 %458 }
 0x29f   : > { %v461_v14 = vsub.f32 %v1080_v31, %v459_v12  ;;  %v575_v31 = vpop.permute.xlu0 %574 }
 0x2a0   : > { %v628_v15 = vld [vmem:[#allocation2] sm:$0xff]  ;;  %v580_v32 = vsel %vm400_vm7, %v575_v31, 0 }
 0x2a1   : > { %v462_v16 = vmul.f32 1.442695, %v461_v14  ;;  %v632_v17 = vmax.f32 %v628_v15, %v631_v13  ;;  %661 = vrot.lane.b32.xlu2 %v1090_v39, %s980_s27  ;;  %589 = vmatpush.bf16.msrb.mxu3 %v580_v32 }
 0x2a2   : > { %927 = vset.pattern.permute.xlu2 %v978_v0 }
 0x2a3   : > { %940 = vpow2.f32 %v462_v16  ;;  %v642_v20 = vsub.f32 %v628_v15, %v632_v17  ;;  %689 = vst.msk [vmem:[#allocation2] sm:$0xff] %vm651_vm10, %v632_v17  ;;  %635 = vperm.xlu1 %926, %v632_v17  }
 0x2a4   : > { %942 = vpow2.f32 %v466_v21 }
 0x2a5   : > { %944 = vpow2.f32 %v556_v30  ;;  %v643_v33 = vmul.f32 1.442695, %v642_v20 }
 0x2a7   : > { %946 = vpow2.f32 %v643_v33 }
 0x2a9   : > { %v941_v23 = vpop.eup %940  ;;  %392 = vperm.xlu2 %927, %v939_v22  }
 0x2aa   : > { %v464_v25 = vsel %vm1056_vm5, %v941_v23, 0.0  ;;  %v943_v28 = vpop.eup %942 }
 0x2ab   : > { %v470_v26 = vsel %vm342_vm0, %v464_v25, 0.0  ;;  %v483_v27 = vpack.c.bf16 %v464_v25, %v464_v25  ;;  %929 = vset.pattern.permute.xlu1 %v985_v3  ;;  %v1142_v34 = vpop.eup %944 }
 0x2ac   : > { %471 = vadd.xlane.f32.xlu0 %v470_v26 }
 0x2ad   : > { %880 = vmatmul.msk.bf16.vlgmr.msra.gmra.mxu3 %vm342_vm0, %v483_v27  ;;  %v1145_v35 = vpop.eup %946 }
 0x2b1   : > { %928 = vset.pattern.permute.xlu2 %v984_v55  ;;  %v381_v55 = vld [vmem:[#allocation3] sm:$0xff] }
 0x2b2   : > { %479 = vperm.xlu2 %928, %v943_v28   ;;  %v382_v57 = vmul.f32 %v939_v22, %v381_v55 }
 0x2cd   : > { %384 = vadd.xlane.f32.xlu1 %v383_v29 }
 0x2e6   : > { %569 = vperm.xlu1 %929, %v1142_v34  }
 0x2ee   : > { %930 = vset.pattern.permute.xlu1 %v986_v4 }
 0x2ef   : > { %656 = vperm.xlu1 %930, %v1145_v35  }
 0x2f3   : > { %v549_v36 = vpop.permute.xlu2 %548 }
 0x2f4   : > { %v551_v37 = vsub.f32 %v1117_v63, %v549_v36 }
 0x2f6   : > { %v552_v38 = vmul.f32 1.442695, %v551_v37 }
 0x2f7   : > { %931 = vset.pattern.permute.xlu1 %v978_v0 }
 0x2f8   : > { %948 = vpow2.f32 %v552_v38 }
 0x2fb   : > { %v662_v24 = vpop.permute.xlu2 %661 }
 0x2fc   : > { %v667_v41 = vsel %vm400_vm7, %v662_v24, 0 }
 0x2fd   : > { %676 = vmatpush.bf16.msrb.mxu2 %v667_v41 }
 0x2fe   : > { %v949_v39 = vpop.eup %948 }
 0x2ff   : > { %v554_v40 = vsel %vm1056_vm5, %v949_v39, 0.0 }
 0x300   : > { %v573_v42 = vpack.c.bf16 %v554_v40, %v554_v40  ;;  %v560_v62 = vsel %vm342_vm0, %v554_v40, 0.0 }
 0x302   : > { %882 = vmatmul.msk.bf16.vlgmr.msrb.gmra.mxu3 %vm342_vm0, %v573_v42 }
 0x303   : > { %v393_v44 = vpop.permute.xlu2 %392 }
 0x304   : > { %v395_v45 = vmul.f32 %v393_v44, %v389_v43 }
 0x306   : > { %v417_v46 = vadd.f32 %v1111_v58, %v395_v45 }
 0x308   : > { %418 = vst.msk [vmem:[#allocation4] sm:$0xff] %vm342_vm0, %v417_v46 }
 0x30c   : > { %v480_v63 = vpop.permute.xlu2 %479 }
 0x30f   : > { %v476_v2 = vld [vmem:[#allocation4] sm:$0xff] }
 0x310   : > { %v482_v5 = vmul.f32 %v480_v63, %v476_v2 }
 0x315   : > { %v636_v0 = vpop.permute.xlu1 %635 }
 0x316   : > { %v638_v47 = vsub.f32 %v1107_v56, %v636_v0 }
 0x318   : > { %v639_v48 = vmul.f32 1.442695, %v638_v47 }
 0x31a   : > { %950 = vpow2.f32 %v639_v48 }
 0x31f   : > { %v472_v18 = vpop.xlane.xlu0 %471 }
 0x320   : > { %v951_v49 = vpop.eup %950 }
 0x321   : > { %v641_v50 = vsel %vm1056_vm5, %v951_v49, 0.0 }
 0x322   : > { %v647_v51 = vsel %vm342_vm0, %v641_v50, 0.0  ;;  %v660_v52 = vpack.c.bf16 %v641_v50, %v641_v50 }
 0x323   : > { %648 = vadd.xlane.f32.xlu0 %v647_v51 }
 0x324   : > { %884 = vmatmul.msk.bf16.vlgmr.msrb.gmra.mxu2 %vm342_vm0, %v660_v52  ;;  %vm705_vm0 = vcmask 60416  }
 0x330   : > { %v504_v53 = vpop.f32.mrf.mxu3 }
 0x331   : > { %509 = vrot.lane.b32.xlu2 %v504_v53, %s987_s9 }
 0x338   : > { %v506_v54 = vpop.f32.mrf.mxu3 }
 0x340   : > { %v385_v58 = vpop.xlane.xlu1 %384 }
 0x341   : > { %v386_v56 = vadd.f32 %v385_v58, %v382_v57 }
 0x343   : > { %388 = vst.msk [vmem:[#allocation3] sm:$0xff] %vm387_vm6, %v386_v56 }
 0x34a   : > { %v468_v59 = vld [vmem:[#allocation3] sm:$0xff] }
 0x34b   : > { %v469_v60 = vmul.f32 %v943_v28, %v468_v59 }
 0x34d   : > { %v473_v61 = vadd.f32 %v472_v18, %v469_v60 }
 0x34f   : > { %475 = vst.msk [vmem:[#allocation3] sm:$0xff] %vm474_vm8, %v473_v61 }
 0x356   : > { %v558_v11 = vld [vmem:[#allocation3] sm:$0xff] }
 0x357   : > { %v559_v12 = vmul.f32 %v1142_v34, %v558_v11 }
 0x358   : > { %v570_v25 = vpop.permute.xlu1 %569 }
 0x35a   : > { %561 = vadd.xlane.f32.xlu2 %v560_v62 }
 0x361   : > { %v657_v29 = vpop.permute.xlu1 %656 }
 0x385   : > { %v591_v1 = vpop.f32.mrf.mxu3 }
 0x386   : > { %596 = vrot.lane.b32.xlu0 %v591_v1, %s988_s10 }
 0x38b   : > { %v510_v6 = vpop.permute.xlu2 %509 }
 0x38c   : > { %v512_v7 = vadd.f32 %v510_v6, %v482_v5 }
 0x38d   : > { %v593_v8 = vpop.f32.mrf.mxu3 }
 0x38e   : > { %514 = vst.msk [vmem:[#allocation4] sm:$0xff] %vm513_vm12, %v512_v7 }
 0x395   : > { %v566_v23 = vld [vmem:[#allocation4] sm:$0xff] }
 0x396   : > { %v649_v17 = vpop.xlane.xlu0 %648  ;;  %v572_v26 = vmul.f32 %v570_v25, %v566_v23 }
 0x3a7   : > { %v678_v9 = vpop.f32.mrf.mxu2 }
 0x3a8   : > { %683 = vrot.lane.b32.xlu2 %v678_v9, %s989_s11 }
 0x3af   : > { %v680_v10 = vpop.f32.mrf.mxu2 }
 0x3cd   : > { %v562_v13 = vpop.xlane.xlu2 %561 }
 0x3ce   : > { %v563_v14 = vadd.f32 %v562_v13, %v559_v12 }
 0x3d0   : > { %565 = vst.msk [vmem:[#allocation3] sm:$0xff] %vm564_vm9, %v563_v14 }
 0x3d7   : > { %v645_v15 = vld [vmem:[#allocation3] sm:$0xff] }
 0x3d8   : > { %v646_v16 = vmul.f32 %v1145_v35, %v645_v15 }
 0x3da   : > { %v650_v19 = vadd.f32 %v649_v17, %v646_v16 }
 0x3dc   : > { %652 = vst.msk [vmem:[#allocation3] sm:$0xff] %vm651_vm10, %v650_v19 }
 0x3e3   : > { %v707_v20 = vld [vmem:[#allocation3] sm:$0xff] }
 0x3e4   : > { %vm708_vm13 = vcmp.le.f32.partialorder %v707_v20, 0.0 }
 0x3e5   : > { %v709_v21 = vsel %vm708_vm13, 1.0, %v707_v20 }
 0x3e6   : > { %952 = vrcp.f32 %v709_v21 }
 0x3ec   : > { %v953_v22 = vpop.eup %952 }
 0x3ed   : > { %714 = vperm.xlu0 %932, %v953_v22   ;;  %700 = vperm.xlu1 %931, %v953_v22  }
 0x3f5   : > { %933 = vset.pattern.permute.xlu1 %v985_v3  ;;  %935 = vset.pattern.permute.xlu0 %v986_v4 }
 0x3f6   : > { %728 = vperm.xlu1 %933, %v953_v22  }
 0x3f8   : > { %v597_v27 = vpop.permute.xlu0 %596 }
 0x3f9   : > { %v599_v28 = vadd.f32 %v597_v27, %v572_v26 }
 0x3fb   : > { %601 = vst.msk [vmem:[#allocation4] sm:$0xff] %vm600_vm14, %v599_v28 }
 0x3fe   : > { %934 = vset.pattern.permute.xlu1 %v986_v4 }
 0x3ff   : > { %742 = vperm.xlu1 %934, %v953_v22  }
 0x402   : > { %v653_v30 = vld [vmem:[#allocation4] sm:$0xff]  ;;  %v684_v32 = vpop.permute.xlu2 %683 }
 0x403   : > { %v659_v31 = vmul.f32 %v657_v29, %v653_v30 }
 0x405   : > { %v686_v33 = vadd.f32 %v684_v32, %v659_v31 }
 0x407   : > { %688 = vst.msk [vmem:[#allocation4] sm:$0xff] %vm687_vm15, %v686_v33 }
 0x40e   : > { %v710_v3 = vld [vmem:[#allocation4] sm:$0xff] }
 0x45f   : > { %v715_v34 = vpop.permute.xlu0 %714  ;;  %v701_v35 = vpop.permute.xlu1 %700 }
 0x460   : > { %v717_v36 = vmul.f32 %v715_v34, %v710_v3  ;;  %v703_v37 = vmul.f32 %v710_v3, %v701_v35 }
 0x462   : > { %v718_v38 = vpack.c.bf16 %v717_v36, %v717_v36  ;;  %v704_v4 = vpack.c.bf16 %v703_v37, %v703_v37 }
 0x464   : > { %706 = vst.msk [vmem:[%s311_s14] sm:$0xf] %vm705_vm0, %v704_v4 }
 0x465   : > { %720 = vst.msk [vmem:[%s311_s14] sm:$0xf] %vm719_vm1, %v718_v38 }
 0x468   : > { %v729_v24 = vpop.permute.xlu1 %728 }
 0x469   : > { %v731_v39 = vmul.f32 %v729_v24, %v710_v3 }
 0x46b   : > { %v732_v40 = vpack.c.bf16 %v731_v39, %v731_v39 }
 0x46d   : > { %734 = vst.msk [vmem:[%s311_s14] sm:$0xf] %vm733_vm2, %v732_v40 }
 0x471   : > { %v743_v41 = vpop.permute.xlu1 %742 }
 0x472   : > { %v745_v42 = vmul.f32 %v743_v41, %v710_v3 }
 0x474   : > { %v746_v43 = vpack.c.bf16 %v745_v42, %v745_v42 }
 0x476   : > { %748 = vst.msk [vmem:[%s311_s14] sm:$0xf] %vm747_vm3, %v746_v43 }
 0x477 PF: > { %s14_s17 = sadd.s32 1, %s976_s17   ;;  %s1192_s15 = smov %s972_s16 }
 0x478   : > { %p11_p5 = scmp.ge.s32.totalorder %s14_s17, 4   ;;  %s1193_s16 = smov %s1195_s18 }
 0x47a   :  { %13 = sbr.rel (!%p11_p5) target bundleno = 2 (0x2), region = 83 }

// kernel: transformer_forward.30
= control target key start
LH: loop header
LB: loop body
LE: loop exit
PB: predicated region body
PF: predicated region fallthrough
CT: control target
= control target key end

     0   :  { %s1003_s15 = smov 0   ;;  %s1005_s16 = smov 0   ;;  %s1173_s0 = inlined_call_operand.vmem [shape: f32[2,1,8], index: 0, kind: input, shape index: {}]   ;;  %s1174_s1 = inlined_call_operand.vmem [shape: bf16[2,8,32], index: 1, kind: input, shape index: {}]   ;;  %s1175_s2 = inlined_call_operand.vmem [shape: bf16[2,8,32], index: 2, kind: input, shape index: {}]   ;;  %s1176_s3 = inlined_call_operand.vmem [shape: bf16[2,8,32], index: 3, kind: input, shape index: {}]   ;;  %s1177_s4 = inlined_call_operand.vmem [shape: bf16[2,8,32], index: 4, kind: output, shape index: {}]  }
   0x1   :  { %s1007_s17 = smov 0  }
   0x2 LB: > { %s33_s18 = sadd.s32 1, %s960_s16  ;;  %p860_p0 = scmp.ge.s32.totalorder %s964_s17, 1  ;;  %s964_s17 = sphi %s1007_s17, %s14_s17   ;;  %s960_s16 = sphi %s1005_s16, %s1181_s16   ;;  %s956_s15 = sphi %s1003_s15, %s1180_s15  }
   0x3   : > { %p35_p1 = scmp.ge.s32.totalorder %s33_s18, 2  ;;  %p228_p2 = scmp.lt.s32.totalorder %s964_s17, 3 }
   0x5   : > { %s1183_s18 = smov (%p35_p1, %s33_s18), 0  ;;  %p229_p3 = pnand %p860_p0, %p228_p2 }
   0x6   : > { %p278_p4 = scmp.lt.s32.totalorder (!%p229_p3), %s956_s15, 1  ;;  %s967_s26 = smov (!%p229_p3), 120  }
   0x7   : > { %232 = sbr.rel (%p229_p3) target bundleno = 1143 (0x477), region = 36  ;;  %s968_s27 = smov (!%p229_p3), 104  }
   0x8   : > { %s970_s5 = smov (!%p229_p3), 112   ;;  %s975_s9 = smov (!%p229_p3), 8  }
   0x9   : > { %s976_s10 = smov (!%p229_p3), 16   ;;  %s977_s11 = smov (!%p229_p3), 24  }
   0xc   : > { %v966_v0 = vmov 0   ;;  %s1185_s15 = smov (!%p278_p4, %s956_s15), 1  ;;  %vm327_vm0 = vcmask 64512   ;;  %vm317_vm1 = vcmask 31744   ;;  %v969_v8 = vmov -1e+30  }
   0xd   : > { %911 = vset.pattern.permute.xlu0 %v966_v0  ;;  %s1022_s19 = sshll.u32 %s1185_s15, 2  ;;  %318 = vst.msk [vmem:[#allocation2] sm:$0xff] %vm317_vm1, %v969_v8  ;;  %s283_s30 = scalar_lea.vmem %s1173_s0, %s1185_s15  ;;  %v971_v21 = vmov 0.0   ;;  %vm375_vm4 = vcmask 7168   ;;  %vm388_vm5 = vcmask 1043456   ;;  %vm462_vm6 = vcmask 15368  }
   0xe   : > { %s297_s22 = scalar_lea.vmem %s1175_s2, %s1022_s19  ;;  %s290_s25 = scalar_lea.vmem %s1174_s1, %s1022_s19  ;;  %v325_v11 = vld [vmem:[%s283_s30] sm:$0x1]  ;;  %319 = vst.msk [vmem:[#allocation3] sm:$0xff] %vm317_vm1, %v971_v21  ;;  %v972_v52 = vmov 1   ;;  %v973_v63 = vmov 2   ;;  %vm552_vm7 = vcmask 23568  }
   0xf   : > { %v323_v1 = vld [vmem:[%s297_s22] sm:$0xf]  ;;  %vm326_vm2 = vcmp.gt.f32.partialorder %v325_v11, 0.0  ;;  %s304_s8 = scalar_lea.vmem %s1176_s3, %s1022_s19  ;;  %912 = vset.pattern.permute.xlu2 %v972_v52  ;;  %vm639_vm8 = vcmask 31768   ;;  %vm320_vm9 = vcmask 261120   ;;  %vm501_vm10 = vcmask 130112   ;;  %s311_s14 = scalar_lea.vmem %s1177_s4, %s1022_s19 }
  0x10   : > { %v332_v2 = vsel %vm327_vm0, %v323_v1, 0  ;;  %v414_v3 = vunpack.c.l.b16 %v323_v1  ;;  %v322_v4 = vld [vmem:[%s290_s25] sm:$0xf]  ;;  %v348_v12 = vsel %vm326_vm2, 1, %v966_v0  ;;  %v974_v1 = vmov 3   ;;  %321 = vst.msk [vmem:[#allocation4] sm:$0xff] %vm320_vm9, %v971_v21 }
  0x11   : > { %341 = vmatpush.bf16.xpose.msra.mxu0 %v332_v2  ;;  %v409_v6 = vunpack.c.l.b16 %v322_v4  ;;  %v349_v14 = vperm.slane %v348_v12, 0  ;;  %v324_v31 = vld [vmem:[%s304_s8] sm:$0xf]  ;;  %914 = vset.pattern.permute.xlu1 %v974_v1  ;;  %vm588_vm12 = vcmask 195712   ;;  %vm675_vm13 = vcmask 261312  }
  0x12   : > { %v415_v5 = vpack.c.b16 %v414_v3, %v414_v3  ;;  %v390_v32 = vsel %vm388_vm5, %v324_v31, 0  ;;  %v473_v33 = vunpack.c.l.b16 %v324_v31  ;;  %vm693_vm14 = vcmask 60416  }
  0x13   : > { %v410_v7 = vpack.c.b16 %v409_v6, %v409_v6  ;;  %vm1044_vm3 = vcmp.eq.s32.totalorder %v349_v14, 1  ;;  %399 = vmatpush.bf16.msra.mxu1 %v390_v32  ;;  %vm707_vm15 = vcmask 126016   ;;  %vm735_vm1 = vcmask 257216  }
  0x14   : > { %416 = vrot.lane.b32.xlu1 %v415_v5, %s967_s26  ;;  %506 = vrot.lane.b32.xlu2 %v415_v5, %s970_s5  ;;  %v1056_v22 = vld [vmem:[#allocation2] sm:$0xff]  ;;  %v1078_v36 = vpack.c.b16 %v473_v33, %v473_v33 }
  0x18   : > { %865 = vmatmul.msk.bf16.vlgmr.msra.gmra.mxu0 %vm327_vm0, %v322_v4 }
  0x1c   : > { %411 = vrot.lane.b32.xlu1 %v410_v7, %s967_s26  ;;  %504 = vrot.lane.b32.xlu2 %v410_v7, %s970_s5 }
  0x24   : > { %593 = vrot.lane.b32.xlu1 %v415_v5, %s968_s27  ;;  %591 = vrot.lane.b32.xlu2 %v410_v7, %s968_s27 }
  0x6e   : > { %v507_v34 = vpop.permute.xlu2 %506 }
  0x6f   : > { %v512_v35 = vsel %vm327_vm0, %v507_v34, 0 }
  0x70   : > { %521 = vmatpush.bf16.xpose.msrb.mxu1 %v512_v35 }
  0x76   : > { %v505_v37 = vpop.permute.xlu2 %504 }
  0x7e   : > { %v592_v43 = vpop.permute.xlu2 %591 }
  0x86   : > { %v417_v9 = vpop.permute.xlu1 %416 }
  0x87   : > { %v422_v10 = vsel %vm327_vm0, %v417_v9, 0 }
  0x88   : > { %431 = vmatpush.bf16.xpose.msra.mxu2 %v422_v10 }
  0x8e   : > { %v412_v13 = vpop.permute.xlu1 %411 }
  0x8f   : > { %867 = vmatmul.msk.bf16.vlgmr.msra.gmra.mxu2 %vm327_vm0, %v412_v13 }
  0x95   : > { %v343_v16 = vpop.f32.mrf.mxu0 }
  0x96   : > { %v347_v17 = vmul.f32 0.35355338, %v343_v16  ;;  %v594_v38 = vpop.permute.xlu1 %593 }
  0x97   : > { %v599_v39 = vsel %vm327_vm0, %v594_v38, 0 }
  0x98   : > { %v351_v18 = vsel %vm1044_vm3, %v347_v17, -1e+30  ;;  %608 = vmatpush.bf16.xpose.msrb.mxu0 %v599_v39 }
  0x99   : > { %v353_v19 = vsel %vm327_vm0, %v351_v18, -inf }
  0x9a   : > { %354 = vmax.xlane.f32.xlu0 %v353_v19 }
  0x9d   : > { %v345_v20 = vpop.f32.mrf.mxu0 }
  0x9f   : > { %871 = vmatmul.msk.bf16.vlgmr.msrb.gmra.mxu0 %vm327_vm0, %v592_v43 }
 0x10d   : > { %v355_v23 = vpop.xlane.xlu0 %354 }
 0x10e   : > { %v1059_v24 = vmax.f32 %v1056_v22, %v355_v23 }
 0x110   : > { %v366_v25 = vsub.f32 %v1056_v22, %v1059_v24  ;;  %407 = vst.msk [vmem:[#allocation2] sm:$0xff] %vm375_vm4, %v1059_v24  ;;  %359 = vperm.xlu0 %911, %v1059_v24  }
 0x112   : > { %v433_v26 = vpop.f32.mrf.mxu2  ;;  %v367_v8 = vmul.f32 1.442695, %v366_v25 }
 0x113   : > { %v437_v27 = vmul.f32 0.35355338, %v433_v26 }
 0x115   : > { %v1068_v28 = vsel %vm1044_vm3, %v437_v27, -1e+30 }
 0x116   : > { %v440_v29 = vsel %vm327_vm0, %v1068_v28, -inf }
 0x117   : > { %441 = vmax.xlane.f32.xlu1 %v440_v29  ;;  %v439_v45 = vld [vmem:[#allocation2] sm:$0xff] }
 0x118   : > { %920 = vset.pattern.permute.xlu0 %v972_v52 }
 0x11a   : > { %v435_v30 = vpop.f32.mrf.mxu2 }
 0x11c   : > { %v610_v50 = vpop.f32.mrf.mxu0 }
 0x11d   : > { %v614_v51 = vmul.f32 0.35355338, %v610_v50 }
 0x11f   : > { %v1095_v53 = vsel %vm1044_vm3, %v614_v51, -1e+30 }
 0x120   : > { %v617_v54 = vsel %vm327_vm0, %v1095_v53, -inf }
 0x124   : > { %v612_v56 = vpop.f32.mrf.mxu0 }
 0x130   : > { %475 = vrot.lane.b32.xlu1 %v1078_v36, %s967_s26 }
 0x13a   : > { %618 = vmax.xlane.f32.xlu0 %v617_v54 }
 0x14e   : > { %562 = vrot.lane.b32.xlu0 %v1078_v36, %s970_s5 }
 0x182   : > { %v360_v40 = vpop.permute.xlu0 %359 }
 0x183   : > { %v362_v41 = vsub.f32 %v351_v18, %v360_v40  ;;  %v377_v40 = vld [vmem:[#allocation4] sm:$0xff] }
 0x185   : > { %v363_v42 = vmul.f32 1.442695, %v362_v41 }
 0x187   : > { %924 = vpow2.f32 %v363_v42 }
 0x188   : > { %926 = vpow2.f32 %v367_v8 }
 0x18a   : > { %v442_v44 = vpop.xlane.xlu1 %441 }
 0x18b   : > { %v443_v46 = vmax.f32 %v439_v45, %v442_v44 }
 0x18d   : > { %v925_v47 = vpop.eup %924  ;;  %503 = vst.msk [vmem:[#allocation2] sm:$0xff] %vm462_vm6, %v443_v46  ;;  %v453_v16 = vsub.f32 %v439_v45, %v443_v46 }
 0x18e   : > { %v1087_v48 = vsel %vm1044_vm3, %v925_v47, 0.0  ;;  %v927_v19 = vpop.eup %926 }
 0x18f   : > { %v384_v49 = vpack.c.bf16 %v1087_v48, %v1087_v48  ;;  %v454_v18 = vmul.f32 1.442695, %v453_v16  ;;  %v371_v26 = vsel %vm327_vm0, %v1087_v48, 0.0 }
 0x191   : > { %866 = vmatmul.msk.bf16.vlgmr.msra.gmra.mxu1 %vm327_vm0, %v384_v49 }
 0x194   : > { %v529_v5 = vld [vmem:[#allocation2] sm:$0xff] }
 0x1a1   : > { %869 = vmatmul.msk.bf16.vlgmr.msrb.gmra.mxu1 %vm327_vm0, %v505_v37 }
 0x1a2   : > { %v476_v2 = vpop.permute.xlu1 %475 }
 0x1a3   : > { %v481_v3 = vsel %vm388_vm5, %v476_v2, 0 }
 0x1a4   : > { %490 = vmatpush.bf16.msra.mxu3 %v481_v3 }
 0x1ad   : > { %v619_v10 = vpop.xlane.xlu0 %618 }
 0x20e   : > { %v1099_v55 = vpop.f32.mrf.mxu1 }
 0x216   : > { %v403_v57 = vpop.f32.mrf.mxu1 }
 0x21e   : > { %v523_v58 = vpop.f32.mrf.mxu1 }
 0x21f   : > { %v527_v59 = vmul.f32 0.35355338, %v523_v58 }
 0x221   : > { %v1105_v60 = vsel %vm1044_vm3, %v527_v59, -1e+30 }
 0x222   : > { %v530_v61 = vsel %vm327_vm0, %v1105_v60, -inf }
 0x223   : > { %531 = vmax.xlane.f32.xlu2 %v530_v61 }
 0x226   : > { %v525_v62 = vpop.f32.mrf.mxu1 }
 0x23b   : > { %446 = vperm.xlu2 %912, %v443_v46  }
 0x243   : > { %913 = vset.pattern.permute.xlu2 %v973_v63 }
 0x296   : > { %v532_v4 = vpop.xlane.xlu2 %531 }
 0x297   : > { %v533_v6 = vmax.f32 %v529_v5, %v532_v4 }
 0x299   : > { %v543_v7 = vsub.f32 %v529_v5, %v533_v6  ;;  %590 = vst.msk [vmem:[#allocation2] sm:$0xff] %vm552_vm7, %v533_v6  ;;  %536 = vperm.xlu2 %913, %v533_v6  }
 0x29b   : > { %v544_v27 = vmul.f32 1.442695, %v543_v7 }
 0x29e   : > { %v447_v9 = vpop.permute.xlu2 %446 }
 0x29f   : > { %v449_v11 = vsub.f32 %v1068_v28, %v447_v9  ;;  %v563_v28 = vpop.permute.xlu0 %562 }
 0x2a0   : > { %v616_v12 = vld [vmem:[#allocation2] sm:$0xff]  ;;  %v568_v29 = vsel %vm388_vm5, %v563_v28, 0 }
 0x2a1   : > { %v450_v13 = vmul.f32 1.442695, %v449_v11  ;;  %v620_v14 = vmax.f32 %v616_v12, %v619_v10  ;;  %649 = vrot.lane.b32.xlu2 %v1078_v36, %s968_s27  ;;  %577 = vmatpush.bf16.msrb.mxu3 %v568_v29 }
 0x2a2   : > { %915 = vset.pattern.permute.xlu2 %v966_v0 }
 0x2a3   : > { %928 = vpow2.f32 %v450_v13  ;;  %v630_v17 = vsub.f32 %v616_v12, %v620_v14  ;;  %677 = vst.msk [vmem:[#allocation2] sm:$0xff] %vm639_vm8, %v620_v14  ;;  %623 = vperm.xlu1 %914, %v620_v14  }
 0x2a4   : > { %930 = vpow2.f32 %v454_v18 }
 0x2a5   : > { %932 = vpow2.f32 %v544_v27  ;;  %v631_v30 = vmul.f32 1.442695, %v630_v17 }
 0x2a7   : > { %934 = vpow2.f32 %v631_v30 }
 0x2a9   : > { %v929_v20 = vpop.eup %928  ;;  %380 = vperm.xlu2 %915, %v927_v19  }
 0x2aa   : > { %v452_v22 = vsel %vm1044_vm3, %v929_v20, 0.0  ;;  %v931_v25 = vpop.eup %930 }
 0x2ab   : > { %v458_v23 = vsel %vm327_vm0, %v452_v22, 0.0  ;;  %v471_v24 = vpack.c.bf16 %v452_v22, %v452_v22  ;;  %917 = vset.pattern.permute.xlu1 %v973_v63  ;;  %v1130_v31 = vpop.eup %932 }
 0x2ac   : > { %459 = vadd.xlane.f32.xlu0 %v458_v23 }
 0x2ad   : > { %868 = vmatmul.msk.bf16.vlgmr.msra.gmra.mxu3 %vm327_vm0, %v471_v24  ;;  %v1133_v32 = vpop.eup %934 }
 0x2b1   : > { %916 = vset.pattern.permute.xlu2 %v972_v52  ;;  %v369_v52 = vld [vmem:[#allocation3] sm:$0xff] }
 0x2b2   : > { %467 = vperm.xlu2 %916, %v931_v25   ;;  %v370_v54 = vmul.f32 %v927_v19, %v369_v52 }
 0x2cd   : > { %372 = vadd.xlane.f32.xlu1 %v371_v26 }
 0x2e6   : > { %557 = vperm.xlu1 %917, %v1130_v31  }
 0x2ee   : > { %918 = vset.pattern.permute.xlu1 %v974_v1 }
 0x2ef   : > { %644 = vperm.xlu1 %918, %v1133_v32  }
 0x2f3   : > { %v537_v33 = vpop.permute.xlu2 %536 }
 0x2f4   : > { %v539_v34 = vsub.f32 %v1105_v60, %v537_v33 }
 0x2f6   : > { %v540_v35 = vmul.f32 1.442695, %v539_v34 }
 0x2f7   : > { %919 = vset.pattern.permute.xlu1 %v966_v0 }
 0x2f8   : > { %936 = vpow2.f32 %v540_v35 }
 0x2fb   : > { %v650_v21 = vpop.permute.xlu2 %649 }
 0x2fc   : > { %v655_v38 = vsel %vm388_vm5, %v650_v21, 0 }
 0x2fd   : > { %664 = vmatpush.bf16.msrb.mxu2 %v655_v38 }
 0x2fe   : > { %v937_v36 = vpop.eup %936 }
 0x2ff   : > { %v542_v37 = vsel %vm1044_vm3, %v937_v36, 0.0 }
 0x300   : > { %v561_v39 = vpack.c.bf16 %v542_v37, %v542_v37  ;;  %v548_v59 = vsel %vm327_vm0, %v542_v37, 0.0 }
 0x302   : > { %870 = vmatmul.msk.bf16.vlgmr.msrb.gmra.mxu3 %vm327_vm0, %v561_v39 }
 0x303   : > { %v381_v41 = vpop.permute.xlu2 %380 }
 0x304   : > { %v383_v42 = vmul.f32 %v381_v41, %v377_v40 }
 0x306   : > { %v405_v43 = vadd.f32 %v1099_v55, %v383_v42 }
 0x308   : > { %406 = vst.msk [vmem:[#allocation4] sm:$0xff] %vm327_vm0, %v405_v43 }
 0x30c   : > { %v468_v60 = vpop.permute.xlu2 %467 }
 0x30f   : > { %v464_v62 = vld [vmem:[#allocation4] sm:$0xff] }
 0x310   : > { %v470_v2 = vmul.f32 %v468_v60, %v464_v62 }
 0x315   : > { %v624_v0 = vpop.permute.xlu1 %623 }
 0x316   : > { %v626_v44 = vsub.f32 %v1095_v53, %v624_v0 }
 0x318   : > { %v627_v45 = vmul.f32 1.442695, %v626_v44 }
 0x31a   : > { %938 = vpow2.f32 %v627_v45 }
 0x31f   : > { %v460_v15 = vpop.xlane.xlu0 %459 }
 0x320   : > { %v939_v46 = vpop.eup %938 }
 0x321   : > { %v629_v47 = vsel %vm1044_vm3, %v939_v46, 0.0 }
 0x322   : > { %v635_v48 = vsel %vm327_vm0, %v629_v47, 0.0  ;;  %v648_v49 = vpack.c.bf16 %v629_v47, %v629_v47 }
 0x323   : > { %636 = vadd.xlane.f32.xlu0 %v635_v48 }
 0x324   : > { %872 = vmatmul.msk.bf16.vlgmr.msrb.gmra.mxu2 %vm327_vm0, %v648_v49  ;;  %vm721_vm0 = vcmask 191616  }
 0x330   : > { %v492_v50 = vpop.f32.mrf.mxu3 }
 0x331   : > { %497 = vrot.lane.b32.xlu2 %v492_v50, %s975_s9 }
 0x338   : > { %v494_v51 = vpop.f32.mrf.mxu3 }
 0x340   : > { %v373_v55 = vpop.xlane.xlu1 %372 }
 0x341   : > { %v374_v53 = vadd.f32 %v373_v55, %v370_v54 }
 0x343   : > { %376 = vst.msk [vmem:[#allocation3] sm:$0xff] %vm375_vm4, %v374_v53 }
 0x34a   : > { %v456_v56 = vld [vmem:[#allocation3] sm:$0xff] }
 0x34b   : > { %v457_v57 = vmul.f32 %v931_v25, %v456_v56 }
 0x34d   : > { %v461_v58 = vadd.f32 %v460_v15, %v457_v57 }
 0x34f   : > { %463 = vst.msk [vmem:[#allocation3] sm:$0xff] %vm462_vm6, %v461_v58 }
 0x356   : > { %v546_v8 = vld [vmem:[#allocation3] sm:$0xff] }
 0x357   : > { %v547_v9 = vmul.f32 %v1130_v31, %v546_v8 }
 0x358   : > { %v558_v22 = vpop.permute.xlu1 %557 }
 0x35a   : > { %549 = vadd.xlane.f32.xlu2 %v548_v59 }
 0x361   : > { %v645_v26 = vpop.permute.xlu1 %644 }
 0x385   : > { %v579_v61 = vpop.f32.mrf.mxu3 }
 0x386   : > { %584 = vrot.lane.b32.xlu0 %v579_v61, %s976_s10 }
 0x38b   : > { %v498_v3 = vpop.permute.xlu2 %497 }
 0x38c   : > { %v500_v4 = vadd.f32 %v498_v3, %v470_v2 }
 0x38d   : > { %v581_v5 = vpop.f32.mrf.mxu3 }
 0x38e   : > { %502 = vst.msk [vmem:[#allocation4] sm:$0xff] %vm501_vm10, %v500_v4 }
 0x395   : > { %v554_v20 = vld [vmem:[#allocation4] sm:$0xff] }
 0x396   : > { %v637_v14 = vpop.xlane.xlu0 %636  ;;  %v560_v23 = vmul.f32 %v558_v22, %v554_v20 }
 0x3a7   : > { %v666_v6 = vpop.f32.mrf.mxu2 }
 0x3a8   : > { %671 = vrot.lane.b32.xlu2 %v666_v6, %s977_s11 }
 0x3af   : > { %v668_v7 = vpop.f32.mrf.mxu2 }
 0x3cd   : > { %v550_v10 = vpop.xlane.xlu2 %549 }
 0x3ce   : > { %v551_v11 = vadd.f32 %v550_v10, %v547_v9 }
 0x3d0   : > { %553 = vst.msk [vmem:[#allocation3] sm:$0xff] %vm552_vm7, %v551_v11 }
 0x3d7   : > { %v633_v12 = vld [vmem:[#allocation3] sm:$0xff] }
 0x3d8   : > { %v634_v13 = vmul.f32 %v1133_v32, %v633_v12 }
 0x3da   : > { %v638_v16 = vadd.f32 %v637_v14, %v634_v13 }
 0x3dc   : > { %640 = vst.msk [vmem:[#allocation3] sm:$0xff] %vm639_vm8, %v638_v16 }
 0x3e3   : > { %v695_v17 = vld [vmem:[#allocation3] sm:$0xff] }
 0x3e4   : > { %vm696_vm11 = vcmp.le.f32.partialorder %v695_v17, 0.0 }
 0x3e5   : > { %v697_v18 = vsel %vm696_vm11, 1.0, %v695_v17 }
 0x3e6   : > { %940 = vrcp.f32 %v697_v18 }
 0x3ec   : > { %v941_v19 = vpop.eup %940 }
 0x3ed   : > { %702 = vperm.xlu0 %920, %v941_v19   ;;  %688 = vperm.xlu1 %919, %v941_v19  }
 0x3f5   : > { %921 = vset.pattern.permute.xlu1 %v973_v63  ;;  %923 = vset.pattern.permute.xlu0 %v974_v1 }
 0x3f6   : > { %716 = vperm.xlu1 %921, %v941_v19  }
 0x3f8   : > { %v585_v24 = vpop.permute.xlu0 %584 }
 0x3f9   : > { %v587_v25 = vadd.f32 %v585_v24, %v560_v23 }
 0x3fb   : > { %589 = vst.msk [vmem:[#allocation4] sm:$0xff] %vm588_vm12, %v587_v25 }
 0x3fe   : > { %922 = vset.pattern.permute.xlu1 %v974_v1 }
 0x3ff   : > { %730 = vperm.xlu1 %922, %v941_v19  }
 0x402   : > { %v641_v27 = vld [vmem:[#allocation4] sm:$0xff]  ;;  %v672_v29 = vpop.permute.xlu2 %671 }
 0x403   : > { %v647_v28 = vmul.f32 %v645_v26, %v641_v27 }
 0x405   : > { %v674_v30 = vadd.f32 %v672_v29, %v647_v28 }
 0x407   : > { %676 = vst.msk [vmem:[#allocation4] sm:$0xff] %vm675_vm13, %v674_v30 }
 0x40e   : > { %v698_v63 = vld [vmem:[#allocation4] sm:$0xff] }
 0x45f   : > { %v703_v31 = vpop.permute.xlu0 %702  ;;  %v689_v32 = vpop.permute.xlu1 %688 }
 0x460   : > { %v705_v33 = vmul.f32 %v703_v31, %v698_v63  ;;  %v691_v34 = vmul.f32 %v698_v63, %v689_v32 }
 0x462   : > { %v706_v35 = vpack.c.bf16 %v705_v33, %v705_v33  ;;  %v692_v1 = vpack.c.bf16 %v691_v34, %v691_v34 }
 0x464   : > { %694 = vst.msk [vmem:[%s311_s14] sm:$0xf] %vm693_vm14, %v692_v1 }
 0x465   : > { %708 = vst.msk [vmem:[%s311_s14] sm:$0xf] %vm707_vm15, %v706_v35 }
 0x468   : > { %v717_v21 = vpop.permute.xlu1 %716 }
 0x469   : > { %v719_v36 = vmul.f32 %v717_v21, %v698_v63 }
 0x46b   : > { %v720_v37 = vpack.c.bf16 %v719_v36, %v719_v36 }
 0x46d   : > { %722 = vst.msk [vmem:[%s311_s14] sm:$0xf] %vm721_vm0, %v720_v37 }
 0x471   : > { %v731_v38 = vpop.permute.xlu1 %730 }
 0x472   : > { %v733_v39 = vmul.f32 %v731_v38, %v698_v63 }
 0x474   : > { %v734_v40 = vpack.c.bf16 %v733_v39, %v733_v39 }
 0x476   : > { %736 = vst.msk [vmem:[%s311_s14] sm:$0xf] %vm735_vm1, %v734_v40 }
 0x477 PF: > { %s14_s17 = sadd.s32 1, %s964_s17   ;;  %s1180_s15 = smov %s960_s16 }
 0x478   : > { %p11_p5 = scmp.ge.s32.totalorder %s14_s17, 4   ;;  %s1181_s16 = smov %s1183_s18 }
 0x47a   :  { %13 = sbr.rel (!%p11_p5) target bundleno = 2 (0x2), region = 83 }

// kernel: transformer_forward.32
= control target key start
LH: loop header
LB: loop body
LE: loop exit
PB: predicated region body
PF: predicated region fallthrough
CT: control target
= control target key end

     0   :  { %8 = vsyncpa [#allocation4], 0  ;;  %s230_s15 = smov [#allocation3]   ;;  %s231_s17 = smov 64   ;;  %s265_s0 = inlined_call_operand.vmem [shape: bf16[16,128], index: 0, kind: input, shape index: {}]   ;;  %s266_s1 = inlined_call_operand.hbm [shape: bf16[128,128], index: 1, kind: input, shape index: {}]   ;;  %s267_s2 = inlined_call_operand.vmem [shape: f32[1,128], index: 2, kind: input, shape index: {}]   ;;  %s268_s3 = inlined_call_operand.vmem [shape: bf16[16,128], index: 3, kind: output, shape index: {}]  }
   0x1   :  { %s15_s14 = sshll.u32 %s266_s1, 4  ;;  %s17_s16 = sshll.u32 %s230_s15, 4  ;;  %s16_s14 = int_to_ptr.hbm [resolvable:$true] %s15_s14  ;;  %s18_s16 = int_to_ptr.vmem [resolvable:$true] %s17_s16 }
   0x2   :  { %s232_s18 = smov 4  }
   0x3   :  { %23 = dma.hbm_to_vmem [thread:$0]  %s16_s14, 1024, %s18_s16, [#allocation4], %s231_s17, %s231_s17, %s232_s18  }
   0x4   :  { %228 = dma.done.wait [#allocation4], 1024  }
   0x5   :  { %229 = vsyncadd [#allocation4], 4294966272  ;;  %v194_v0 = vld [vmem:[#allocation3 + $0x38] sm:$0xff]  ;;  %v193_v1 = vld [vmem:[#allocation3 + $0x30] sm:$0xff] }
   0x6   :  { %110 = vmatpush.bf16.msra.mxu0 %v194_v0  ;;  %v192_v2 = vld [vmem:[#allocation3 + $0x28] sm:$0xff]  ;;  %v191_v3 = vld [vmem:[#allocation3 + $0x20] sm:$0xff]  ;;  %v190_v4 = vld [vmem:[#allocation3 + $0x18] sm:$0xff] }
   0x7   :  { %v189_v5 = vld [vmem:[#allocation3 + $0x10] sm:$0xff]  ;;  %v188_v6 = vld [vmem:[#allocation3 + $0x8] sm:$0xff]  ;;  %v187_v7 = vld [vmem:[#allocation3] sm:$0xff] }
   0x8   :  { %v186_v8 = vld [vmem:[%s265_s0] sm:$0xff] }
   0x9   :  { %v203_v10 = vld [vmem:[%s267_s2] ss:$0 sm:$0xff] }
   0xa   :  { %111 = vmatpush.bf16.msra.mxu0 %v193_v1 }
   0xe   :  { %112 = vmatpush.bf16.msra.mxu0 %v192_v2 }
  0x12   :  { %113 = vmatpush.bf16.msra.mxu0 %v191_v3 }
  0x16   :  { %114 = vmatpush.bf16.msra.mxu0 %v190_v4 }
  0x1a   :  { %115 = vmatpush.bf16.msra.mxu0 %v189_v5 }
  0x1e   :  { %116 = vmatpush.bf16.msra.mxu0 %v188_v6 }
  0x22   :  { %117 = vmatpush.bf16.msra.mxu0 %v187_v7 }
  0x25   :  { %118 = vmatmul.bf16.vlgmr.msra.gmra.mxu0 %v186_v8 }
  0xa2   :  { %v119_v9 = vpop.f32.mrf.mxu0 }
  0xa3   :  { %v137_v11 = vadd.f32 %v203_v10, %v119_v9 }
  0xa5   :  { %v139_v14 = vmax.f32 %v137_v11, 0.0 }
  0xaa   :  { %v121_v12 = vpop.f32.mrf.mxu0 }
  0xab   :  { %v138_v13 = vadd.f32 %v203_v10, %v121_v12 }
  0xad   :  { %v140_v15 = vmax.f32 %v138_v13, 0.0 }
  0xaf   :  { %v198_v16 = vpack.c.bf16 %v140_v15, %v139_v14 }
  0xb1   :  { %199 = vst [vmem:[%s268_s3] sm:$0xff] %v198_v16  }
  0xb2   :  { %149 = vsyncpa [#allocation4], 1 }

// kernel: transformer_forward.34
= control target key start
LH: loop header
LB: loop body
LE: loop exit
PB: predicated region body
PF: predicated region fallthrough
CT: control target
= control target key end

     0   :  { %s235_s1 = inlined_call_operand.vmem [shape: bf16[128,128], index: 1, kind: input, shape index: {}]   ;;  %s236_s2 = inlined_call_operand.vmem [shape: f32[1,128], index: 2, kind: input, shape index: {}]   ;;  %s237_s0 = inlined_call_operand.vmem [shape: bf16[16,128], index: 0, kind: input, shape index: {}]   ;;  %s238_s3 = inlined_call_operand.vmem [shape: bf16[16,128], index: 3, kind: output, shape index: {}]  }
   0x1   :  { %v175_v0 = vld [vmem:[%s235_s1 + $0x38] sm:$0xff]  ;;  %v174_v1 = vld [vmem:[%s235_s1 + $0x30] sm:$0xff]  ;;  %v173_v2 = vld [vmem:[%s235_s1 + $0x28] sm:$0xff] }
   0x2   :  { %94 = vmatpush.bf16.msra.mxu0 %v175_v0  ;;  %v172_v3 = vld [vmem:[%s235_s1 + $0x20] sm:$0xff]  ;;  %v171_v4 = vld [vmem:[%s235_s1 + $0x18] sm:$0xff]  ;;  %v170_v5 = vld [vmem:[%s235_s1 + $0x10] sm:$0xff] }
   0x3   :  { %v169_v6 = vld [vmem:[%s235_s1 + $0x8] sm:$0xff]  ;;  %v168_v7 = vld [vmem:[%s235_s1] sm:$0xff] }
   0x4   :  { %v167_v8 = vld [vmem:[%s237_s0] sm:$0xff] }
   0x5   :  { %v181_v10 = vld [vmem:[%s236_s2] ss:$0 sm:$0xff] }
   0x6   :  { %95 = vmatpush.bf16.msra.mxu0 %v174_v1 }
   0xa   :  { %96 = vmatpush.bf16.msra.mxu0 %v173_v2 }
   0xe   :  { %97 = vmatpush.bf16.msra.mxu0 %v172_v3 }
  0x12   :  { %98 = vmatpush.bf16.msra.mxu0 %v171_v4 }
  0x16   :  { %99 = vmatpush.bf16.msra.mxu0 %v170_v5 }
  0x1a   :  { %100 = vmatpush.bf16.msra.mxu0 %v169_v6 }
  0x1e   :  { %101 = vmatpush.bf16.msra.mxu0 %v168_v7 }
  0x21   :  { %102 = vmatmul.bf16.vlgmr.msra.gmra.mxu0 %v167_v8 }
  0x9e   :  { %v103_v9 = vpop.f32.mrf.mxu0 }
  0x9f   :  { %v121_v12 = vadd.f32 %v181_v10, %v103_v9 }
  0xa6   :  { %v105_v11 = vpop.f32.mrf.mxu0 }
  0xa7   :  { %v122_v13 = vadd.f32 %v181_v10, %v105_v11 }
  0xa9   :  { %v179_v14 = vpack.c.bf16 %v122_v13, %v121_v12 }
  0xab   :  { %180 = vst [vmem:[%s238_s3] sm:$0xff] %v179_v14  }

// kernel: transformer_forward.36
= control target key start
LH: loop header
LB: loop body
LE: loop exit
PB: predicated region body
PF: predicated region fallthrough
CT: control target
= control target key end

     0   :  { %v138_v9 = vlaneseq  ;;  %s347_s1 = inlined_call_operand.vmem [shape: bf16[128,128], index: 1, kind: input, shape index: {}]   ;;  %s348_s2 = inlined_call_operand.vmem [shape: f32[1,128], index: 2, kind: input, shape index: {}]   ;;  %s349_s0 = inlined_call_operand.vmem [shape: bf16[16,128], index: 0, kind: input, shape index: {}]   ;;  %s350_s3 = inlined_call_operand.vmem [shape: bf16[16,128], index: 3, kind: input, shape index: {}]   ;;  %s351_s4 = inlined_call_operand.vmem [shape: f32[1,128], index: 4, kind: input, shape index: {}]   ;;  %s352_s5 = inlined_call_operand.vmem [shape: f32[1,128], index: 5, kind: input, shape index: {}]   ;;  %s353_s6 = inlined_call_operand.vmem [shape: bf16[16,128], index: 6, kind: output, shape index: {}]  }
   0x1   :  { %v249_v0 = vld [vmem:[%s347_s1 + $0x38] sm:$0xff]  ;;  %v248_v1 = vld [vmem:[%s347_s1 + $0x30] sm:$0xff]  ;;  %v247_v2 = vld [vmem:[%s347_s1 + $0x28] sm:$0xff] }
   0x2   :  { %103 = vmatpush.bf16.msra.mxu0 %v249_v0  ;;  %v246_v3 = vld [vmem:[%s347_s1 + $0x20] sm:$0xff]  ;;  %v245_v4 = vld [vmem:[%s347_s1 + $0x18] sm:$0xff]  ;;  %v244_v5 = vld [vmem:[%s347_s1 + $0x10] sm:$0xff]  ;;  %v139_v12 = vand.u32 127, %v138_v9 }
   0x3   :  { %v243_v6 = vld [vmem:[%s347_s1 + $0x8] sm:$0xff]  ;;  %v242_v7 = vld [vmem:[%s347_s1] sm:$0xff] }
   0x4   :  { %v241_v8 = vld [vmem:[%s349_s0] sm:$0xff]  ;;  %vm140_vm0 = vcmp.lt.s32.totalorder %v139_v12, 32 }
   0x5   :  { %v251_v10 = vld [vmem:[%s350_s3] sm:$0xff]  }
   0x6   :  { %104 = vmatpush.bf16.msra.mxu0 %v248_v1  ;;  %v259_v11 = vld [vmem:[%s348_s2] ss:$0 sm:$0xff]  ;;  %v252_v13 = vunpack.c.l.bf16 %v251_v10  ;;  %v253_v18 = vunpack.c.h.bf16 %v251_v10 }
   0x7   :  { %v260_v51 = vld [vmem:[%s351_s4] ss:$0 sm:$0xff] }
   0x8   :  { %v261_v55 = vld [vmem:[%s352_s5] ss:$0 sm:$0xff] }
   0xa   :  { %105 = vmatpush.bf16.msra.mxu0 %v247_v2 }
   0xe   :  { %106 = vmatpush.bf16.msra.mxu0 %v246_v3 }
  0x12   :  { %107 = vmatpush.bf16.msra.mxu0 %v245_v4 }
  0x16   :  { %108 = vmatpush.bf16.msra.mxu0 %v244_v5 }
  0x1a   :  { %109 = vmatpush.bf16.msra.mxu0 %v243_v6 }
  0x1e   :  { %110 = vmatpush.bf16.msra.mxu0 %v242_v7 }
  0x21   :  { %111 = vmatmul.bf16.vlgmr.msra.gmra.mxu0 %v241_v8 }
  0x9e   :  { %v112_v14 = vpop.f32.mrf.mxu0 }
  0x9f   :  { %v130_v15 = vadd.f32 %v259_v11, %v112_v14 }
  0xa1   :  { %v136_v16 = vadd.f32 %v252_v13, %v130_v15 }
  0xa3   :  { %v141_v17 = vsel %vm140_vm0, %v136_v16, 0.0 }
  0xa4   :  { %143 = vadd.xlane.f32.xlu0 %v141_v17 }
  0xa6   :  { %v114_v19 = vpop.f32.mrf.mxu0 }
  0xa7   :  { %v131_v20 = vadd.f32 %v259_v11, %v114_v19 }
  0xa9   :  { %v137_v21 = vadd.f32 %v253_v18, %v131_v20 }
  0xab   :  { %v142_v22 = vsel %vm140_vm0, %v137_v21, 0.0 }
  0xac   :  { %145 = vadd.xlane.f32.xlu0 %v142_v22 }
 0x117   :  { %v144_v23 = vpop.xlane.xlu0 %143 }
 0x118   :  { %v147_v24 = vmul.f32 0.03125, %v144_v23 }
 0x11a   :  { %v149_v25 = vsub.f32 %v136_v16, %v147_v24 }
 0x11c   :  { %v151_v26 = vsel %vm140_vm0, %v149_v25, 0.0 }
 0x11d   :  { %v153_v27 = vmul.f32 %v151_v26, %v151_v26 }
 0x11f   :  { %155 = vadd.xlane.f32.xlu1 %v153_v27  ;;  %v146_v28 = vpop.xlane.xlu0 %145 }
 0x120   :  { %v148_v29 = vmul.f32 0.03125, %v146_v28 }
 0x122   :  { %v150_v30 = vsub.f32 %v137_v21, %v148_v29 }
 0x124   :  { %v152_v31 = vsel %vm140_vm0, %v150_v30, 0.0 }
 0x125   :  { %v154_v32 = vmul.f32 %v152_v31, %v152_v31 }
 0x127   :  { %157 = vadd.xlane.f32.xlu1 %v154_v32 }
 0x192   :  { %v156_v33 = vpop.xlane.xlu1 %155 }
 0x193   :  { %v159_v34 = vmul.f32 0.03125, %v156_v33 }
 0x195   :  { %v161_v35 = vadd.f32 1e-05, %v159_v34 }
 0x197   :  { %262 = vrsqrt.f32 %v161_v35  ;;  %vm169_vm2 = vweird.f32 %v161_v35 }
 0x19a   :  { %v158_v36 = vpop.xlane.xlu1 %157 }
 0x19b   :  { %v160_v37 = vmul.f32 0.03125, %v158_v36 }
 0x19d   :  { %v263_v38 = vpop.eup %262  ;;  %v162_v39 = vadd.f32 1e-05, %v160_v37 }
 0x19e   :  { %v164_v40 = vmul.f32 %v263_v38, %v161_v35  ;;  %vm170_vm1 = vweird.f32 %v263_v38 }
 0x19f   :  { %264 = vrsqrt.f32 %v162_v39  ;;  %vm171_vm3 = vmor %vm169_vm2, %vm170_vm1  ;;  %vm179_vm5 = vweird.f32 %v162_v39 }
 0x1a0   :  { %v165_v41 = vmul.f32 %v263_v38, %v164_v40 }
 0x1a2   :  { %v166_v42 = vmul.f32 0.5, %v165_v41 }
 0x1a4   :  { %v167_v43 = vsub.f32 1.5, %v166_v42 }
 0x1a5   :  { %v265_v44 = vpop.eup %264 }
 0x1a6   :  { %v168_v45 = vmul.f32 %v263_v38, %v167_v43  ;;  %v174_v46 = vmul.f32 %v265_v44, %v162_v39  ;;  %vm180_vm4 = vweird.f32 %v265_v44 }
 0x1a7   :  { %vm181_vm6 = vmor %vm179_vm5, %vm180_vm4 }
 0x1a8   :  { %v175_v47 = vmul.f32 %v265_v44, %v174_v46  ;;  %v172_v48 = vsel %vm171_vm3, %v263_v38, %v168_v45 }
 0x1a9   :  { %v183_v52 = vmul.f32 %v172_v48, %v149_v25 }
 0x1aa   :  { %v176_v49 = vmul.f32 0.5, %v175_v47 }
 0x1ab   :  { %v189_v56 = vmul.f32 %v260_v51, %v183_v52 }
 0x1ac   :  { %v177_v50 = vsub.f32 1.5, %v176_v49 }
 0x1ad   :  { %v195_v59 = vadd.f32 %v261_v55, %v189_v56 }
 0x1ae   :  { %v178_v53 = vmul.f32 %v265_v44, %v177_v50 }
 0x1b0   :  { %v182_v54 = vsel %vm181_vm6, %v265_v44, %v178_v53 }
 0x1b1   :  { %v184_v57 = vmul.f32 %v182_v54, %v150_v30 }
 0x1b3   :  { %v190_v58 = vmul.f32 %v260_v51, %v184_v57 }
 0x1b5   :  { %v196_v60 = vadd.f32 %v261_v55, %v190_v58 }
 0x1b7   :  { %v257_v61 = vpack.c.bf16 %v196_v60, %v195_v59 }
 0x1b9   :  { %258 = vst [vmem:[%s353_s6] sm:$0xff] %v257_v61  }

// kernel: transformer_forward.37
= control target key start
LH: loop header
LB: loop body
LE: loop exit
PB: predicated region body
PF: predicated region fallthrough
CT: control target
= control target key end

     0   :  { %s237_s1 = inlined_call_operand.vmem [shape: bf16[128,128], index: 1, kind: input, shape index: {}]   ;;  %s238_s2 = inlined_call_operand.vmem [shape: f32[1,128], index: 2, kind: input, shape index: {}]   ;;  %s239_s0 = inlined_call_operand.vmem [shape: bf16[16,128], index: 0, kind: input, shape index: {}]   ;;  %s240_s3 = inlined_call_operand.vmem [shape: bf16[16,128], index: 3, kind: output, shape index: {}]  }
   0x1   :  { %v177_v0 = vld [vmem:[%s237_s1 + $0x38] sm:$0xff]  ;;  %v176_v1 = vld [vmem:[%s237_s1 + $0x30] sm:$0xff]  ;;  %v175_v2 = vld [vmem:[%s237_s1 + $0x28] sm:$0xff] }
   0x2   :  { %94 = vmatpush.bf16.msra.mxu0 %v177_v0  ;;  %v174_v3 = vld [vmem:[%s237_s1 + $0x20] sm:$0xff]  ;;  %v173_v4 = vld [vmem:[%s237_s1 + $0x18] sm:$0xff]  ;;  %v172_v5 = vld [vmem:[%s237_s1 + $0x10] sm:$0xff] }
   0x3   :  { %v171_v6 = vld [vmem:[%s237_s1 + $0x8] sm:$0xff]  ;;  %v170_v7 = vld [vmem:[%s237_s1] sm:$0xff] }
   0x4   :  { %v169_v8 = vld [vmem:[%s239_s0] sm:$0xff] }
   0x5   :  { %v183_v10 = vld [vmem:[%s238_s2] ss:$0 sm:$0xff] }
   0x6   :  { %95 = vmatpush.bf16.msra.mxu0 %v176_v1 }
   0xa   :  { %96 = vmatpush.bf16.msra.mxu0 %v175_v2 }
   0xe   :  { %97 = vmatpush.bf16.msra.mxu0 %v174_v3 }
  0x12   :  { %98 = vmatpush.bf16.msra.mxu0 %v173_v4 }
  0x16   :  { %99 = vmatpush.bf16.msra.mxu0 %v172_v5 }
  0x1a   :  { %100 = vmatpush.bf16.msra.mxu0 %v171_v6 }
  0x1e   :  { %101 = vmatpush.bf16.msra.mxu0 %v170_v7 }
  0x21   :  { %102 = vmatmul.bf16.vlgmr.msra.gmra.mxu0 %v169_v8 }
  0x9e   :  { %v103_v9 = vpop.f32.mrf.mxu0 }
  0x9f   :  { %v121_v11 = vadd.f32 %v183_v10, %v103_v9 }
  0xa1   :  { %v123_v14 = vmax.f32 %v121_v11, 0.0 }
  0xa6   :  { %v105_v12 = vpop.f32.mrf.mxu0 }
  0xa7   :  { %v122_v13 = vadd.f32 %v183_v10, %v105_v12 }
  0xa9   :  { %v124_v15 = vmax.f32 %v122_v13, 0.0 }
  0xab   :  { %v181_v16 = vpack.c.bf16 %v124_v15, %v123_v14 }
  0xad   :  { %182 = vst [vmem:[%s240_s3] sm:$0xff] %v181_v16  }

// kernel: transformer_forward.57
= control target key start
LH: loop header
LB: loop body
LE: loop exit
PB: predicated region body
PF: predicated region fallthrough
CT: control target
= control target key end

     0   :  { %s231_s1 = inlined_call_operand.vmem [shape: bf16[128,128], index: 1, kind: input, shape index: {}]   ;;  %s232_s2 = inlined_call_operand.vmem [shape: f32[1,128], index: 2, kind: input, shape index: {}]   ;;  %s233_s0 = inlined_call_operand.vmem [shape: bf16[16,128], index: 0, kind: input, shape index: {}]   ;;  %s234_s3 = inlined_call_operand.vmem [shape: f32[16,128], index: 3, kind: output, shape index: {}]  }
   0x1   :  { %v173_v0 = vld [vmem:[%s231_s1 + $0x38] sm:$0xff]  ;;  %v172_v1 = vld [vmem:[%s231_s1 + $0x30] sm:$0xff]  ;;  %v171_v2 = vld [vmem:[%s231_s1 + $0x28] sm:$0xff] }
   0x2   :  { %94 = vmatpush.bf16.msra.mxu0 %v173_v0  ;;  %v170_v3 = vld [vmem:[%s231_s1 + $0x20] sm:$0xff]  ;;  %v169_v4 = vld [vmem:[%s231_s1 + $0x18] sm:$0xff]  ;;  %v168_v5 = vld [vmem:[%s231_s1 + $0x10] sm:$0xff] }
   0x3   :  { %v167_v6 = vld [vmem:[%s231_s1 + $0x8] sm:$0xff]  ;;  %v166_v7 = vld [vmem:[%s231_s1] sm:$0xff] }
   0x4   :  { %v165_v8 = vld [vmem:[%s233_s0] sm:$0xff] }
   0x5   :  { %v174_v9 = vld [vmem:[%s232_s2] ss:$0 sm:$0xff] }
   0x6   :  { %95 = vmatpush.bf16.msra.mxu0 %v172_v1 }
   0xa   :  { %96 = vmatpush.bf16.msra.mxu0 %v171_v2 }
   0xe   :  { %97 = vmatpush.bf16.msra.mxu0 %v170_v3 }
  0x12   :  { %98 = vmatpush.bf16.msra.mxu0 %v169_v4 }
  0x16   :  { %99 = vmatpush.bf16.msra.mxu0 %v168_v5 }
  0x1a   :  { %100 = vmatpush.bf16.msra.mxu0 %v167_v6 }
  0x1e   :  { %101 = vmatpush.bf16.msra.mxu0 %v166_v7 }
  0x21   :  { %102 = vmatmul.bf16.vlgmr.msra.gmra.mxu0 %v165_v8 }
  0x9e   :  { %v103_v10 = vpop.f32.mrf.mxu0 }
  0x9f   :  { %v121_v11 = vadd.f32 %v174_v9, %v103_v10 }
  0xa1   :  { %123 = vst [vmem:[%s234_s3] sm:$0xff] %v121_v11 }
  0xa6   :  { %v105_v12 = vpop.f32.mrf.mxu0 }
  0xa7   :  { %v122_v13 = vadd.f32 %v174_v9, %v105_v12 }
  0xa9   :  { %124 = vst [vmem:[%s234_s3 + $0x8] sm:$0xff] %v122_v13 }

// kernel: transformer_forward.53
= control target key start
LH: loop header
LB: loop body
LE: loop exit
PB: predicated region body
PF: predicated region fallthrough
CT: control target
= control target key end

     0   :  { %11 = vsyncpa [#allocation3], 0  ;;  %s1226_s0 = inlined_call_operand.vmem [shape: f32[2,1,8], index: 0, kind: input, shape index: {}]   ;;  %s1227_s1 = inlined_call_operand.vmem [shape: bf16[2,8,32], index: 1, kind: input, shape index: {}]   ;;  %s1228_s2 = inlined_call_operand.vmem [shape: bf16[2,8,32], index: 2, kind: input, shape index: {}]   ;;  %s1229_s3 = inlined_call_operand.vmem [shape: bf16[2,8,32], index: 3, kind: input, shape index: {}]   ;;  %s1230_s4 = inlined_call_operand.vmem [shape: bf16[2,8,32], index: 4, kind: output, shape index: {0}]   ;;  %s1231_s5 = inlined_call_operand.hbm [shape: f32[2,4,8,8], index: 5, kind: output, shape index: {1}]  }
   0x1   :  { %13 = vsyncpa [#allocation3 + $0x1], 0  ;;  %s1031_s18 = smov 0   ;;  %s1033_s19 = smov 0  }
   0x2   :  { %s1035_s20 = smov 0   ;;  %s1037_s21 = smov 0  }
   0x3   :  { %s1039_s22 = smov 0   ;;  %s1041_s23 = smov 0  }
   0x4 LB: > { %s807_s24 = sadd.s32 4294967295, %s991_s23   ;;  %s808_s25 = sadd.s32 4294967294, %s991_s23   ;;  %s991_s23 = sphi %s1041_s23, %s19_s23   ;;  %s987_s22 = sphi %s1039_s22, %s1240_s22   ;;  %s983_s21 = sphi %s1037_s21, %s1239_s21   ;;  %s979_s20 = sphi %s1035_s20, %s1238_s20   ;;  %s975_s19 = sphi %s1033_s19, %s1237_s19   ;;  %s971_s18 = sphi %s1031_s18, %s1236_s18  }
   0x5   : > { %s31_s26 = sadd.s32 1, %s987_s22  ;;  %s174_s27 = sadd.s32 1, %s979_s20 }
   0x6   : > { %p33_p0 = scmp.ge.s32.totalorder %s31_s26, 2  ;;  %p184_p1 = scmp.ne.s32.totalorder %s979_s20, %s975_s19 }
   0x7   : > { %p185_p2 = scmp.eq.s32.totalorder %s807_s24, 1  ;;  %p190_p3 = scmp.ne.s32.totalorder %s975_s19, %s971_s18 }
   0x8   : > { %s1242_s26 = smov (%p33_p0, %s31_s26), 0  ;;  %p191_p5 = scmp.eq.s32.totalorder %s808_s25, 1 }
   0x9   : > { %p1071_p4 = por %p185_p2, %p184_p1  ;;  %s169_s29 = ssub.s32 %s987_s22, %s1242_s26 }
   0xa   : > { %p811_p6 = scmp.ge.s32.totalorder %s991_s23, 1  ;;  %p172_p7 = scmp.eq.s32.totalorder %s169_s29, 0 }
   0xb   : > { %p1078_p8 = por %p191_p5, %p190_p3  ;;  %p239_p9 = scmp.lt.s32.totalorder %s991_s23, 3 }
   0xc   : > { %s1084_s6 = scalar_select %p172_p7, %s979_s20, %s174_s27  }
   0xd   : > { %p240_p10 = pnand %p811_p6, %p239_p9 }
   0xe   : > { %p287_p11 = scmp.lt.s32.totalorder (!%p240_p10), %s983_s21, 1  ;;  %s993_s15 = smov (!%p240_p10), 120  }
   0xf   : > { %243 = sbr.rel (%p240_p10) target bundleno = 1097 (0x449), region = 36  ;;  %s994_s16 = smov (!%p240_p10), 112  }
  0x10   : > { %s995_s17 = smov (!%p240_p10), 104   ;;  %s284_s10 = sand.u32 (!%p240_p10), 1, %s975_s19  }
  0x14   : > { %s288_s7 = scalar_select %p287_p11, %s983_s21, 1  ;;  %vm318_vm0 = vcmask 64512   ;;  %v996_v10 = vmov 0   ;;  %vm372_vm3 = vcmask 1043456   ;;  %vm390_vm12 = vcmask 60416  }
  0x16   : > { %s1088_s8 = sshll.u32 %s288_s7, 2  ;;  %s289_s27 = scalar_lea.vmem %s1226_s0, %s288_s7 }
  0x17   : > { %s300_s11 = scalar_lea.vmem %s1228_s2, %s1088_s8  ;;  %s296_s14 = scalar_lea.vmem %s1227_s1, %s1088_s8  ;;  %v316_v9 = vld [vmem:[%s289_s27] sm:$0x1] }
  0x18   : > { %v314_v0 = vld [vmem:[%s300_s11] sm:$0xf]  ;;  %vm317_vm1 = vcmp.gt.f32.partialorder %v316_v9, 0.0  ;;  %s304_s9 = scalar_lea.vmem %s1229_s3, %s1088_s8  ;;  %s812_s11 = sshll.u32 %s284_s10, 5 }
  0x19   : > { %v323_v1 = vsel %vm318_vm0, %v314_v0, 0  ;;  %v398_v2 = vunpack.c.l.b16 %v314_v0  ;;  %v313_v4 = vld [vmem:[%s296_s14] sm:$0xf]  ;;  %v339_v11 = vsel %vm317_vm1, 1, %v996_v10  ;;  %s1142_s12 = scalar_lea.vmem [#allocation2], %s812_s11 }
  0x1a   : > { %332 = vmatpush.bf16.xpose.msra.mxu0 %v323_v1  ;;  %v393_v5 = vunpack.c.l.b16 %v313_v4  ;;  %v340_v13 = vperm.slane %v339_v11, 0  ;;  %v315_v34 = vld [vmem:[%s304_s9] sm:$0xf]  ;;  %s665_s29 = sshll.u32 %s1142_s12, 4  ;;  %s649_s9 = scalar_lea.sflag [#allocation3], %s284_s10  ;;  %s666_s29 = int_to_ptr.vmem [resolvable:$true] %s665_s29 }
  0x1b   : > { %v399_v3 = vpack.c.b16 %v398_v2, %v398_v2  ;;  %v374_v36 = vsel %vm372_vm3, %v315_v34, 0  ;;  %v451_v54 = vunpack.c.l.b16 %v315_v34 }
  0x1c   : > { %v394_v6 = vpack.c.b16 %v393_v5, %v393_v5  ;;  %vm1110_vm2 = vcmp.eq.s32.totalorder %v340_v13, 1  ;;  %383 = vmatpush.bf16.msra.mxu1 %v374_v36 }
  0x1d   : > { %400 = vrot.lane.b32.xlu1 %v399_v3, %s993_s15  ;;  %483 = vrot.lane.b32.xlu2 %v399_v3, %s994_s16  ;;  %v1140_v57 = vpack.c.b16 %v451_v54, %v451_v54 }
  0x21   : > { %817 = vmatmul.msk.bf16.vlgmr.msra.gmra.mxu0 %vm318_vm0, %v313_v4 }
  0x25   : > { %395 = vrot.lane.b32.xlu1 %v394_v6, %s993_s15  ;;  %563 = vrot.lane.b32.xlu2 %v399_v3, %s995_s17 }
  0x2d   : > { %561 = vrot.lane.b32.xlu1 %v394_v6, %s995_s17 }
  0x77   : > { %v484_v20 = vpop.permute.xlu2 %483 }
  0x78   : > { %v489_v35 = vsel %vm318_vm0, %v484_v20, 0 }
  0x79   : > { %498 = vmatpush.bf16.xpose.msrb.mxu1 %v489_v35 }
  0x7f   : > { %v564_v21 = vpop.permute.xlu2 %563 }
  0x80   : > { %v569_v22 = vsel %vm318_vm0, %v564_v21, 0 }
  0x81   : > { %578 = vmatpush.bf16.xpose.msrb.mxu0 %v569_v22 }
  0x8f   : > { %v401_v7 = vpop.permute.xlu1 %400 }
  0x90   : > { %v406_v8 = vsel %vm318_vm0, %v401_v7, 0 }
  0x91   : > { %415 = vmatpush.bf16.xpose.msra.mxu2 %v406_v8 }
  0x97   : > { %v396_v12 = vpop.permute.xlu1 %395 }
  0x98   : > { %819 = vmatmul.msk.bf16.vlgmr.msra.gmra.mxu2 %vm318_vm0, %v396_v12 }
  0x9e   : > { %v334_v14 = vpop.f32.mrf.mxu0 }
  0x9f   : > { %v338_v16 = vmul.f32 0.35355338, %v334_v14  ;;  %v562_v23 = vpop.permute.xlu1 %561 }
  0xa0   : > { %825 = vmatmul.msk.bf16.vlgmr.msrb.gmra.mxu0 %vm318_vm0, %v562_v23 }
  0xa1   : > { %v342_v17 = vsel %vm1110_vm2, %v338_v16, -1e+30 }
  0xa2   : > { %v343_v18 = vsel %vm318_vm0, %v342_v17, -inf }
  0xa3   : > { %344 = vmax.xlane.f32.xlu0 %v343_v18 }
  0xa6   : > { %v336_v19 = vpop.f32.mrf.mxu0 }
 0x116   : > { %v345_v24 = vpop.xlane.xlu0 %344 }
 0x117   : > { %v346_v25 = vsub.f32 %v342_v17, %v345_v24 }
 0x119   : > { %v347_v26 = vmul.f32 1.442695, %v346_v25 }
 0x11b   : > { %897 = vpow2.f32 %v347_v26  ;;  %v417_v27 = vpop.f32.mrf.mxu2 }
 0x11c   : > { %v421_v28 = vmul.f32 0.35355338, %v417_v27 }
 0x11d   : > { %v580_v37 = vpop.f32.mrf.mxu0 }
 0x11e   : > { %v422_v29 = vsel %vm1110_vm2, %v421_v28, -1e+30  ;;  %v584_v38 = vmul.f32 0.35355338, %v580_v37 }
 0x11f   : > { %v423_v30 = vsel %vm318_vm0, %v422_v29, -inf }
 0x120   : > { %424 = vmax.xlane.f32.xlu2 %v423_v30  ;;  %v1132_v41 = vsel %vm1110_vm2, %v584_v38, -1e+30 }
 0x121   : > { %v898_v31 = vpop.eup %897  ;;  %v586_v42 = vsel %vm318_vm0, %v1132_v41, -inf }
 0x122   : > { %v349_v32 = vsel %vm318_vm0, %v898_v31, 0.0 }
 0x123   : > { %350 = vadd.xlane.f32.xlu0 %v349_v32  ;;  %v419_v33 = vpop.f32.mrf.mxu2 }
 0x125   : > { %v582_v45 = vpop.f32.mrf.mxu0 }
 0x137   : > { %481 = vrot.lane.b32.xlu0 %v394_v6, %s994_s16 }
 0x161   : > { %587 = vmax.xlane.f32.xlu0 %v586_v42 }
 0x175   : > { %613 = vrot.lane.b32.xlu0 %v1140_v57, %s995_s17  ;;  %s1159_s17 = scalar_lea.vmem %s1230_s4, %s1088_s8  ;;  %s997_s8 = smov 24  }
 0x193   : > { %v425_v39 = vpop.xlane.xlu2 %424 }
 0x194   : > { %v426_v40 = vsub.f32 %v422_v29, %v425_v39 }
 0x196   : > { %v351_v43 = vpop.xlane.xlu0 %350  ;;  %v427_v44 = vmul.f32 1.442695, %v426_v40 }
 0x197   : > { %899 = vrcp.f32 %v351_v43  ;;  %v363_v51 = vand.u32 2147483648, %v351_v43  ;;  %v361_v53 = vand.u32 2147483647, %v351_v43  ;;  %vm357_vm5 = vweird.f32 %v351_v43 }
 0x198   : > { %901 = vpow2.f32 %v427_v44 }
 0x199   : > { %v364_v56 = vor.u32 1.1754944e-38, %v363_v51  ;;  %vm362_vm7 = vcmp.eq.f32.partialorder %v361_v53, 8.507059e+37 }
 0x19d   : > { %v900_v46 = vpop.eup %899 }
 0x19e   : > { %v902_v47 = vpop.eup %901  ;;  %v353_v48 = vmul.f32 %v900_v46, %v351_v43  ;;  %vm358_vm4 = vweird.f32 %v900_v46 }
 0x19f   : > { %v429_v49 = vsel %vm318_vm0, %v902_v47, 0.0  ;;  %vm359_vm6 = vmor %vm357_vm5, %vm358_vm4 }
 0x1a0   : > { %v354_v50 = vsub.f32 1.0, %v353_v48  ;;  %430 = vadd.xlane.f32.xlu2 %v429_v49 }
 0x1a2   : > { %v355_v52 = vmul.f32 %v900_v46, %v354_v50 }
 0x1a4   : > { %v356_v55 = vadd.f32 %v900_v46, %v355_v52 }
 0x1a6   : > { %v360_v58 = vsel %vm359_vm6, %v900_v46, %v356_v55 }
 0x1a7   : > { %v365_v59 = vsel %vm362_vm7, %v364_v56, %v360_v58 }
 0x1a8   : > { %v366_v60 = vmul.f32 %v898_v31, %v365_v59 }
 0x1a9   : > { %v482_v62 = vpop.permute.xlu0 %481 }
 0x1aa   : > { %367 = vst.msk [vmem:[%s1142_s12] sm:$0xff] %vm318_vm0, %v366_v60  ;;  %v368_v61 = vpack.c.bf16 %v366_v60, %v366_v60 }
 0x1ac   : > { %818 = vmatmul.msk.bf16.vlgmr.msra.gmra.mxu1 %vm318_vm0, %v368_v61 }
 0x1bc   : > { %822 = vmatmul.msk.bf16.vlgmr.msrb.gmra.mxu1 %vm318_vm0, %v482_v62 }
 0x1d4   : > { %v588_v13 = vpop.xlane.xlu0 %587 }
 0x1d5   : > { %v589_v16 = vsub.f32 %v1132_v41, %v588_v13 }
 0x1d7   : > { %v590_v17 = vmul.f32 1.442695, %v589_v16 }
 0x1e7   : > { %v614_v25 = vpop.permute.xlu0 %613 }
 0x1e8   : > { %v619_v26 = vsel %vm372_vm3, %v614_v25, 0 }
 0x1e9   : > { %628 = vmatpush.bf16.msrb.mxu2 %v619_v26 }
 0x213   : > { %v431_v63 = vpop.xlane.xlu2 %430 }
 0x214   : > { %903 = vrcp.f32 %v431_v63  ;;  %v443_v2 = vand.u32 2147483648, %v431_v63  ;;  %vm437_vm8 = vweird.f32 %v431_v63  ;;  %v441_v4 = vand.u32 2147483647, %v431_v63 }
 0x215   : > { %905 = vpow2.f32 %v590_v17 }
 0x216   : > { %v444_v6 = vor.u32 1.1754944e-38, %v443_v2  ;;  %vm442_vm11 = vcmp.eq.f32.partialorder %v441_v4, 8.507059e+37 }
 0x21a   : > { %v904_v0 = vpop.eup %903 }
 0x21b   : > { %v433_v1 = vmul.f32 %v904_v0, %v431_v63  ;;  %vm438_vm9 = vweird.f32 %v904_v0  ;;  %v906_v22 = vpop.eup %905 }
 0x21c   : > { %vm439_vm10 = vmor %vm437_vm8, %vm438_vm9  ;;  %v592_v24 = vsel %vm318_vm0, %v906_v22, 0.0 }
 0x21d   : > { %v434_v3 = vsub.f32 1.0, %v433_v1 }
 0x21f   : > { %v435_v5 = vmul.f32 %v904_v0, %v434_v3 }
 0x221   : > { %v436_v7 = vadd.f32 %v904_v0, %v435_v5 }
 0x223   : > { %v440_v8 = vsel %vm439_vm10, %v904_v0, %v436_v7 }
 0x224   : > { %v445_v9 = vsel %vm442_vm11, %v444_v6, %v440_v8 }
 0x225   : > { %v1150_v10 = vmul.f32 %v902_v47, %v445_v9 }
 0x227   : > { %820 = vst.msk [vmem:[%s1142_s12 + $0x8] sm:$0xff] %vm318_vm0, %v1150_v10  ;;  %v449_v53 = vpack.c.bf16 %v1150_v10, %v1150_v10 }
 0x229   : > { %v385_v11 = vpop.f32.mrf.mxu1 }
 0x22a   : > { %v389_v12 = vpack.c.bf16 %v385_v11, %v385_v11 }
 0x22c   : > { %391 = vst.msk [vmem:[%s1159_s17] sm:$0xf] %vm390_vm12, %v389_v12 }
 0x231   : > { %v387_v14 = vpop.f32.mrf.mxu1 }
 0x239   : > { %v500_v18 = vpop.f32.mrf.mxu1 }
 0x23a   : > { %v504_v19 = vmul.f32 0.35355338, %v500_v18 }
 0x23c   : > { %v505_v20 = vsel %vm1110_vm2, %v504_v19, -1e+30 }
 0x23d   : > { %v506_v21 = vsel %vm318_vm0, %v505_v20, -inf }
 0x23e   : > { %507 = vmax.xlane.f32.xlu1 %v506_v21 }
 0x241   : > { %v502_v23 = vpop.f32.mrf.mxu1 }
 0x246   : > { %593 = vadd.xlane.f32.xlu1 %v592_v24 }
 0x25f   : > { %533 = vrot.lane.b32.xlu1 %v1140_v57, %s994_s16  ;;  %s833_s16 = sshll.u32 %s983_s21, 5 }
 0x260   : > { %s664_s27 = scalar_lea.hbm %s1231_s5, %s833_s16 }
 0x261   : > { %s667_s7 = sshll.u32 %s664_s27, 4  ;;  %s668_s7 = int_to_ptr.hbm [resolvable:$true] %s667_s7 }
 0x262   : > { %s927_s11 = sshra.s32 %s668_s7, 4  ;;  %s928_s11 = int_to_ptr.hbm [resolvable:$true] %s927_s11 }
 0x263   : > { %s929_s13 = scalar_lea.hbm %s928_s11, 32  ;;  %p934_p1 = scmp.lt.s32.totalorder %s928_s11, %s1231_s5 }
 0x264   : > { %p930_p12 = scmp.ne.s32.totalorder %s928_s11, %s929_s13 }
 0x266   : > { %p931_p13 = pnand %p930_p12, %p1071_p4 }
 0x268   : > { %p932_p0 = pneg %p931_p13 }
 0x2b1   : > { %v508_v27 = vpop.xlane.xlu1 %507 }
 0x2b2   : > { %v509_v28 = vsub.f32 %v505_v20, %v508_v27 }
 0x2b4   : > { %v510_v29 = vmul.f32 1.442695, %v509_v28 }
 0x2b6   : > { %907 = vpow2.f32 %v510_v29 }
 0x2b9   : > { %v594_v15 = vpop.xlane.xlu1 %593 }
 0x2ba   : > { %909 = vrcp.f32 %v594_v15  ;;  %v606_v35 = vand.u32 2147483648, %v594_v15  ;;  %v604_v37 = vand.u32 2147483647, %v594_v15  ;;  %vm600_vm14 = vweird.f32 %v594_v15 }
 0x2bc   : > { %v908_v30 = vpop.eup %907  ;;  %v607_v39 = vor.u32 1.1754944e-38, %v606_v35  ;;  %vm605_vm1 = vcmp.eq.f32.partialorder %v604_v37, 8.507059e+37 }
 0x2bd   : > { %v512_v31 = vsel %vm318_vm0, %v908_v30, 0.0 }
 0x2be   : > { %513 = vadd.xlane.f32.xlu2 %v512_v31 }
 0x2c0   : > { %v910_v32 = vpop.eup %909 }
 0x2c1   : > { %v596_v33 = vmul.f32 %v910_v32, %v594_v15  ;;  %vm601_vm13 = vweird.f32 %v910_v32 }
 0x2c2   : > { %vm602_vm15 = vmor %vm600_vm14, %vm601_vm13 }
 0x2c3   : > { %v597_v34 = vsub.f32 1.0, %v596_v33 }
 0x2c5   : > { %v598_v36 = vmul.f32 %v910_v32, %v597_v34 }
 0x2c7   : > { %v599_v38 = vadd.f32 %v910_v32, %v598_v36 }
 0x2c9   : > { %v603_v40 = vsel %vm602_vm15, %v910_v32, %v599_v38 }
 0x2ca   : > { %v608_v41 = vsel %vm605_vm1, %v607_v39, %v603_v40 }
 0x2cb   : > { %v609_v42 = vmul.f32 %v906_v22, %v608_v41 }
 0x2cd   : > { %826 = vst.msk [vmem:[%s1142_s12 + $0x18] sm:$0xff] %vm318_vm0, %v609_v42  ;;  %v612_v43 = vpack.c.bf16 %v609_v42, %v609_v42 }
 0x2cf   : > { %827 = vmatmul.msk.bf16.vlgmr.msrb.gmra.mxu2 %vm318_vm0, %v612_v43 }
 0x2d1   : > { %v534_v45 = vpop.permute.xlu1 %533 }
 0x2d2   : > { %v539_v49 = vsel %vm372_vm3, %v534_v45, 0 }
 0x2d6   : > { %453 = vrot.lane.b32.xlu2 %v1140_v57, %s993_s15  ;;  %s998_s15 = smov 8  }
 0x331   : > { %v514_v44 = vpop.xlane.xlu2 %513 }
 0x332   : > { %911 = vrcp.f32 %v514_v44  ;;  %v526_v52 = vand.u32 2147483648, %v514_v44  ;;  %v524_v55 = vand.u32 2147483647, %v514_v44  ;;  %vm520_vm4 = vweird.f32 %v514_v44 }
 0x334   : > { %v527_v57 = vor.u32 1.1754944e-38, %v526_v52 }
 0x338   : > { %v912_v46 = vpop.eup %911 }
 0x339   : > { %v516_v47 = vmul.f32 %v912_v46, %v514_v44  ;;  %v454_v48 = vpop.permute.xlu2 %453  ;;  %vm521_vm2 = vweird.f32 %v912_v46 }
 0x33a   : > { %v459_v50 = vsel %vm372_vm3, %v454_v48, 0  ;;  %vm522_vm5 = vmor %vm520_vm4, %vm521_vm2  ;;  %vm525_vm3 = vcmp.eq.f32.partialorder %v524_v55, 8.507059e+37 }
 0x33b   : > { %v517_v51 = vsub.f32 1.0, %v516_v47  ;;  %468 = vmatpush.bf16.msra.mxu3 %v459_v50 }
 0x33d   : > { %v518_v54 = vmul.f32 %v912_v46, %v517_v51 }
 0x33e   : > { %821 = vmatmul.msk.bf16.vlgmr.msra.gmra.mxu3 %vm318_vm0, %v449_v53 }
 0x33f   : > { %548 = vmatpush.bf16.msrb.mxu3 %v539_v49  ;;  %v519_v56 = vadd.f32 %v912_v46, %v518_v54 }
 0x341   : > { %v523_v58 = vsel %vm522_vm5, %v912_v46, %v519_v56 }
 0x342   : > { %v528_v59 = vsel %vm525_vm3, %v527_v57, %v523_v58 }
 0x343   : > { %v529_v60 = vmul.f32 %v908_v30, %v528_v59 }
 0x345   : > { %823 = vst.msk [vmem:[%s1142_s12 + $0x10] sm:$0xff] %vm318_vm0, %v529_v60  ;;  %v532_v61 = vpack.c.bf16 %v529_v60, %v529_v60 }
 0x34e   : > { %824 = vmatmul.msk.bf16.vlgmr.msrb.gmra.mxu3 %vm318_vm0, %v532_v61 }
 0x352   : > { %v630_v62 = vpop.f32.mrf.mxu2 }
 0x353   : > { %v634_v63 = vpack.c.bf16 %v630_v62, %v630_v62 }
 0x355   : > { %636 = vrot.lane.b32.xlu1 %v634_v63, %s997_s8  ;;  %s933_s8 = scalar_lea.hbm %s1231_s5, 64 }
 0x356   : > { %p935_p2 = scmp.lt.s32.totalorder %s933_s8, %s929_s13 }
 0x358   : > { %p936_p3 = por %p935_p2, %p934_p1 }
 0x35a   : > { %v632_v0 = vpop.f32.mrf.mxu2  ;;  %p937_p5 = pnand %p936_p3, %p932_p0 }
 0x3c1   : > { %v470_v1 = vpop.f32.mrf.mxu3 }
 0x3c2   : > { %v474_v2 = vpack.c.bf16 %v470_v1, %v470_v1 }
 0x3c4   : > { %476 = vrot.lane.b32.xlu2 %v474_v2, %s998_s15 }
 0x3c9   : > { %v472_v3 = vpop.f32.mrf.mxu3 }
 0x3ca   : > { %940 = shalt.err (!%p937_p5)
}
 0x3cb   : > { %s999_s10 = smov 128   ;;  %s1000_s12 = smov 16   ;;  %vm479_vm0 = vcmask 126016   ;;  %vm559_vm6 = vcmask 191616   ;;  %vm639_vm7 = vcmask 257216   ;;  %v637_v9 = vpop.permute.xlu1 %636 }
 0x3cc   : > { %834 = dma.vmem_to_hbm [thread:$0]  (%p1071_p4), %s666_s29, 512, %s668_s7, %s649_s9, %s999_s10, %s999_s10, %s998_s15  }
 0x3d1   : > { %v550_v4 = vpop.f32.mrf.mxu3 }
 0x3d2   : > { %v554_v5 = vpack.c.bf16 %v550_v4, %v550_v4 }
 0x3d4   : > { %556 = vrot.lane.b32.xlu0 %v554_v5, %s1000_s12 }
 0x3d9   : > { %v552_v6 = vpop.f32.mrf.mxu3 }
 0x41e   : > { %v477_v7 = vpop.permute.xlu2 %476 }
 0x41f   : > { %480 = vst.msk [vmem:[%s1159_s17] sm:$0xf] %vm479_vm0, %v477_v7 }
 0x446   : > { %v557_v8 = vpop.permute.xlu0 %556 }
 0x447   : > { %560 = vst.msk [vmem:[%s1159_s17] sm:$0xf] %vm559_vm6, %v557_v8 }
 0x448   : > { %640 = vst.msk [vmem:[%s1159_s17] sm:$0xf] %vm639_vm7, %v637_v9 }
 0x449 PF: > { %p840_p6 = scmp.ge.s32.totalorder %s991_s23, 2  ;;  %s692_s28 = sand.u32 1, %s971_s18  }
 0x44a   : > { %s693_s15 = scalar_lea.sflag [#allocation3], %s692_s28 }
 0x44b   : > { %p837_p4 = pnand %p840_p6, %p1078_p8 }
 0x44d   : > { %p838_p7 = pneg %p837_p4 }
 0x44f   : > { %966 = dma.done.wait (%p838_p7), %s693_s15, 512  }
 0x450   : > { %968 = vsyncadd (%p838_p7), %s693_s15, 4294966784  ;;  %s19_s23 = sadd.s32 1, %s991_s23   ;;  %s1236_s18 = smov %s975_s19 }
 0x451   : > { %p16_p9 = scmp.ge.s32.totalorder %s19_s23, 4   ;;  %s1237_s19 = smov %s979_s20 }
 0x452   : > { %s1238_s20 = smov %s1084_s6  ;;  %s1239_s21 = smov %s987_s22 }
 0x453   : > { %s1240_s22 = smov %s1242_s26  ;;  %18 = sbr.rel (!%p16_p9) target bundleno = 4 (0x4), region = 95 }
 0x458   :  { %699 = vsyncpa [#allocation3], 1 }
 0x459   :  { %701 = vsyncpa [#allocation3 + $0x1], 1 }

</bundles_post_ra>
